<compile_context>
chip_gen: v7x
topology: tpu7x:2x2x1
jax: 0.10.0
libtpu: 0.0.40
codegen_flags: <defaults>
</compile_context>

<pallas_src>
import functools

import jax
import jax.numpy as jnp
import numpy as np
from jax.experimental import pallas as pl
from jax.experimental.pallas import tpu as pltpu


def _full_kernel(wt_ref, widx_ref, def_ref, bias_ref, out_ref, *, transpose_def):
    # wt_ref  : VMEM (3, K, NW) bf16 — hi/mid/lo planes of W^T, VMEM-resident
    # widx_ref: VMEM (1, TB)  int32 — flat gather indices (batch on lanes)
    # def_ref : VMEM (TB, K)  f32 if transpose_def else (K, TB) f32
    # bias_ref: VMEM (1, TB)  f32 — pre-gathered bias b[a]
    # out_ref : VMEM (1, TB)  f32 — lane-dense output tile
    NW = wt_ref.shape[2]
    TB = widx_ref.shape[1]

    widx = widx_ref[...]                                           # (1, TB)
    row_ids = jax.lax.broadcasted_iota(jnp.int32, (NW, TB), dimension=0)
    # One-hot in bf16: {0, 1} are exact, operand goes to the MXU untouched.
    onehot = (row_ids == widx).astype(jnp.bfloat16)                # (NW, TB)

    # MXU gather: three single-pass bf16 dots, accumulated in f32.
    # Each column of `onehot` has exactly one nonzero, so every dot output is
    # the selected plane value exactly; hi+mid+lo reconstructs W to ~f32.
    gathered = (
        jnp.dot(wt_ref[0], onehot, preferred_element_type=jnp.float32)
        + jnp.dot(wt_ref[1], onehot, preferred_element_type=jnp.float32)
        + jnp.dot(wt_ref[2], onehot, preferred_element_type=jnp.float32)
    )                                                              # (K, TB)

    if transpose_def:
        # (TB, K) -> (K, TB): rides the XLU slot; avoids a wrapper-side
        # pad+transpose (a full extra HBM read+write of the largest operand).
        def_t = def_ref[...].T
    else:
        def_t = def_ref[...]                                       # (K, TB)

    prod = gathered * def_t                                        # (K, TB)
    out_ref[...] = jnp.sum(prod, axis=0, keepdims=True) + bias_ref[...]


@functools.partial(jax.jit, static_argnames=("tb", "min_pallas_batch"))
def full_forward(W, b, a, bh_pos, def_pos, *, tb=2048, min_pallas_batch=1024):
    """JAX/Pallas equivalent of Full.forward."""
    A, B1, B2, C1, C2 = W.shape
    batch = a.shape[0]
    NW = A * B1 * B2
    K = C1 * C2

    a_i = a.astype(jnp.int32)
    bh0 = bh_pos[:, 0].astype(jnp.int32)
    bh1 = bh_pos[:, 1].astype(jnp.int32)

    if batch < min_pallas_batch:
        # One grid step of fixed Pallas overhead would dominate — plain XLA.
        g = W.astype(jnp.float32)[a_i, bh0, bh1]                   # (batch, C1, C2)
        return (jnp.einsum("bcd,bcd->b", g, def_pos.astype(jnp.float32))
                + b.astype(jnp.float32)[a_i])

    # ---- wrapper glue (tiny arrays / free reshapes only) -------------------
    # 3-plane bf16 split of W^T: W ~= hi + mid + lo to ~24 mantissa bits.
    Wt = W.reshape(NW, K).T.astype(jnp.float32)                    # (K, NW)
    w_hi = Wt.astype(jnp.bfloat16)
    r1 = Wt - w_hi.astype(jnp.float32)
    w_mid = r1.astype(jnp.bfloat16)
    w_lo = (r1 - w_mid.astype(jnp.float32)).astype(jnp.bfloat16)
    w_planes = jnp.stack([w_hi, w_mid, w_lo], axis=0)              # (3, K, NW)

    widx = a_i * (B1 * B2) + bh0 * B2 + bh1                        # (batch,)
    bias_g = b.astype(jnp.float32)[a_i]                            # (batch,)
    def_f = def_pos.astype(jnp.float32).reshape(batch, K)          # free reshape

    # Pad batch up to a multiple of the lane tile tb (batch lives on lanes).
    num_tiles = pl.cdiv(batch, tb)
    batch_p = num_tiles * tb
    pad = batch_p - batch
    widx_p = jnp.pad(widx, (0, pad)).reshape(1, batch_p)           # (1, Bp)
    bias_p = jnp.pad(bias_g, (0, pad)).reshape(1, batch_p)         # (1, Bp)

    # Fast path: def_pos stays in its natural (batch, K) layout and is
    # transposed in-kernel.  Gate on a lane-aligned K; otherwise fall back to
    # the (proven) wrapper transpose.
    transpose_def = (K % 128 == 0)
    if transpose_def:
        def_in = jnp.pad(def_f, ((0, pad), (0, 0)))                # (Bp, K)
        def_spec = pl.BlockSpec((tb, K), lambda i: (i, 0))
    else:
        def_in = jnp.pad(def_f, ((0, pad), (0, 0))).T              # (K, Bp)
        def_spec = pl.BlockSpec((K, tb), lambda i: (0, i))

    kernel = functools.partial(_full_kernel, transpose_def=transpose_def)

    out2 = pl.pallas_call(
        kernel,
        out_shape=jax.ShapeDtypeStruct((1, batch_p), jnp.float32),
        grid_spec=pltpu.PrefetchScalarGridSpec(
            num_scalar_prefetch=0,
            grid=(num_tiles,),
            in_specs=[
                # W planes fully VMEM-resident (constant block index -> the
                # ~small copy should be elided across steps; 76 KB worst case).
                pl.BlockSpec((3, K, NW), lambda i: (0, 0, 0)),
                # per-step tiles, batch on the lane axis
                pl.BlockSpec((1, tb), lambda i: (0, i)),           # widx
                def_spec,                                          # def_pos
                pl.BlockSpec((1, tb), lambda i: (0, i)),           # bias
            ],
            out_specs=pl.BlockSpec((1, tb), lambda i: (0, i)),     # lane-dense
        ),
        compiler_params=pltpu.CompilerParams(
            dimension_semantics=("parallel",)),
    )(w_planes, widx_p, def_in, bias_p)

    return out2.reshape(batch_p)[:batch]


if __name__ == "__main__":
    # Small deterministic setup consistent with the module's __init__.
    a_dims = 5
    b_dims = (4, 5)      # ballhandler-position grid
    c_dims = (8, 16)     # defender-position grid (K = 128, lane-aligned)
    batch = 3000         # > min_pallas_batch -> exercises the Pallas path,
                         # 2 grid tiles at tb=2048 (+ padding of the last one)

    key = jax.random.PRNGKey(0)
    kW, ka, kbh0, kbh1, kd = jax.random.split(key, 5)

    W = jax.random.normal(kW, (a_dims, *b_dims, *c_dims), dtype=jnp.float32)
    b = jnp.zeros((a_dims,), dtype=jnp.float32)   # torch.zeros init

    a = jax.random.randint(ka, (batch,), 0, a_dims, dtype=jnp.int32)
    bh_pos = jnp.stack(
        [jax.random.randint(kbh0, (batch,), 0, b_dims[0], dtype=jnp.int32),
         jax.random.randint(kbh1, (batch,), 0, b_dims[1], dtype=jnp.int32)],
        axis=1)
    def_pos = jax.random.normal(kd, (batch, *c_dims), dtype=jnp.float32)

    out = jax.block_until_ready(full_forward(W, b, a, bh_pos, def_pos))

    # Pure-JAX reference (mirrors the PyTorch einsum + bias gather).
    gathered = W[a, bh_pos[:, 0], bh_pos[:, 1]]            # (batch, C1, C2)
    ref = jnp.einsum("bcd,bcd->b", gathered, def_pos) + b[a]

    np.testing.assert_allclose(np.asarray(out), np.asarray(ref),
                               rtol=1e-5, atol=5e-5)
    print("KERNEL_OK")
</pallas_src>

<mosaic_0001>
module attributes {stable_mosaic.version = 11 : i64} {
  func.func @_full_kernel(%arg0: i32, %arg1: memref<3x128x100xbf16, #tpu.memory_space<vmem>>, %arg2: memref<1x2048xi32, #tpu.memory_space<vmem>>, %arg3: memref<2048x128xf32, #tpu.memory_space<vmem>>, %arg4: memref<1x2048xf32, #tpu.memory_space<vmem>>, %arg5: memref<1x2048xf32, #tpu.memory_space<vmem>>) attributes {dimension_semantics = [#tpu.dimension_semantics<parallel>], iteration_bounds = array<i64: 2>, scalar_prefetch = 0 : i64, scratch_operands = 0 : i64, tpu.core_type = #tpu.core_type<tc>, window_params = [{pipeline_mode = #tpu.pipeline_mode<synchronous>, transform_indices = @transform_0, window_bounds = array<i64: 3, 128, 100>}, {transform_indices = @transform_1, window_bounds = array<i64: 1, 2048>}, {transform_indices = @transform_2, window_bounds = array<i64: 2048, 128>}, {transform_indices = @transform_3, window_bounds = array<i64: 1, 2048>}, {transform_indices = @transform_4, window_bounds = array<i64: 1, 2048>}]} {
    %c0 = arith.constant 0 : index
    %c0_0 = arith.constant 0 : index
    %0 = vector.load %arg2[%c0, %c0_0] : memref<1x2048xi32, #tpu.memory_space<vmem>>, vector<1x2048xi32>
    %1 = tpu.iota {dimensions = array<i32: 0>} : vector<100x2048xi32>
    %2 = vector.broadcast %0 : vector<1x2048xi32> to vector<100x2048xi32>
    %3 = arith.cmpi eq, %1, %2 : vector<100x2048xi32>
    %4 = arith.extui %3 : vector<100x2048xi1> to vector<100x2048xi32>
    %5 = arith.sitofp %4 : vector<100x2048xi32> to vector<100x2048xf32>
    %6 = arith.truncf %5 : vector<100x2048xf32> to vector<100x2048xbf16>
    %c0_1 = arith.constant 0 : index
    %c0_2 = arith.constant 0 : index
    %c0_3 = arith.constant 0 : index
    %7 = vector.load %arg1[%c0_1, %c0_2, %c0_3] : memref<3x128x100xbf16, #tpu.memory_space<vmem>>, vector<1x128x100xbf16>
    %8 = vector.shape_cast %7 : vector<1x128x100xbf16> to vector<128x100xbf16>
    %cst = arith.constant dense<0.000000e+00> : vector<128x2048xf32>
    %9 = tpu.matmul %8, %6, %cst {dimension_numbers = #tpu.dot_dimension_numbers<[1], [0], [0], [1], [0, 0, 1, 1], [], []>} : vector<128x100xbf16>, vector<100x2048xbf16>, vector<128x2048xf32> -> vector<128x2048xf32>
    %c1 = arith.constant 1 : index
    %c0_4 = arith.constant 0 : index
    %c0_5 = arith.constant 0 : index
    %10 = vector.load %arg1[%c1, %c0_4, %c0_5] : memref<3x128x100xbf16, #tpu.memory_space<vmem>>, vector<1x128x100xbf16>
    %11 = vector.shape_cast %10 : vector<1x128x100xbf16> to vector<128x100xbf16>
    %cst_6 = arith.constant dense<0.000000e+00> : vector<128x2048xf32>
    %12 = tpu.matmul %11, %6, %cst_6 {dimension_numbers = #tpu.dot_dimension_numbers<[1], [0], [0], [1], [0, 0, 1, 1], [], []>} : vector<128x100xbf16>, vector<100x2048xbf16>, vector<128x2048xf32> -> vector<128x2048xf32>
    %13 = arith.addf %9, %12 : vector<128x2048xf32>
    %c2 = arith.constant 2 : index
    %c0_7 = arith.constant 0 : index
    %c0_8 = arith.constant 0 : index
    %14 = vector.load %arg1[%c2, %c0_7, %c0_8] : memref<3x128x100xbf16, #tpu.memory_space<vmem>>, vector<1x128x100xbf16>
    %15 = vector.shape_cast %14 : vector<1x128x100xbf16> to vector<128x100xbf16>
    %cst_9 = arith.constant dense<0.000000e+00> : vector<128x2048xf32>
    %16 = tpu.matmul %15, %6, %cst_9 {dimension_numbers = #tpu.dot_dimension_numbers<[1], [0], [0], [1], [0, 0, 1, 1], [], []>} : vector<128x100xbf16>, vector<100x2048xbf16>, vector<128x2048xf32> -> vector<128x2048xf32>
    %17 = arith.addf %13, %16 : vector<128x2048xf32>
    %c0_10 = arith.constant 0 : index
    %c0_11 = arith.constant 0 : index
    %18 = vector.load %arg3[%c0_10, %c0_11] : memref<2048x128xf32, #tpu.memory_space<vmem>>, vector<2048x128xf32>
    %19 = tpu.transpose %18, [1, 0] : vector<2048x128xf32> -> vector<128x2048xf32>
    %20 = arith.mulf %17, %19 : vector<128x2048xf32>
    %cst_12 = arith.constant dense<0.000000e+00> : vector<2048xf32>
    %21 = vector.multi_reduction <add>, %20, %cst_12 [0] : vector<128x2048xf32> to vector<2048xf32>
    %22 = vector.shape_cast %21 : vector<2048xf32> to vector<1x2048xf32>
    %c0_13 = arith.constant 0 : index
    %c0_14 = arith.constant 0 : index
    %23 = vector.load %arg4[%c0_13, %c0_14] : memref<1x2048xf32, #tpu.memory_space<vmem>>, vector<1x2048xf32>
    %24 = arith.addf %22, %23 : vector<1x2048xf32>
    %c0_15 = arith.constant 0 : index
    %c0_16 = arith.constant 0 : index
    %25 = vector.load %arg5[%c0_15, %c0_16] : memref<1x2048xf32, #tpu.memory_space<vmem>>, vector<1x2048xf32>
    tpu.vector_store %arg5[%c0_15, %c0_16], %24 {strides = array<i32>} : memref<1x2048xf32, #tpu.memory_space<vmem>>, vector<1x2048xf32>,
    return
  }
  func.func @transform_0(%arg0: i32) -> (i32, i32, i32) {
    %c0_i32 = arith.constant 0 : i32
    %c0_i32_0 = arith.constant 0 : i32
    %c0_i32_1 = arith.constant 0 : i32
    %c0_i32_2 = arith.constant 0 : i32
    return %c0_i32, %c0_i32_0, %c0_i32_1 : i32, i32, i32
  }
  func.func @transform_1(%arg0: i32) -> (i32, i32) {
    %c0_i32 = arith.constant 0 : i32
    %c0_i32_0 = arith.constant 0 : i32
    return %c0_i32, %arg0 : i32, i32
  }
  func.func @transform_2(%arg0: i32) -> (i32, i32) {
    %c0_i32 = arith.constant 0 : i32
    %c0_i32_0 = arith.constant 0 : i32
    return %arg0, %c0_i32 : i32, i32
  }
  func.func @transform_3(%arg0: i32) -> (i32, i32) {
    %c0_i32 = arith.constant 0 : i32
    %c0_i32_0 = arith.constant 0 : i32
    return %c0_i32, %arg0 : i32, i32
  }
  func.func @transform_4(%arg0: i32) -> (i32, i32) {
    %c0_i32 = arith.constant 0 : i32
    %c0_i32_0 = arith.constant 0 : i32
    return %c0_i32, %arg0 : i32, i32
  }
}

</mosaic_0001>

<bundles_post_ra>
// kernel: full_forward.1
= control target key start
LH: loop header
LB: loop body
LE: loop exit
PB: predicated region body
PF: predicated region fallthrough
CT: control target
= control target key end

     0   :  { %s7614_s15 = smov 0   ;;  %s11707_s0 = inlined_call_operand.vmem [shape: bf16[3,128,100], index: 0, kind: input, shape index: {}]   ;;  %s11708_s1 = inlined_call_operand.vmem [shape: s32[1,4096], index: 1, kind: input, shape index: {}]   ;;  %s11709_s2 = inlined_call_operand.vmem [shape: f32[4096,128], index: 2, kind: input, shape index: {}]   ;;  %s11710_s3 = inlined_call_operand.vmem [shape: f32[1,4096], index: 3, kind: input, shape index: {}]   ;;  %s11711_s4 = inlined_call_operand.vmem [shape: f32[1,4096], index: 4, kind: output, shape index: {}]  }
   0x1 LB: > { %s5960_s16 = sadd.s32 4294967295, %s7583_s15   ;;  %p5964_p0 = scmp.ge.s32.totalorder %s7583_s15, 1  ;;  %s7583_s15 = sphi %s7614_s15, %s14_s15  }
   0x2   : > { %p183_p1 = scmp.lt.s32.totalorder %s7583_s15, 3 }
   0x4   : > { %p184_p2 = pnand %p5964_p0, %p183_p1 }
   0x6   : > { %187 = sbr.rel (%p184_p2) target bundleno = 1079 (0x437), region = 36 }
   0xd   : > { %s5965_s17 = sshll.u32 %s5960_s16, 4  ;;  %v240_v0 = vlaneseq  ;;  %v11772_v2 = vmov 0   ;;  %v12039_v15 = vmov 0  ;;  %v11786_v16 = vmov 1.0|1.0   ;;  %s5966_s11 = sshll.u32 %s5960_s16, 8 }
   0xe   : > { %p217_p3 = scmp.lt.s32.totalorder %s5965_s17, 31  ;;  %1233 = vmatprep.mubr.bf16.mxu0 %v11772_v2  ;;  %1346 = vmatprep.mubr.bf16.mxu1 %v11772_v2  ;;  %v12042_v17 = vmov 0  ;;  %v12045_v20 = vmov 0  ;;  %v12048_v21 = vmov 0  ;;  %v12051_v22 = vmov 0  ;;  %p222_p4 = scmp.lt.s32.totalorder %s5966_s11, 511 }
   0xf   : > { %v7624_v1 = vshrl.u32 %v240_v0, 7  ;;  %v12054_v23 = vmov 0  ;;  %v12057_v26 = vmov 0  ;;  %v12060_v27 = vmov 0 }
  0x10   : > { %s13306_s17 = smov (!%p217_p3, %s5965_s17), 31  ;;  %v12063_v28 = vmov 0  ;;  %v12066_v30 = vmov 0  ;;  %v12069_v33 = vmov 0  ;;  %v12072_v34 = vmov 0  ;;  %s13308_s11 = smov (!%p222_p4, %s5966_s11), 511 }
  0x11   : > { %12034 = vst [vmem:[#allocation2_spill] sm:$0xff] %v7624_v1  ;;  %v7631_v3 = vsub.s32 1, %v7624_v1  ;;  %v7634_v4 = vsub.s32 3, %v7624_v1  ;;  %v7637_v5 = vsub.s32 0, %v7624_v1  ;;  %s7643_s20 = scalar_lea.vmem %s11708_s1, %s13306_s17  ;;  %v7646_v6 = vadd.s32 8, %v7624_v1  ;;  %s5967_s12 = sshll.u32 %s13308_s11, 3 }
  0x12   : > { %v7649_v7 = vsub.s32 2, %v7624_v1  ;;  %v7652_v8 = vld [vmem:[%s7643_s20] sm:$0xff]  ;;  %v7655_v9 = vadd.s32 16, %v7624_v1  ;;  %v7658_v10 = vadd.s32 24, %v7624_v1  ;;  %v7708_v18 = vadd.s32 32, %v7624_v1  ;;  %s9616_s16 = scalar_lea.vmem %s11709_s2, %s5967_s12  ;;  %s11337_s5 = scalar_lea.vmem %s11710_s3, %s13306_s17 }
  0x13   : > { %12035 = vst [vmem:[#allocation3_spill] sm:$0xff] %v7631_v3  ;;  %12036 = vst [vmem:[#allocation4_spill] sm:$0xff] %v7634_v4  ;;  %v7662_v11 = vrot.slane %v7652_v8, %v7631_v3  ;;  %v7666_v12 = vrot.slane %v7652_v8, %v7634_v4  ;;  %v7670_v13 = vrot.slane %v7652_v8, %v7637_v5  ;;  %v7711_v19 = vadd.s32 40, %v7624_v1  ;;  %s11560_s7 = scalar_lea.vmem %s11711_s4, %s13306_s17 }
  0x14   : > { %12037 = vst [vmem:[#allocation5_spill] sm:$0xff] %v7637_v5  ;;  %12038 = vst [vmem:[#allocation6_spill] sm:$0xff] %v7649_v7  ;;  %v7674_v14 = vrot.slane %v7652_v8, %v7649_v7  ;;  %v7758_v24 = vadd.s32 48, %v7624_v1  ;;  %v7761_v25 = vadd.s32 56, %v7624_v1  ;;  %v7797_v29 = vadd.s32 64, %v7624_v1 }
  0x15   : > { %vm319_vm0 = vcmp.eq.s32.totalorder %v7624_v1, %v7662_v11  ;;  %vm335_vm1 = vcmp.eq.s32.totalorder %v7646_v6, %v7662_v11  ;;  %vm321_vm2 = vcmp.eq.s32.totalorder %v7624_v1, %v7666_v12  ;;  %vm337_vm3 = vcmp.eq.s32.totalorder %v7646_v6, %v7666_v12 }
  0x16   : > { %vm7684_vm4 = vmpackc.low %vm335_vm1, %vm319_vm0  ;;  %vm318_vm5 = vcmp.eq.s32.totalorder %v7624_v1, %v7670_v13  ;;  %vm334_vm6 = vcmp.eq.s32.totalorder %v7646_v6, %v7670_v13  ;;  %vm320_vm7 = vcmp.eq.s32.totalorder %v7624_v1, %v7674_v14  ;;  %vm336_vm8 = vcmp.eq.s32.totalorder %v7646_v6, %v7674_v14 }
  0x17   : > { %v12040_v15 = vsel %vm7684_vm4, 4294967295, %v12039_v15  ;;  %6203 = vmatprep.subr.msk.bf16.mxu0 %vm7684_vm4, %v11786_v16  ;;  %vm7699_vm9 = vmpackc.low %vm337_vm3, %vm321_vm2  ;;  %vm351_vm10 = vcmp.eq.s32.totalorder %v7655_v9, %v7662_v11  ;;  %vm367_vm11 = vcmp.eq.s32.totalorder %v7658_v10, %v7662_v11  ;;  %vm353_vm13 = vcmp.eq.s32.totalorder %v7655_v9, %v7666_v12 }
  0x18   : > { %12041 = vst [vmem:[#allocation7_spill] sm:$0xff] %v12040_v15  ;;  %v12043_v17 = vsel %vm7699_vm9, 4294967295, %v12042_v17  ;;  %6236 = vmatprep.subr.msk.bf16.mxu1 %vm7699_vm9, %v11786_v16  ;;  %vm7716_vm12 = vmpackc.low %vm334_vm6, %vm318_vm5  ;;  %vm369_vm14 = vcmp.eq.s32.totalorder %v7658_v10, %v7666_v12  ;;  %vm350_vm0 = vcmp.eq.s32.totalorder %v7655_v9, %v7670_v13  ;;  %vm366_vm1 = vcmp.eq.s32.totalorder %v7658_v10, %v7670_v13 }
  0x19   : > { %12044 = vst [vmem:[#allocation8_spill] sm:$0xff] %v12043_v17  ;;  %v12046_v20 = vsel %vm7716_vm12, 4294967295, %v12045_v20  ;;  %6205 = vmatpush1.bf16.msk.msra.mxu0 %vm7716_vm12, %v11786_v16  ;;  %vm7727_vm15 = vmpackc.low %vm336_vm8, %vm320_vm7  ;;  %vm352_vm3 = vcmp.eq.s32.totalorder %v7655_v9, %v7674_v14  ;;  %vm368_vm5 = vcmp.eq.s32.totalorder %v7658_v10, %v7674_v14  ;;  %vm383_vm7 = vcmp.eq.s32.totalorder %v7708_v18, %v7662_v11 }
  0x1a   : > { %12047 = vst [vmem:[#allocation9_spill] sm:$0xff] %v12046_v20  ;;  %v12049_v21 = vsel %vm7727_vm15, 4294967295, %v12048_v21  ;;  %6238 = vmatpush1.bf16.msk.msra.mxu1 %vm7727_vm15, %v11786_v16  ;;  %vm7738_vm2 = vmpackc.low %vm367_vm11, %vm351_vm10  ;;  %vm399_vm8 = vcmp.eq.s32.totalorder %v7711_v19, %v7662_v11  ;;  %vm385_vm11 = vcmp.eq.s32.totalorder %v7708_v18, %v7666_v12  ;;  %v7811_v31 = vadd.s32 72, %v7624_v1 }
  0x1b   : > { %12050 = vst [vmem:[#allocation10_spill] sm:$0xff] %v12049_v21  ;;  %v12052_v22 = vsel %vm7738_vm2, 4294967295, %v12051_v22  ;;  %6207 = vmatprep.subr.msk.bf16.mxu0 %vm7738_vm2, %v11786_v16  ;;  %vm7749_vm6 = vmpackc.low %vm369_vm14, %vm353_vm13  ;;  %vm401_vm13 = vcmp.eq.s32.totalorder %v7711_v19, %v7666_v12  ;;  %v7814_v32 = vadd.s32 96, %v7624_v1  ;;  %v7839_v35 = vadd.s32 80, %v7624_v1 }
  0x1c   : > { %12053 = vst [vmem:[#allocation11_spill] sm:$0xff] %v12052_v22  ;;  %v12055_v23 = vsel %vm7749_vm6, 4294967295, %v12054_v23  ;;  %6240 = vmatprep.subr.msk.bf16.mxu1 %vm7749_vm6, %v11786_v16  ;;  %vm7766_vm10 = vmpackc.low %vm366_vm1, %vm350_vm0  ;;  %vm382_vm0 = vcmp.eq.s32.totalorder %v7708_v18, %v7670_v13  ;;  %vm398_vm1 = vcmp.eq.s32.totalorder %v7711_v19, %v7670_v13  ;;  %v12075_v36 = vmov 0 }
  0x1d   : > { %12056 = vst [vmem:[#allocation12_spill] sm:$0xff] %v12055_v23  ;;  %v12058_v26 = vsel %vm7766_vm10, 4294967295, %v12057_v26  ;;  %6209 = vmatpush1.bf16.msk.msra.mxu0 %vm7766_vm10, %v11786_v16  ;;  %vm7777_vm14 = vmpackc.low %vm368_vm5, %vm352_vm3  ;;  %vm384_vm3 = vcmp.eq.s32.totalorder %v7708_v18, %v7674_v14  ;;  %vm400_vm5 = vcmp.eq.s32.totalorder %v7711_v19, %v7674_v14  ;;  %v7855_v37 = vadd.s32 88, %v7624_v1 }
  0x1e   : > { %12059 = vst [vmem:[#allocation13_spill] sm:$0xff] %v12058_v26  ;;  %v12061_v27 = vsel %vm7777_vm14, 4294967295, %v12060_v27  ;;  %6242 = vmatpush1.bf16.msk.msra.mxu1 %vm7777_vm14, %v11786_v16  ;;  %vm7788_vm6 = vmpackc.low %vm399_vm8, %vm383_vm7  ;;  %vm415_vm7 = vcmp.eq.s32.totalorder %v7758_v24, %v7662_v11  ;;  %vm431_vm8 = vcmp.eq.s32.totalorder %v7761_v25, %v7662_v11  ;;  %v12078_v38 = vmov 0 }
  0x1f   : > { %12062 = vst [vmem:[#allocation14_spill] sm:$0xff] %v12061_v27  ;;  %v12064_v28 = vsel %vm7788_vm6, 4294967295, %v12063_v28  ;;  %6211 = vmatprep.subr.msk.bf16.mxu0 %vm7788_vm6, %v11786_v16  ;;  %vm7802_vm10 = vmpackc.low %vm401_vm13, %vm385_vm11  ;;  %vm417_vm13 = vcmp.eq.s32.totalorder %v7758_v24, %v7666_v12  ;;  %vm433_vm6 = vcmp.eq.s32.totalorder %v7761_v25, %v7666_v12  ;;  %v12082_v39 = vmov 0 }
  0x20   : > { %12065 = vst [vmem:[#allocation15_spill] sm:$0xff] %v12064_v28  ;;  %v12067_v30 = vsel %vm7802_vm10, 4294967295, %v12066_v30  ;;  %6244 = vmatprep.subr.msk.bf16.mxu1 %vm7802_vm10, %v11786_v16  ;;  %vm7819_vm11 = vmpackc.low %vm398_vm1, %vm382_vm0  ;;  %vm414_vm0 = vcmp.eq.s32.totalorder %v7758_v24, %v7670_v13  ;;  %v7892_v40 = vsub.s32 5, %v7624_v1  ;;  %v12088_v41 = vmov 0 }
  0x21   : > { %12068 = vst [vmem:[#allocation16_spill] sm:$0xff] %v12067_v30  ;;  %v12070_v33 = vsel %vm7819_vm11, 4294967295, %v12069_v33  ;;  %6213 = vmatpush1.bf16.msk.msra.mxu0 %vm7819_vm11, %v11786_v16  ;;  %vm7830_vm14 = vmpackc.low %vm400_vm5, %vm384_vm3  ;;  %v7914_v42 = vsub.s32 7, %v7624_v1  ;;  %v12094_v43 = vmov 0  ;;  %v11762_v44 = vmov 0.0  }
  0x22   : > { %12071 = vst [vmem:[#allocation17_spill] sm:$0xff] %v12070_v33  ;;  %v12073_v34 = vsel %vm7830_vm14, 4294967295, %v12072_v34  ;;  %6246 = vmatpush1.bf16.msk.msra.mxu1 %vm7830_vm14, %v11786_v16  ;;  %vm7844_vm10 = vmpackc.low %vm431_vm8, %vm415_vm7  ;;  %v7938_v46 = vsub.s32 4, %v7624_v1  ;;  %v12101_v47 = vmov 0  ;;  %v7962_v49 = vsub.s32 6, %v7624_v1 }
  0x23   : > { %12074 = vst [vmem:[#allocation18_spill] sm:$0xff] %v12073_v34  ;;  %v12076_v36 = vsel %vm7844_vm10, 4294967295, %v12075_v36  ;;  %6215 = vmatprep.subr.msk.bf16.mxu0 %vm7844_vm10, %v11786_v16  ;;  %vm7860_vm7 = vmpackc.low %vm433_vm6, %vm417_vm13  ;;  %vm12081_vm6 = vcmp.eq.s32.totalorder %v7761_v25, %v7670_v13  ;;  %v12108_v50 = vmov 0  ;;  %vm12111_vm8 = vcmp.eq.s32.totalorder %v7814_v32, %v7666_v12  ;;  %v8998_v34 = vld [vmem:[%s11707_s0 + $0x70] sm:$0xff]  }
  0x24   : > { %12077 = vst [vmem:[#allocation19_spill] sm:$0xff] %v12076_v36  ;;  %v12079_v38 = vsel %vm7860_vm7, 4294967295, %v12078_v38  ;;  %6248 = vmatprep.subr.msk.bf16.mxu1 %vm7860_vm7, %v11786_v16  ;;  %vm7881_vm13 = vmpackc.low %vm12081_vm6, %vm414_vm0  ;;  %vm12086_vm0 = vcmp.eq.s32.totalorder %v7758_v24, %v7674_v14  ;;  %vm12087_vm6 = vcmp.eq.s32.totalorder %v7761_v25, %v7674_v14  ;;  %v6165_v51 = vsel %vm12111_vm8, 1.0, %v11762_v44 }
  0x25   : > { %12080 = vst [vmem:[#allocation20_spill] sm:$0xff] %v12079_v38  ;;  %v12083_v39 = vsel %vm7881_vm13, 4294967295, %v12082_v39  ;;  %12085 = vst [vmem:[#allocation22_spill] sm:$0xff] %v7892_v40  ;;  %6217 = vmatpush1.bf16.msk.msra.mxu0 %vm7881_vm13, %v11786_v16  ;;  %v7989_v53 = vrot.slane %v7652_v8, %v7892_v40  ;;  %v12115_v54 = vmov 0  ;;  %v8012_v55 = vrot.slane %v7652_v8, %v7914_v42 }
  0x26   : > { %12084 = vst [vmem:[#allocation21_spill] sm:$0xff] %v12083_v39  ;;  %vm7903_vm1 = vmpackc.low %vm12087_vm6, %vm12086_vm0  ;;  %vm12092_vm0 = vcmp.eq.s32.totalorder %v7797_v29, %v7662_v11  ;;  %vm12093_vm6 = vcmp.eq.s32.totalorder %v7811_v31, %v7662_v11  ;;  %v12120_v56 = vmov 0  ;;  %v8033_v59 = vrot.slane %v7652_v8, %v7938_v46 }
  0x27   : > { %v12089_v41 = vsel %vm7903_vm1, 4294967295, %v12088_v41  ;;  %12091 = vst [vmem:[#allocation24_spill] sm:$0xff] %v7914_v42  ;;  %6250 = vmatpush1.bf16.msk.msra.mxu1 %vm7903_vm1, %v11786_v16  ;;  %vm7925_vm5 = vmpackc.low %vm12093_vm6, %vm12092_vm0  ;;  %vm12097_vm1 = vcmp.eq.s32.totalorder %v7814_v32, %v7662_v11  ;;  %vm12099_vm0 = vcmp.eq.s32.totalorder %v7797_v29, %v7666_v12  ;;  %vm12100_vm6 = vcmp.eq.s32.totalorder %v7811_v31, %v7666_v12 }
  0x28   : > { %12090 = vst [vmem:[#allocation23_spill] sm:$0xff] %v12089_v41  ;;  %v12095_v43 = vsel %vm7925_vm5, 4294967295, %v12094_v43  ;;  %v6163_v45 = vsel %vm12097_vm1, 1.0, %v11762_v44  ;;  %12098 = vst [vmem:[#allocation26_spill] sm:$0xff] %v7938_v46  ;;  %6219 = vmatprep.subr.msk.bf16.mxu0 %vm7925_vm5, %v11786_v16  ;;  %vm12104_vm5 = vcmp.eq.s32.totalorder %v7814_v32, %v7670_v13  ;;  %v12126_v60 = vmov 0 }
  0x29   : > { %12096 = vst [vmem:[#allocation25_spill] sm:$0xff] %v12095_v43  ;;  %vm7949_vm3 = vmpackc.low %vm12100_vm6, %vm12099_vm0  ;;  %v6162_v48 = vsel %vm12104_vm5, 1.0, %v11762_v44  ;;  %vm12106_vm0 = vcmp.eq.s32.totalorder %v7797_v29, %v7670_v13  ;;  %vm12107_vm6 = vcmp.eq.s32.totalorder %v7811_v31, %v7670_v13  ;;  %v8029_v57 = vpack.c.bf16 %v6163_v45, %v6163_v45 }
  0x2a   : > { %v12102_v47 = vsel %vm7949_vm3, 4294967295, %v12101_v47  ;;  %12105 = vst [vmem:[#allocation28_spill] sm:$0xff] %v7962_v49  ;;  %6252 = vmatprep.subr.msk.bf16.mxu1 %vm7949_vm3, %v11786_v16  ;;  %vm7973_vm1 = vmpackc.low %vm12107_vm6, %vm12106_vm0  ;;  %vm12112_vm3 = vcmp.eq.s32.totalorder %v7814_v32, %v7674_v14  ;;  %vm12113_vm0 = vcmp.eq.s32.totalorder %v7797_v29, %v7674_v14  ;;  %vm12114_vm6 = vcmp.eq.s32.totalorder %v7811_v31, %v7674_v14 }
  0x2b   : > { %12103 = vst [vmem:[#allocation27_spill] sm:$0xff] %v12102_v47  ;;  %v12109_v50 = vsel %vm7973_vm1, 4294967295, %v12108_v50  ;;  %v6164_v52 = vsel %vm12112_vm3, 1.0, %v11762_v44  ;;  %6221 = vmatpush1.bf16.msk.msra.mxu0 %vm7973_vm1, %v11786_v16  ;;  %vm8000_vm8 = vmpackc.low %vm12114_vm6, %vm12113_vm0  ;;  %vm12118_vm0 = vcmp.eq.s32.totalorder %v7839_v35, %v7662_v11  ;;  %vm12119_vm6 = vcmp.eq.s32.totalorder %v7855_v37, %v7662_v11 }
  0x2c   : > { %12110 = vst [vmem:[#allocation29_spill] sm:$0xff] %v12109_v50  ;;  %v12116_v54 = vsel %vm8000_vm8, 4294967295, %v12115_v54  ;;  %6254 = vmatpush1.bf16.msk.msra.mxu1 %vm8000_vm8, %v11786_v16  ;;  %vm8023_vm3 = vmpackc.low %vm12119_vm6, %vm12118_vm0  ;;  %v1038_v58 = vpack.c.bf16 %v6162_v48, %v6162_v48  ;;  %vm12124_vm0 = vcmp.eq.s32.totalorder %v7839_v35, %v7666_v12  ;;  %vm12125_vm6 = vcmp.eq.s32.totalorder %v7855_v37, %v7666_v12 }
  0x2d   : > { %12117 = vst [vmem:[#allocation30_spill] sm:$0xff] %v12116_v54  ;;  %v12121_v56 = vsel %vm8023_vm3, 4294967295, %v12120_v56  ;;  %12123 = vst [vmem:[#allocation32_spill] sm:$0xff] %v8029_v57  ;;  %6223 = vmatprep.subr.msk.bf16.mxu0 %vm8023_vm3, %v11786_v16  ;;  %v8048_v61 = vpack.c.bf16 %v6165_v51, %v6165_v51  ;;  %v1040_v62 = vpack.c.bf16 %v6164_v52, %v6164_v52  ;;  %v12132_v0 = vmov 0 }
  0x2e   : > { %12122 = vst [vmem:[#allocation31_spill] sm:$0xff] %v12121_v56  ;;  %vm8044_vm5 = vmpackc.low %vm12125_vm6, %vm12124_vm0  ;;  %v8052_v63 = vrot.slane %v7652_v8, %v7962_v49  ;;  %vm12130_vm3 = vcmp.eq.s32.totalorder %v7839_v35, %v7670_v13  ;;  %vm12131_vm0 = vcmp.eq.s32.totalorder %v7855_v37, %v7670_v13  ;;  %vm323_vm13 = vcmp.eq.s32.totalorder %v7624_v1, %v7989_v53 }
  0x2f   : > { %v12127_v60 = vsel %vm8044_vm5, 4294967295, %v12126_v60  ;;  %12129 = vst [vmem:[#allocation34_spill] sm:$0xff] %v8048_v61  ;;  %6256 = vmatprep.subr.msk.bf16.mxu1 %vm8044_vm5, %v11786_v16  ;;  %vm8063_vm6 = vmpackc.low %vm12131_vm0, %vm12130_vm3  ;;  %vm339_vm8 = vcmp.eq.s32.totalorder %v7646_v6, %v7989_v53  ;;  %vm12135_vm5 = vcmp.eq.s32.totalorder %v7839_v35, %v7674_v14  ;;  %vm12136_vm1 = vcmp.eq.s32.totalorder %v7855_v37, %v7674_v14  ;;  %v8116_v14 = vld [vmem:[%s11707_s0 + $0x40] sm:$0xff]  }
  0x30   : > { %12128 = vst [vmem:[#allocation33_spill] sm:$0xff] %v12127_v60  ;;  %v12133_v0 = vsel %vm8063_vm6, 4294967295, %v12132_v0  ;;  %6225 = vmatpush1.bf16.msk.msra.mxu0 %vm8063_vm6, %v11786_v16  ;;  %vm8080_vm3 = vmpackc.low %vm12136_vm1, %vm12135_vm5  ;;  %v12137_v8 = vmov 0  ;;  %vm325_vm0 = vcmp.eq.s32.totalorder %v7624_v1, %v8012_v55  ;;  %vm341_vm7 = vcmp.eq.s32.totalorder %v7646_v6, %v8012_v55 }
  0x31   : > { %12134 = vst [vmem:[#allocation35_spill] sm:$0xff] %v12133_v0  ;;  %v12138_v8 = vsel %vm8080_vm3, 4294967295, %v12137_v8  ;;  %6258 = vmatpush1.bf16.msk.msra.mxu1 %vm8080_vm3, %v11786_v16  ;;  %vm12140_vm6 = vcmask 1041408   ;;  %vm322_vm1 = vcmp.eq.s32.totalorder %v7624_v1, %v8033_v59  ;;  %vm338_vm5 = vcmp.eq.s32.totalorder %v7646_v6, %v8033_v59  ;;  %vm8105_vm2 = vmpackc.low %vm339_vm8, %vm323_vm13 }
  0x32   : > { %12139 = vst [vmem:[#allocation36_spill] sm:$0xff] %v12138_v8  ;;  %6226 = vmatprep.subr.msk.bf16.mxu0 %vm12140_vm6, %v8029_v57  ;;  %vm12141_vm10 = vmmov %vm12140_vm6  ;;  %v12146_v13 = vmov 0  ;;  %v12149_v45 = vmov 0  ;;  %v12152_v48 = vmov 0  ;;  %v12155_v51 = vmov 0 }
  0x33   : > { %v8094_v11 = vsel %vm12141_vm10, %v1038_v58, 0  ;;  %vm12143_vm14 = vmmov %vm12140_vm6  ;;  %v12147_v13 = vsel %vm8105_vm2, 4294967295, %v12146_v13  ;;  %vm324_vm10 = vcmp.eq.s32.totalorder %v7624_v1, %v8052_v63  ;;  %v12158_v52 = vmov 0  ;;  %v8159_v58 = vld [vmem:[%s7643_s20 + $0x8] sm:$0xff] }
  0x34   : > { %12142 = vst [vmem:[#allocation37_spill] sm:$0xff] %v8094_v11  ;;  %6259 = vmatprep.subr.msk.bf16.mxu1 %vm12143_vm14, %v8048_v61  ;;  %vm12144_vm11 = vmmov %vm12140_vm6  ;;  %vm340_vm6 = vcmp.eq.s32.totalorder %v7646_v6, %v8052_v63  ;;  %vm355_vm14 = vcmp.eq.s32.totalorder %v7655_v9, %v7989_v53  ;;  %1214 = vmatpush1.bf16.msra.mxu0 %v8094_v11  ;;  %v12166_v44 = vmov 0  ;;  %v12212_v61 = vmov 0 }
  0x35   : > { %v8103_v12 = vsel %vm12144_vm11, %v1040_v62, 0  ;;  %12148 = vst [vmem:[#allocation39_spill] sm:$0xff] %v12147_v13  ;;  %vm8118_vm3 = vmpackc.low %vm341_vm7, %vm325_vm0  ;;  %vm371_vm11 = vcmp.eq.s32.totalorder %v7658_v10, %v7989_v53  ;;  %vm357_vm7 = vcmp.eq.s32.totalorder %v7655_v9, %v8012_v55  ;;  %vm373_vm0 = vcmp.eq.s32.totalorder %v7658_v10, %v8012_v55  ;;  %6269 = vmatprep.subr.msk.bf16.mxu0 %vm8105_vm2, %v11786_v16 }
  0x36   : > { %12145 = vst [vmem:[#allocation38_spill] sm:$0xff] %v8103_v12  ;;  %v12150_v45 = vsel %vm8118_vm3, 4294967295, %v12149_v45  ;;  %vm8127_vm8 = vmpackc.low %vm338_vm5, %vm322_vm1  ;;  %1327 = vmatpush1.bf16.msra.mxu1 %v8103_v12  ;;  %vm354_vm1 = vcmp.eq.s32.totalorder %v7655_v9, %v8033_v59  ;;  %vm370_vm5 = vcmp.eq.s32.totalorder %v7658_v10, %v8033_v59  ;;  %vm12161_vm2 = vcmask 818176  }
  0x37   : > { %12151 = vst [vmem:[#allocation40_spill] sm:$0xff] %v12150_v45  ;;  %v12153_v48 = vsel %vm8127_vm8, 4294967295, %v12152_v48  ;;  %vm8139_vm15 = vmpackc.low %vm340_vm6, %vm324_vm10  ;;  %6302 = vmatprep.subr.msk.bf16.mxu1 %vm8118_vm3, %v11786_v16  ;;  %vm356_vm10 = vcmp.eq.s32.totalorder %v7655_v9, %v8052_v63  ;;  %vm372_vm6 = vcmp.eq.s32.totalorder %v7658_v10, %v8052_v63  ;;  %6227 = vmatmul.mubr.msk.bf16.vlgmr.msra.gmra.mrb[0].mxu0 %vm12161_vm2, %v8116_v14  ;;  %v12162_v62 = vmov 0 }
  0x38   : > { %12154 = vst [vmem:[#allocation41_spill] sm:$0xff] %v12153_v48  ;;  %v12156_v51 = vsel %vm8139_vm15, 4294967295, %v12155_v51  ;;  %vm8150_vm13 = vmpackc.low %vm371_vm11, %vm355_vm14  ;;  %vm387_vm14 = vcmp.eq.s32.totalorder %v7708_v18, %v7989_v53  ;;  %vm403_vm11 = vcmp.eq.s32.totalorder %v7711_v19, %v7989_v53  ;;  %6271 = vmatpush1.bf16.msk.msra.mxu0 %vm8127_vm8, %v11786_v16  ;;  %1243 = vmatprep.mubr.bf16.mxu0 %v11772_v2  ;;  %v12169_v45 = vmov 0 }
  0x39   : > { %12157 = vst [vmem:[#allocation42_spill] sm:$0xff] %v12156_v51  ;;  %v12159_v52 = vsel %vm8150_vm13, 4294967295, %v12158_v52  ;;  %vm8163_vm12 = vmpackc.low %vm373_vm0, %vm357_vm7  ;;  %vm405_vm7 = vcmp.eq.s32.totalorder %v7711_v19, %v8012_v55  ;;  %v8194_v48 = vrot.slane %v8159_v58, %v7631_v3  ;;  %6273 = vmatprep.subr.msk.bf16.mxu0 %vm8150_vm13, %v11786_v16  ;;  %v12172_v13 = vmov 0 }
  0x3a   : > { %12160 = vst [vmem:[#allocation43_spill] sm:$0xff] %v12159_v52  ;;  %v12163_v62 = vsel %vm8163_vm12, 4294967295, %v12162_v62  ;;  %vm12165_vm3 = vmmov %vm12161_vm2  ;;  %vm389_vm2 = vcmp.eq.s32.totalorder %v7708_v18, %v8012_v55  ;;  %v8210_v3 = vrot.slane %v8159_v58, %v7634_v4  ;;  %v12175_v52 = vmov 0 }
  0x3b   : > { %12164 = vst [vmem:[#allocation44_spill] sm:$0xff] %v12163_v62  ;;  %6260 = vmatmul.mubr.msk.bf16.vlgmr.msra.gmra.mrb[0].mxu1 %vm12165_vm3, %v8116_v14  ;;  %vm8176_vm9 = vmpackc.low %vm370_vm5, %vm354_vm1  ;;  %vm386_vm1 = vcmp.eq.s32.totalorder %v7708_v18, %v8033_v59  ;;  %v12179_v4 = vmov 0  ;;  %v12203_v62 = vmov 0  ;;  %v12206_v51 = vmov 0.0  }
  0x3c   : > { %v12167_v44 = vsel %vm8176_vm9, 4294967295, %v12166_v44  ;;  %6304 = vmatpush1.bf16.msk.msra.mxu1 %vm8139_vm15, %v11786_v16  ;;  %vm8188_vm3 = vmpackc.low %vm372_vm6, %vm356_vm10  ;;  %1356 = vmatprep.mubr.bf16.mxu1 %v11772_v2  ;;  %v8215_v2 = vld [vmem:[%s11707_s0 + $0x48] sm:$0xff]   ;;  %v12218_v57 = vmov 0  ;;  %v8435_v56 = vrot.slane %v8159_v58, %v7637_v5  ;;  %v8567_v5 = vld [vmem:[%s11707_s0 + $0x58] sm:$0xff]   ;;  %vm12310_vm8 = vcmp.eq.s32.totalorder %v7758_v24, %v8194_v48 }
  0x3d   : > { %12168 = vst [vmem:[#allocation45_spill] sm:$0xff] %v12167_v44  ;;  %v12170_v45 = vsel %vm8188_vm3, 4294967295, %v12169_v45  ;;  %vm8200_vm0 = vmpackc.low %vm403_vm11, %vm387_vm14  ;;  %6306 = vmatprep.subr.msk.bf16.mxu1 %vm8163_vm12, %v11786_v16  ;;  %6275 = vmatpush1.bf16.msk.msra.mxu0 %vm8176_vm9, %v11786_v16  ;;  %vm12182_vm11 = vcmp.eq.s32.totalorder %v7708_v18, %v8052_v63  ;;  %v12200_v44 = vmov 1.0|1.0   ;;  %vm12207_vm9 = vcmp.eq.s32.totalorder %v7814_v32, %v7989_v53 }
  0x3e   : > { %12171 = vst [vmem:[#allocation46_spill] sm:$0xff] %v12170_v45  ;;  %v12173_v13 = vsel %vm8200_vm0, 4294967295, %v12172_v13  ;;  %vm8220_vm10 = vmpackc.low %vm405_vm7, %vm389_vm2  ;;  %6277 = vmatprep.subr.msk.bf16.mxu0 %vm8200_vm0, %v11786_v16  ;;  %vm12178_vm7 = vcmp.eq.s32.totalorder %v7711_v19, %v8033_v59  ;;  %vm12187_vm0 = vcmask 818176   ;;  %v12197_v45 = vmov 0 }
  0x3f   : > { %12174 = vst [vmem:[#allocation47_spill] sm:$0xff] %v12173_v13  ;;  %v12176_v52 = vsel %vm8220_vm10, 4294967295, %v12175_v52  ;;  %vm8255_vm2 = vmpackc.low %vm12178_vm7, %vm386_vm1  ;;  %vm12183_vm1 = vcmp.eq.s32.totalorder %v7711_v19, %v8052_v63  ;;  %v12184_v13 = vmov 0  ;;  %6228 = vmatmul.mubr.msk.bf16.gmra.mrb[4].mxu0 %vm12187_vm0, %v8215_v2  ;;  %v6167_v12 = vsel %vm12207_vm9, 1.0, %v12206_v51 }
  0x40   : > { %12177 = vst [vmem:[#allocation48_spill] sm:$0xff] %v12176_v52  ;;  %6308 = vmatpush1.bf16.msk.msra.mxu1 %vm8188_vm3, %v11786_v16  ;;  %v12180_v4 = vsel %vm8255_vm2, 4294967295, %v12179_v4  ;;  %vm8274_vm7 = vmpackc.low %vm12183_vm1, %vm12182_vm11  ;;  %vm12188_vm11 = vcmp.eq.s32.totalorder %v7758_v24, %v7989_v53  ;;  %vm12189_vm1 = vcmp.eq.s32.totalorder %v7761_v25, %v7989_v53  ;;  %v12194_v52 = vmov 0  }
  0x41   : > { %12181 = vst [vmem:[#allocation49_spill] sm:$0xff] %v12180_v4  ;;  %6310 = vmatprep.subr.msk.bf16.mxu1 %vm8220_vm10, %v11786_v16  ;;  %v12185_v13 = vsel %vm8274_vm7, 4294967295, %v12184_v13  ;;  %vm8294_vm3 = vmpackc.low %vm12189_vm1, %vm12188_vm11  ;;  %v12190_v16 = vmov 0  ;;  %1253 = vmatprep.mubr.bf16.mxu0 %v12194_v52  ;;  %vm12195_vm11 = vcmp.eq.s32.totalorder %v7758_v24, %v8012_v55  ;;  %vm12196_vm1 = vcmp.eq.s32.totalorder %v7761_v25, %v8012_v55 }
  0x42   : > { %12186 = vst [vmem:[#allocation50_spill] sm:$0xff] %v12185_v13  ;;  %v12191_v16 = vsel %vm8294_vm3, 4294967295, %v12190_v16  ;;  %vm12193_vm5 = vmmov %vm12187_vm0  ;;  %6279 = vmatpush1.bf16.msk.msra.mxu0 %vm8255_vm2, %v12200_v44  ;;  %vm12210_vm9 = vcmp.eq.s32.totalorder %v7758_v24, %v8052_v63  ;;  %v8394_v13 = vld [vmem:[%s11707_s0 + $0x50] sm:$0xff]   ;;  %v8427_v8 = vpack.c.bf16 %v6167_v12, %v6167_v12  ;;  %v8454_v12 = vrot.slane %v8159_v58, %v7649_v7 }
  0x43   : > { %12192 = vst [vmem:[#allocation51_spill] sm:$0xff] %v12191_v16  ;;  %6261 = vmatmul.mubr.msk.bf16.gmra.mrb[4].mxu1 %vm12193_vm5, %v8215_v2  ;;  %vm8315_vm6 = vmpackc.low %vm12196_vm1, %vm12195_vm11  ;;  %vm12201_vm11 = vcmp.eq.s32.totalorder %v7758_v24, %v8033_v59  ;;  %vm12202_vm1 = vcmp.eq.s32.totalorder %v7761_v25, %v8033_v59  ;;  %vm12208_vm5 = vcmp.eq.s32.totalorder %v7814_v32, %v8012_v55  ;;  %v12241_v7 = vmov 0 }
  0x44   : > { %v12198_v45 = vsel %vm8315_vm6, 4294967295, %v12197_v45  ;;  %1366 = vmatprep.mubr.bf16.mxu1 %v12194_v52  ;;  %vm8339_vm14 = vmpackc.low %vm12202_vm1, %vm12201_vm11  ;;  %v6169_v4 = vsel %vm12208_vm5, 1.0, %v12206_v51  ;;  %vm12209_vm11 = vcmp.eq.s32.totalorder %v7814_v32, %v8033_v59  ;;  %6312 = vmatpush1.bf16.msk.msra.mxu1 %vm8274_vm7, %v12200_v44  ;;  %vm12211_vm5 = vcmp.eq.s32.totalorder %v7761_v25, %v8052_v63  ;;  %12226 = vst [vmem:[#allocation57_spill] sm:$0xff] %v8427_v8 }
  0x45   : > { %12199 = vst [vmem:[#allocation52_spill] sm:$0xff] %v12198_v45  ;;  %v12204_v62 = vsel %vm8339_vm14, 4294967295, %v12203_v62  ;;  %v8357_v11 = vsel %vm12209_vm11, 1.0, %v12206_v51  ;;  %6281 = vmatprep.subr.msk.bf16.mxu0 %vm8294_vm3, %v12200_v44  ;;  %vm8375_vm11 = vmpackc.low %vm12211_vm5, %vm12210_vm9  ;;  %vm12215_vm3 = vcmp.eq.s32.totalorder %v7814_v32, %v8052_v63  ;;  %6314 = vmatprep.subr.msk.bf16.mxu1 %vm8315_vm6, %v12200_v44  ;;  %vm12216_vm9 = vcmp.eq.s32.totalorder %v7797_v29, %v7989_v53 }
  0x46   : > { %12205 = vst [vmem:[#allocation53_spill] sm:$0xff] %v12204_v62  ;;  %v12213_v61 = vsel %vm8375_vm11, 4294967295, %v12212_v61  ;;  %v8389_v16 = vsel %vm12215_vm3, 1.0, %v12206_v51  ;;  %vm12217_vm5 = vcmp.eq.s32.totalorder %v7811_v31, %v7989_v53  ;;  %vm12221_vm7 = vcmp.eq.s32.totalorder %v7797_v29, %v8012_v55  ;;  %6283 = vmatpush1.bf16.msk.msra.mxu0 %vm8339_vm14, %v12200_v44  ;;  %v8898_v62 = vld [vmem:[%s11707_s0 + $0x68] sm:$0xff]  }
  0x47   : > { %12214 = vst [vmem:[#allocation54_spill] sm:$0xff] %v12213_v61  ;;  %vm8405_vm10 = vmpackc.low %vm12217_vm5, %vm12216_vm9  ;;  %vm12222_vm9 = vcmp.eq.s32.totalorder %v7811_v31, %v8012_v55  ;;  %v12223_v45 = vmov 0  ;;  %v8429_v0 = vpack.c.bf16 %v6169_v4, %v6169_v4  ;;  %v1042_v60 = vpack.c.bf16 %v8357_v11, %v8357_v11 }
  0x48   : > { %v12219_v57 = vsel %vm8405_vm10, 4294967295, %v12218_v57  ;;  %vm8423_vm5 = vmpackc.low %vm12222_vm9, %vm12221_vm7  ;;  %vm12228_vm7 = vcmp.eq.s32.totalorder %v7797_v29, %v8033_v59  ;;  %vm12229_vm9 = vcmp.eq.s32.totalorder %v7811_v31, %v8033_v59  ;;  %v12230_v4 = vmov 0  ;;  %6316 = vmatpush1.bf16.msk.msra.mxu1 %vm8375_vm11, %v12200_v44  ;;  %6285 = vmatprep.subr.msk.bf16.mxu0 %vm8405_vm10, %v12200_v44 }
  0x49   : > { %12220 = vst [vmem:[#allocation55_spill] sm:$0xff] %v12219_v57  ;;  %v12224_v45 = vsel %vm8423_vm5, 4294967295, %v12223_v45  ;;  %12227 = vst [vmem:[#allocation58_spill] sm:$0xff] %v8429_v0  ;;  %v1044_v11 = vpack.c.bf16 %v8389_v16, %v8389_v16  ;;  %v12235_v16 = vmov 0  ;;  %6318 = vmatprep.subr.msk.bf16.mxu1 %vm8423_vm5, %v12200_v44  ;;  %vm12306_vm15 = vcmp.eq.s32.totalorder %v7708_v18, %v8454_v12 }
  0x4a   : > { %12225 = vst [vmem:[#allocation56_spill] sm:$0xff] %v12224_v45  ;;  %vm8446_vm6 = vmpackc.low %vm12229_vm9, %vm12228_vm7  ;;  %vm12233_vm7 = vcmp.eq.s32.totalorder %v7797_v29, %v8052_v63  ;;  %vm12234_vm9 = vcmp.eq.s32.totalorder %v7811_v31, %v8052_v63  ;;  %vm12314_vm4 = vcmp.eq.s32.totalorder %v7758_v24, %v8210_v3  ;;  %v12326_v45 = vmov 0 }
  0x4b   : > { %v12231_v4 = vsel %vm8446_vm6, 4294967295, %v12230_v4  ;;  %vm8472_vm3 = vmpackc.low %vm12234_vm9, %vm12233_vm7  ;;  %vm12239_vm7 = vcmp.eq.s32.totalorder %v7839_v35, %v7989_v53  ;;  %vm12240_vm9 = vcmp.eq.s32.totalorder %v7855_v37, %v7989_v53  ;;  %v12247_v53 = vmov 0  ;;  %6287 = vmatpush1.bf16.msk.msra.mxu0 %vm8446_vm6, %v12200_v44 }
  0x4c   : > { %12232 = vst [vmem:[#allocation59_spill] sm:$0xff] %v12231_v4  ;;  %v12236_v16 = vsel %vm8472_vm3, 4294967295, %v12235_v16  ;;  %vm12238_vm10 = vmmov %vm12187_vm0  ;;  %6320 = vmatpush1.bf16.msk.msra.mxu1 %vm8472_vm3, %v12200_v44  ;;  %v12272_v4 = vmov 0  ;;  %vm12277_vm3 = vcmp.eq.s32.totalorder %v7655_v9, %v8210_v3  ;;  %v12330_v57 = vmov 0 }
  0x4d   : > { %12237 = vst [vmem:[#allocation60_spill] sm:$0xff] %v12236_v16  ;;  %6229 = vmatmul.mubr.msk.bf16.gmra.mrb[8].mxu0 %vm12238_vm10, %v8394_v13  ;;  %vm8493_vm1 = vmpackc.low %vm12240_vm9, %vm12239_vm7  ;;  %vm12245_vm7 = vcmp.eq.s32.totalorder %v7839_v35, %v8012_v55  ;;  %vm12246_vm9 = vcmp.eq.s32.totalorder %v7855_v37, %v8012_v55  ;;  %v12252_v55 = vmov 0  ;;  %v12267_v16 = vmov 0 }
  0x4e   : > { %v12242_v7 = vsel %vm8493_vm1, 4294967295, %v12241_v7  ;;  %vm12244_vm5 = vmmov %vm12187_vm0  ;;  %1263 = vmatprep.mubr.bf16.mxu0 %v12194_v52  ;;  %6289 = vmatprep.subr.msk.bf16.mxu0 %vm8493_vm1, %v12200_v44  ;;  %vm12278_vm1 = vcmp.eq.s32.totalorder %v7658_v10, %v8210_v3  ;;  %v12335_v61 = vmov 0  ;;  %v12340_v54 = vmov 0 }
  0x4f   : > { %12243 = vst [vmem:[#allocation61_spill] sm:$0xff] %v12242_v7  ;;  %6262 = vmatmul.mubr.msk.bf16.gmra.mrb[8].mxu1 %vm12244_vm5, %v8394_v13  ;;  %vm8512_vm14 = vmpackc.low %vm12246_vm9, %vm12245_vm7  ;;  %vm12250_vm7 = vcmp.eq.s32.totalorder %v7839_v35, %v8033_v59  ;;  %vm12251_vm9 = vcmp.eq.s32.totalorder %v7855_v37, %v8033_v59  ;;  %v12257_v59 = vmov 0  ;;  %v8592_v7 = vrot.slane %v8159_v58, %v7914_v42 }
  0x50   : > { %v12248_v53 = vsel %vm8512_vm14, 4294967295, %v12247_v53  ;;  %1376 = vmatprep.mubr.bf16.mxu1 %v12194_v52  ;;  %vm8532_vm11 = vmpackc.low %vm12251_vm9, %vm12250_vm7  ;;  %vm12255_vm7 = vcmp.eq.s32.totalorder %v7839_v35, %v8052_v63  ;;  %vm12256_vm9 = vcmp.eq.s32.totalorder %v7855_v37, %v8052_v63  ;;  %6322 = vmatprep.subr.msk.bf16.mxu1 %vm8512_vm14, %v12200_v44  ;;  %v12262_v63 = vmov 0 }
  0x51   : > { %12249 = vst [vmem:[#allocation62_spill] sm:$0xff] %v12248_v53  ;;  %v12253_v55 = vsel %vm8532_vm11, 4294967295, %v12252_v55  ;;  %vm8554_vm0 = vmpackc.low %vm12256_vm9, %vm12255_vm7  ;;  %vm12260_vm7 = vcmp.eq.s32.totalorder %v7624_v1, %v8194_v48  ;;  %vm12261_vm9 = vcmp.eq.s32.totalorder %v7646_v6, %v8194_v48  ;;  %v8588_v53 = vrot.slane %v8159_v58, %v7892_v40  ;;  %6291 = vmatpush1.bf16.msk.msra.mxu0 %vm8532_vm11, %v12200_v44 }
  0x52   : > { %12254 = vst [vmem:[#allocation63_spill] sm:$0xff] %v12253_v55  ;;  %v12258_v59 = vsel %vm8554_vm0, 4294967295, %v12257_v59  ;;  %vm8578_vm10 = vmpackc.low %vm12261_vm9, %vm12260_vm7  ;;  %vm12265_vm7 = vcmp.eq.s32.totalorder %v7624_v1, %v8210_v3  ;;  %vm12266_vm9 = vcmp.eq.s32.totalorder %v7646_v6, %v8210_v3  ;;  %v8610_v42 = vrot.slane %v8159_v58, %v7938_v46  ;;  %6324 = vmatpush1.bf16.msk.msra.mxu1 %vm8554_vm0, %v12200_v44 }
  0x53   : > { %12259 = vst [vmem:[#allocation64_spill] sm:$0xff] %v12258_v59  ;;  %v12263_v63 = vsel %vm8578_vm10, 4294967295, %v12262_v63  ;;  %vm8600_vm14 = vmpackc.low %vm12266_vm9, %vm12265_vm7  ;;  %v8614_v40 = vrot.slane %v8159_v58, %v7962_v49  ;;  %vm12270_vm7 = vcmp.eq.s32.totalorder %v7655_v9, %v8194_v48  ;;  %vm12271_vm9 = vcmp.eq.s32.totalorder %v7658_v10, %v8194_v48 }
  0x54   : > { %12264 = vst [vmem:[#allocation65_spill] sm:$0xff] %v12263_v63  ;;  %v12268_v16 = vsel %vm8600_vm14, 4294967295, %v12267_v16  ;;  %vm8625_vm5 = vmpackc.low %vm12271_vm9, %vm12270_vm7  ;;  %vm12274_vm7 = vcmask 1041408   ;;  %v12279_v49 = vmov 0  ;;  %v12287_v46 = vmov 0  ;;  %v8744_v63 = vld [vmem:[%s11707_s0 + $0x60] sm:$0xff]  }
  0x55   : > { %12269 = vst [vmem:[#allocation66_spill] sm:$0xff] %v12268_v16  ;;  %v12273_v4 = vsel %vm8625_vm5, 4294967295, %v12272_v4  ;;  %6292 = vmatprep.subr.msk.bf16.mxu0 %vm12274_vm7, %v8427_v8  ;;  %vm12275_vm9 = vmmov %vm12274_vm7  ;;  %v12308_v16 = vmov 0  ;;  %v12312_v8 = vmov 0  ;;  %v12316_v59 = vmov 0 }
  0x56   : > { %v8643_v58 = vsel %vm12275_vm9, %v1042_v60, 0  ;;  %vm8651_vm6 = vmpackc.low %vm12278_vm1, %vm12277_vm3  ;;  %vm12281_vm9 = vcmask 818176   ;;  %vm12285_vm1 = vcmp.eq.s32.totalorder %v7655_v9, %v8435_v56  ;;  %vm12286_vm3 = vcmp.eq.s32.totalorder %v7658_v10, %v8435_v56 }
  0x57   : > { %12276 = vst [vmem:[#allocation67_spill] sm:$0xff] %v8643_v58  ;;  %v12280_v49 = vsel %vm8651_vm6, 4294967295, %v12279_v49  ;;  %6230 = vmatmul.mubr.msk.bf16.gmra.mrb[12].mxu0 %vm12281_vm9, %v8567_v5  ;;  %vm12282_vm2 = vmmov %vm12274_vm7  ;;  %vm12294_vm7 = vcmp.eq.s32.totalorder %v7708_v18, %v8194_v48  ;;  %v12321_v55 = vmov 0  ;;  %v12344_v50 = vmov 0 }
  0x58   : > { %6325 = vmatprep.subr.msk.bf16.mxu1 %vm12282_vm2, %v8429_v0  ;;  %vm12283_vm12 = vmmov %vm12282_vm2  ;;  %1273 = vmatprep.mubr.bf16.mxu0 %v12194_v52  ;;  %v12296_v0 = vmov 0  ;;  %v12346_v47 = vmov 0  ;;  %v12348_v43 = vmov 0  ;;  %v12351_v41 = vmov 0 }
  0x59   : > { %v8666_v60 = vsel %vm12283_vm12, %v1044_v11, 0  ;;  %vm8674_vm11 = vmpackc.low %vm12286_vm3, %vm12285_vm1  ;;  %vm12290_vm1 = vcmp.eq.s32.totalorder %v7655_v9, %v8454_v12  ;;  %vm12291_vm3 = vcmp.eq.s32.totalorder %v7658_v10, %v8454_v12  ;;  %v12292_v11 = vmov 0  ;;  %1440 = vmatpush1.bf16.msra.mxu0 %v8643_v58 }
  0x5a   : > { %12284 = vst [vmem:[#allocation68_spill] sm:$0xff] %v8666_v60  ;;  %v12288_v46 = vsel %vm8674_vm11, 4294967295, %v12287_v46  ;;  %vm12289_vm2 = vmmov %vm12281_vm9  ;;  %1553 = vmatpush1.bf16.msra.mxu1 %v8666_v60  ;;  %6335 = vmatprep.subr.msk.bf16.mxu0 %vm8578_vm10, %v12200_v44  ;;  %v12300_v58 = vmov 0  ;;  %v12304_v60 = vmov 0  ;;  %vm12328_vm10 = vcmp.eq.s32.totalorder %v7797_v29, %v8194_v48 }
  0x5b   : > { %6263 = vmatmul.mubr.msk.bf16.gmra.mrb[12].mxu1 %vm12289_vm2, %v8567_v5  ;;  %vm8693_vm0 = vmpackc.low %vm12291_vm3, %vm12290_vm1  ;;  %vm12295_vm1 = vcmp.eq.s32.totalorder %v7711_v19, %v8194_v48  ;;  %6368 = vmatprep.subr.msk.bf16.mxu1 %vm8600_vm14, %v12200_v44  ;;  %vm487_vm14 = vcmp.eq.s32.totalorder %v7839_v35, %v8194_v48  ;;  %v12354_v39 = vmov 0  ;;  %v12357_v38 = vmov 0 }
  0x5c   : > { %v12293_v11 = vsel %vm8693_vm0, 4294967295, %v12292_v11  ;;  %1386 = vmatprep.mubr.bf16.mxu1 %v12194_v52  ;;  %vm8711_vm3 = vmpackc.low %vm12295_vm1, %vm12294_vm7  ;;  %vm12298_vm7 = vcmp.eq.s32.totalorder %v7708_v18, %v8210_v3  ;;  %vm12299_vm1 = vcmp.eq.s32.totalorder %v7711_v19, %v8210_v3  ;;  %v12361_v36 = vmov 0 }
  0x5d   : > { %v12297_v0 = vsel %vm8711_vm3, 4294967295, %v12296_v0  ;;  %vm8731_vm13 = vmpackc.low %vm12299_vm1, %vm12298_vm7  ;;  %vm12302_vm7 = vcmp.eq.s32.totalorder %v7708_v18, %v8435_v56  ;;  %vm12303_vm1 = vcmp.eq.s32.totalorder %v7711_v19, %v8435_v56  ;;  %vm504_vm3 = vcmp.eq.s32.totalorder %v7855_v37, %v8454_v12 }
  0x5e   : > { %v12301_v58 = vsel %vm8731_vm13, 4294967295, %v12300_v58  ;;  %vm8755_vm2 = vmpackc.low %vm12303_vm1, %vm12302_vm7  ;;  %vm12307_vm7 = vcmp.eq.s32.totalorder %v7711_v19, %v8454_v12  ;;  %vm488_vm13 = vcmp.eq.s32.totalorder %v7839_v35, %v8454_v12  ;;  %v12365_v33 = vmov 0 }
  0x5f   : > { %v12305_v60 = vsel %vm8755_vm2, 4294967295, %v12304_v60  ;;  %vm8773_vm1 = vmpackc.low %vm12307_vm7, %vm12306_vm15  ;;  %vm12311_vm15 = vcmp.eq.s32.totalorder %v7761_v25, %v8194_v48  ;;  %v12369_v30 = vmov 0  ;;  %v12373_v28 = vmov 0 }
  0x60   : > { %v12309_v16 = vsel %vm8773_vm1, 4294967295, %v12308_v16  ;;  %vm8791_vm7 = vmpackc.low %vm12311_vm15, %vm12310_vm8  ;;  %vm12315_vm8 = vcmp.eq.s32.totalorder %v7761_v25, %v8210_v3  ;;  %vm12343_vm1 = vcmp.eq.s32.totalorder %v7811_v31, %v8454_v12  ;;  %v12377_v27 = vmov 0 }
  0x61   : > { %v12313_v8 = vsel %vm8791_vm7, 4294967295, %v12312_v8  ;;  %vm8809_vm15 = vmpackc.low %vm12315_vm8, %vm12314_vm4  ;;  %vm12319_vm4 = vcmp.eq.s32.totalorder %v7758_v24, %v8435_v56  ;;  %vm12320_vm8 = vcmp.eq.s32.totalorder %v7761_v25, %v8435_v56  ;;  %v12382_v26 = vmov 0 }
  0x62   : > { %v12317_v59 = vsel %vm8809_vm15, 4294967295, %v12316_v59  ;;  %vm12318_vm7 = vmmov %vm12281_vm9  ;;  %v12387_v23 = vmov 0  ;;  %v12391_v22 = vmov 0  ;;  %v12399_v21 = vmov 0 }
  0x63   : > { %6231 = vmatmul.mubr.msk.bf16.gmra.mrb[16].mxu0 %vm12318_vm7, %v8744_v63  ;;  %vm8829_vm15 = vmpackc.low %vm12320_vm8, %vm12319_vm4  ;;  %vm12324_vm4 = vcmp.eq.s32.totalorder %v7758_v24, %v8454_v12  ;;  %vm12325_vm8 = vcmp.eq.s32.totalorder %v7761_v25, %v8454_v12  ;;  %v12409_v20 = vmov 0  ;;  %v12420_v17 = vmov 0 }
  0x64   : > { %v12322_v55 = vsel %vm8829_vm15, 4294967295, %v12321_v55  ;;  %vm12323_vm12 = vmmov %vm12318_vm7  ;;  %1283 = vmatprep.mubr.bf16.mxu0 %v12194_v52  ;;  %vm12333_vm15 = vcmp.eq.s32.totalorder %v7797_v29, %v8210_v3  ;;  %vm503_vm7 = vcmp.eq.s32.totalorder %v7855_v37, %v8194_v48  ;;  %v12426_v15 = vmov 0 }
  0x65   : > { %6264 = vmatmul.mubr.msk.bf16.gmra.mrb[16].mxu1 %vm12323_vm12, %v8744_v63  ;;  %vm8850_vm9 = vmpackc.low %vm12325_vm8, %vm12324_vm4  ;;  %vm12329_vm4 = vcmp.eq.s32.totalorder %v7811_v31, %v8194_v48  ;;  %vm505_vm12 = vcmp.eq.s32.totalorder %v7855_v37, %v8210_v3 }
  0x66   : > { %v12327_v45 = vsel %vm8850_vm9, 4294967295, %v12326_v45  ;;  %1396 = vmatprep.mubr.bf16.mxu1 %v12194_v52  ;;  %vm8867_vm8 = vmpackc.low %vm12329_vm4, %vm12328_vm10  ;;  %vm12334_vm10 = vcmp.eq.s32.totalorder %v7811_v31, %v8210_v3 }
  0x67   : > { %v12331_v57 = vsel %vm8867_vm8, 4294967295, %v12330_v57  ;;  %vm8885_vm4 = vmpackc.low %vm12334_vm10, %vm12333_vm15  ;;  %vm12338_vm15 = vcmp.eq.s32.totalorder %v7797_v29, %v8435_v56  ;;  %vm12339_vm10 = vcmp.eq.s32.totalorder %v7811_v31, %v8435_v56  ;;  %vm12342_vm8 = vcmp.eq.s32.totalorder %v7797_v29, %v8454_v12 }
  0x68   : > { %12332 = vst [vmem:[#allocation69_spill] sm:$0xff] %v12331_v57  ;;  %v12336_v61 = vsel %vm8885_vm4, 4294967295, %v12335_v61  ;;  %vm8906_vm9 = vmpackc.low %vm12339_vm10, %vm12338_vm15  ;;  %vm489_vm4 = vcmp.eq.s32.totalorder %v7839_v35, %v8210_v3  ;;  %vm486_vm15 = vcmp.eq.s32.totalorder %v7839_v35, %v8435_v56  ;;  %vm502_vm10 = vcmp.eq.s32.totalorder %v7855_v37, %v8435_v56 }
  0x69   : > { %12337 = vst [vmem:[#allocation70_spill] sm:$0xff] %v12336_v61  ;;  %v12341_v54 = vsel %vm8906_vm9, 4294967295, %v12340_v54  ;;  %vm8920_vm2 = vmpackc.low %vm12343_vm1, %vm12342_vm8  ;;  %vm331_vm8 = vcmp.eq.s32.totalorder %v7624_v1, %v8588_v53 }
  0x6a   : > { %v12345_v50 = vsel %vm8920_vm2, 4294967295, %v12344_v50  ;;  %vm8928_vm9 = vmpackc.low %vm503_vm7, %vm487_vm14  ;;  %vm12350_vm2 = vcmask 818176   ;;  %vm333_vm7 = vcmp.eq.s32.totalorder %v7624_v1, %v8592_v7 }
  0x6b   : > { %v12347_v47 = vsel %vm8928_vm9, 4294967295, %v12346_v47  ;;  %vm8936_vm1 = vmpackc.low %vm505_vm12, %vm489_vm4  ;;  %6232 = vmatmul.mubr.msk.bf16.gmra.mrb[20].mxu0 %vm12350_vm2, %v8898_v62  ;;  %vm330_vm9 = vcmp.eq.s32.totalorder %v7624_v1, %v8610_v42 }
  0x6c   : > { %v12349_v43 = vsel %vm8936_vm1, 4294967295, %v12348_v43  ;;  %vm8944_vm14 = vmpackc.low %vm502_vm10, %vm486_vm15  ;;  %1293 = vmatprep.mubr.bf16.mxu0 %v12194_v52  ;;  %vm12364_vm10 = vcmp.eq.s32.totalorder %v7646_v6, %v8610_v42 }
  0x6d   : > { %v12352_v41 = vsel %vm8944_vm14, 4294967295, %v12351_v41  ;;  %vm12353_vm4 = vmmov %vm12350_vm2  ;;  %vm12372_vm2 = vcmp.eq.s32.totalorder %v7658_v10, %v8588_v53 }
  0x6e   : > { %6265 = vmatmul.mubr.msk.bf16.gmra.mrb[20].mxu1 %vm12353_vm4, %v8898_v62  ;;  %vm8957_vm1 = vmpackc.low %vm504_vm3, %vm488_vm13  ;;  %vm12356_vm4 = vcmp.eq.s32.totalorder %v7646_v6, %v8588_v53  ;;  %vm12371_vm3 = vcmp.eq.s32.totalorder %v7655_v9, %v8588_v53 }
  0x6f   : > { %v12355_v39 = vsel %vm8957_vm1, 4294967295, %v12354_v39  ;;  %1406 = vmatprep.mubr.bf16.mxu1 %v12194_v52  ;;  %vm8971_vm12 = vmpackc.low %vm12356_vm4, %vm331_vm8  ;;  %vm12360_vm8 = vcmp.eq.s32.totalorder %v7646_v6, %v8592_v7 }
  0x70   : > { %v12358_v38 = vsel %vm8971_vm12, 4294967295, %v12357_v38  ;;  %vm8989_vm4 = vmpackc.low %vm12360_vm8, %vm333_vm7  ;;  %vm12367_vm7 = vcmp.eq.s32.totalorder %v7624_v1, %v8614_v40  ;;  %vm12368_vm8 = vcmp.eq.s32.totalorder %v7646_v6, %v8614_v40 }
  0x71   : > { %12359 = vst [vmem:[#allocation71_spill] sm:$0xff] %v12358_v38  ;;  %v12362_v36 = vsel %vm8989_vm4, 4294967295, %v12361_v36  ;;  %vm9006_vm15 = vmpackc.low %vm12364_vm10, %vm330_vm9  ;;  %vm12375_vm10 = vcmp.eq.s32.totalorder %v7655_v9, %v8592_v7  ;;  %vm12402_vm4 = vcmp.eq.s32.totalorder %v7711_v19, %v8614_v40 }
  0x72   : > { %12363 = vst [vmem:[#allocation72_spill] sm:$0xff] %v12362_v36  ;;  %v12366_v33 = vsel %vm9006_vm15, 4294967295, %v12365_v33  ;;  %vm9016_vm13 = vmpackc.low %vm12368_vm8, %vm12367_vm7  ;;  %vm12376_vm15 = vcmp.eq.s32.totalorder %v7658_v10, %v8592_v7  ;;  %vm12379_vm8 = vcmask 818176  }
  0x73   : > { %v12370_v30 = vsel %vm9016_vm13, 4294967295, %v12369_v30  ;;  %vm9026_vm9 = vmpackc.low %vm12372_vm2, %vm12371_vm3  ;;  %6233 = vmatmul.mubr.msk.bf16.gmra.mrb[24].mxu0 %vm12379_vm8, %v8998_v34  ;;  %vm12380_vm13 = vcmp.eq.s32.totalorder %v7655_v9, %v8610_v42  ;;  %vm12381_vm2 = vcmp.eq.s32.totalorder %v7658_v10, %v8610_v42 }
  0x74   : > { %v12374_v28 = vsel %vm9026_vm9, 4294967295, %v12373_v28  ;;  %vm9036_vm7 = vmpackc.low %vm12376_vm15, %vm12375_vm10  ;;  %1303 = vmatprep.mubr.bf16.mxu0 %v12194_v52  ;;  %vm12385_vm15 = vcmp.eq.s32.totalorder %v7655_v9, %v8614_v40  ;;  %vm12386_vm10 = vcmp.eq.s32.totalorder %v7658_v10, %v8614_v40  ;;  %v12395_v9 = vmov 0  ;;  %v9093_v10 = vld [vmem:[%s11707_s0 + $0x78] sm:$0xff]  }
  0x75   : > { %v12378_v27 = vsel %vm9036_vm7, 4294967295, %v12377_v27  ;;  %vm9048_vm3 = vmpackc.low %vm12381_vm2, %vm12380_vm13  ;;  %vm12389_vm13 = vcmp.eq.s32.totalorder %v7708_v18, %v8588_v53 }
  0x76   : > { %v12383_v26 = vsel %vm9048_vm3, 4294967295, %v12382_v26  ;;  %vm12384_vm9 = vmmov %vm12379_vm8  ;;  %vm326_vm3 = vcmp.eq.s32.totalorder %v7624_v1, %v8435_v56 }
  0x77   : > { %6266 = vmatmul.mubr.msk.bf16.gmra.mrb[24].mxu1 %vm12384_vm9, %v8998_v34  ;;  %vm9061_vm8 = vmpackc.low %vm12386_vm10, %vm12385_vm15  ;;  %vm12390_vm9 = vcmp.eq.s32.totalorder %v7711_v19, %v8588_v53  ;;  %vm342_vm15 = vcmp.eq.s32.totalorder %v7646_v6, %v8435_v56  ;;  %vm12393_vm10 = vcmp.eq.s32.totalorder %v7708_v18, %v8592_v7 }
  0x78   : > { %v12388_v23 = vsel %vm9061_vm8, 4294967295, %v12387_v23  ;;  %1416 = vmatprep.mubr.bf16.mxu1 %v12194_v52  ;;  %vm9072_vm2 = vmpackc.low %vm12390_vm9, %vm12389_vm13  ;;  %vm12394_vm8 = vcmp.eq.s32.totalorder %v7711_v19, %v8592_v7  ;;  %vm328_vm13 = vcmp.eq.s32.totalorder %v7624_v1, %v8454_v12  ;;  %vm344_vm9 = vcmp.eq.s32.totalorder %v7646_v6, %v8454_v12 }
  0x79   : > { %v12392_v22 = vsel %vm9072_vm2, 4294967295, %v12391_v22  ;;  %vm9086_vm7 = vmpackc.low %vm12394_vm8, %vm12393_vm10  ;;  %vm12397_vm2 = vcmp.eq.s32.totalorder %v7708_v18, %v8610_v42  ;;  %vm12398_vm8 = vcmp.eq.s32.totalorder %v7711_v19, %v8610_v42  ;;  %v12403_v1 = vmov 0 }
  0x7a   : > { %v12396_v9 = vsel %vm9086_vm7, 4294967295, %v12395_v9  ;;  %vm9105_vm10 = vmpackc.low %vm12398_vm8, %vm12397_vm2  ;;  %vm12401_vm7 = vcmp.eq.s32.totalorder %v7708_v18, %v8614_v40  ;;  %v12405_v6 = vmov 0  ;;  %vm12407_vm2 = vcmp.eq.s32.totalorder %v7758_v24, %v8588_v53 }
  0x7b   : > { %v12400_v21 = vsel %vm9105_vm10, 4294967295, %v12399_v21  ;;  %vm9115_vm12 = vmpackc.low %vm12402_vm4, %vm12401_vm7  ;;  %vm12408_vm8 = vcmp.eq.s32.totalorder %v7761_v25, %v8588_v53  ;;  %v12411_v18 = vmov 0  ;;  %vm12413_vm4 = vcmp.eq.s32.totalorder %v7758_v24, %v8592_v7 }
  0x7c   : > { %v12404_v1 = vsel %vm9115_vm12, 4294967295, %v12403_v1  ;;  %vm9119_vm1 = vmpackc.low %vm342_vm15, %vm326_vm3  ;;  %vm12414_vm7 = vcmp.eq.s32.totalorder %v7761_v25, %v8592_v7  ;;  %v12415_v19 = vmov 0  ;;  %vm12417_vm15 = vcmask 818176  }
  0x7d   : > { %v12406_v6 = vsel %vm9119_vm1, 4294967295, %v12405_v6  ;;  %vm9129_vm10 = vmpackc.low %vm12408_vm8, %vm12407_vm2  ;;  %6234 = vmatmul.mubr.msk.bf16.gmra.mrb[28].mxu0 %vm12417_vm15, %v9093_v10  ;;  %vm12418_vm2 = vcmp.eq.s32.totalorder %v7758_v24, %v8610_v42 }
  0x7e   : > { %v12410_v20 = vsel %vm9129_vm10, 4294967295, %v12409_v20  ;;  %vm9133_vm14 = vmpackc.low %vm344_vm9, %vm328_vm13  ;;  %vm12419_vm13 = vcmp.eq.s32.totalorder %v7761_v25, %v8610_v42  ;;  %1459 = vmatprep.mubr.bf16.mxu0 %v12194_v52 }
  0x7f   : > { %v12412_v18 = vsel %vm9133_vm14, 4294967295, %v12411_v18  ;;  %vm9143_vm3 = vmpackc.low %vm12414_vm7, %vm12413_vm4  ;;  %vm12424_vm4 = vcmp.eq.s32.totalorder %v7758_v24, %v8614_v40  ;;  %vm12425_vm7 = vcmp.eq.s32.totalorder %v7761_v25, %v8614_v40  ;;  %v12435_v24 = vmov 0 }
  0x80   : > { %v12416_v19 = vsel %vm9143_vm3, 4294967295, %v12415_v19  ;;  %vm9155_vm9 = vmpackc.low %vm12419_vm13, %vm12418_vm2  ;;  %vm12428_vm2 = vcmp.eq.s32.totalorder %v7797_v29, %v8588_v53  ;;  %vm12429_vm13 = vcmp.eq.s32.totalorder %v7811_v31, %v8588_v53  ;;  %vm12439_vm3 = vcmp.eq.s32.totalorder %v7811_v31, %v8610_v42 }
  0x81   : > { %v12421_v17 = vsel %vm9155_vm9, 4294967295, %v12420_v17  ;;  %vm12423_vm8 = vmmov %vm12417_vm15  ;;  %vm12433_vm9 = vcmp.eq.s32.totalorder %v7797_v29, %v8592_v7  ;;  %v12440_v25 = vmov 0 }
  0x82   : > { %12422 = vst [vmem:[#allocation73_spill] sm:$0xff] %v12421_v17  ;;  %6267 = vmatmul.mubr.msk.bf16.gmra.mrb[28].mxu1 %vm12423_vm8, %v9093_v10  ;;  %vm9168_vm15 = vmpackc.low %vm12425_vm7, %vm12424_vm4  ;;  %v12430_v17 = vmov 0  ;;  %vm12434_vm4 = vcmp.eq.s32.totalorder %v7811_v31, %v8592_v7 }
  0x83   : > { %v12427_v15 = vsel %vm9168_vm15, 4294967295, %v12426_v15  ;;  %1572 = vmatprep.mubr.bf16.mxu1 %v12194_v52  ;;  %vm9179_vm8 = vmpackc.low %vm12429_vm13, %vm12428_vm2  ;;  %vm12438_vm15 = vcmp.eq.s32.totalorder %v7797_v29, %v8610_v42  ;;  %vm12442_vm13 = vcmp.eq.s32.totalorder %v7797_v29, %v8614_v40  ;;  %v12452_v29 = vmov 0 }
  0x84   : > { %v12431_v17 = vsel %vm9179_vm8, 4294967295, %v12430_v17  ;;  %vm9189_vm7 = vmpackc.low %vm12434_vm4, %vm12433_vm9  ;;  %vm12443_vm8 = vcmp.eq.s32.totalorder %v7811_v31, %v8614_v40  ;;  %vm12446_vm4 = vcmp.eq.s32.totalorder %v7839_v35, %v8588_v53  ;;  %v12458_v31 = vmov 0 }
  0x85   : > { %12432 = vst [vmem:[#allocation74_spill] sm:$0xff] %v12431_v17  ;;  %v12436_v24 = vsel %vm9189_vm7, 4294967295, %v12435_v24  ;;  %vm9199_vm2 = vmpackc.low %vm12439_vm3, %vm12438_vm15  ;;  %v12444_v17 = vmov 0  ;;  %vm12447_vm7 = vcmp.eq.s32.totalorder %v7855_v37, %v8588_v53  ;;  %vm12450_vm15 = vcmp.eq.s32.totalorder %v7839_v35, %v8592_v7 }
  0x86   : > { %12437 = vst [vmem:[#allocation75_spill] sm:$0xff] %v12436_v24  ;;  %v12441_v25 = vsel %vm9199_vm2, 4294967295, %v12440_v25  ;;  %vm9209_vm9 = vmpackc.low %vm12443_vm8, %vm12442_vm13  ;;  %v12448_v24 = vmov 0  ;;  %vm12451_vm2 = vcmp.eq.s32.totalorder %v7855_v37, %v8592_v7  ;;  %vm12455_vm13 = vcmask 818176  }
  0x87   : > { %v12445_v17 = vsel %vm9209_vm9, 4294967295, %v12444_v17  ;;  %vm9219_vm3 = vmpackc.low %vm12447_vm7, %vm12446_vm4  ;;  %6293 = vmatmul.mubr.msk.bf16.vlgmr.msra.gmra.mrb[32].mxu0 %vm12455_vm13, %v8116_v14  ;;  %vm12456_vm9 = vcmp.eq.s32.totalorder %v7839_v35, %v8610_v42  ;;  %vm12457_vm7 = vcmp.eq.s32.totalorder %v7855_v37, %v8610_v42 }
  0x88   : > { %v12449_v24 = vsel %vm9219_vm3, 4294967295, %v12448_v24  ;;  %vm9229_vm8 = vmpackc.low %vm12451_vm2, %vm12450_vm15  ;;  %6337 = vmatpush1.bf16.msk.msra.mxu0 %vm9119_vm1, %v12200_v44  ;;  %vm12461_vm2 = vcmp.eq.s32.totalorder %v7839_v35, %v8614_v40  ;;  %vm12462_vm15 = vcmp.eq.s32.totalorder %v7855_v37, %v8614_v40  ;;  %1469 = vmatprep.mubr.bf16.mxu0 %v12194_v52 }
  0x89   : > { %v12453_v29 = vsel %vm9229_vm8, 4294967295, %v12452_v29  ;;  %vm9241_vm4 = vmpackc.low %vm12457_vm7, %vm12456_vm9  ;;  %6339 = vmatprep.subr.msk.bf16.mxu0 %vm8625_vm5, %v12200_v44  ;;  %vm12465_vm9 = vnez %v12297_v0  ;;  %vm12467_vm7 = vcmask 818176  }
  0x8a   : > { %12454 = vst [vmem:[#allocation76_spill] sm:$0xff] %v12453_v29  ;;  %v12459_v31 = vsel %vm9241_vm4, 4294967295, %v12458_v31  ;;  %vm12460_vm3 = vmmov %vm12455_vm13  ;;  %v12463_v29 = vmov 0 }
  0x8b   : > { %6326 = vmatmul.mubr.msk.bf16.vlgmr.msra.gmra.mrb[32].mxu1 %vm12460_vm3, %v8116_v14  ;;  %vm9256_vm13 = vmpackc.low %vm12462_vm15, %vm12461_vm2  ;;  %vm12466_vm3 = vnez %v12301_v58  ;;  %vm12469_vm15 = vnez %v12305_v60 }
  0x8c   : > { %v12464_v29 = vsel %vm9256_vm13, 4294967295, %v12463_v29  ;;  %6370 = vmatpush1.bf16.msk.msra.mxu1 %vm9133_vm14, %v12200_v44  ;;  %1582 = vmatprep.mubr.bf16.mxu1 %v12194_v52  ;;  %vm12468_vm2 = vmmov %vm12467_vm7 }
  0x8d   : > { %6372 = vmatprep.subr.msk.bf16.mxu1 %vm8651_vm6, %v12200_v44  ;;  %6341 = vmatpush1.bf16.msk.msra.mxu0 %vm8674_vm11, %v12200_v44  ;;  %vm12474_vm11 = vnez %v12327_v45  ;;  %vm12476_vm6 = vcmask 818176  }
  0x8e   : > { %6343 = vmatprep.subr.msk.bf16.mxu0 %vm12465_vm9, %v12200_v44  ;;  %vm12470_vm9 = vnez %v12309_v16  ;;  %vm12478_vm5 = vmmov %vm12476_vm6 }
  0x8f   : > { %6294 = vmatmul.mubr.msk.bf16.gmra.mrb[36].mxu0 %vm12467_vm7, %v8215_v2  ;;  %vm12472_vm7 = vnez %v12317_v59 }
  0x90   : > { %6374 = vmatpush1.bf16.msk.msra.mxu1 %vm8693_vm0, %v12200_v44  ;;  %1479 = vmatprep.mubr.bf16.mxu0 %v12194_v52  ;;  %vm518_vm0 = vcmp.eq.s32.totalorder %v7814_v32, %v8435_v56 }
  0x91   : > { %6376 = vmatprep.subr.msk.bf16.mxu1 %vm12466_vm3, %v12200_v44  ;;  %6345 = vmatpush1.bf16.msk.msra.mxu0 %vm12469_vm15, %v12200_v44  ;;  %vm12471_vm3 = vnez %v12313_v8  ;;  %vm12473_vm15 = vnez %v12322_v55  ;;  %v6170_v35 = vsel %vm518_vm0, 1.0, %v12206_v51  ;;  %vm12481_vm0 = vnez %v12347_v47 }
  0x92   : > { %6347 = vmatprep.subr.msk.bf16.mxu0 %vm12471_vm3, %v12200_v44  ;;  %vm520_vm3 = vcmp.eq.s32.totalorder %v7814_v32, %v8454_v12  ;;  %v1046_v12 = vpack.c.bf16 %v6170_v35, %v6170_v35 }
  0x93   : > { %6327 = vmatmul.mubr.msk.bf16.gmra.mrb[36].mxu1 %vm12468_vm2, %v8215_v2  ;;  %vm519_vm2 = vcmp.eq.s32.totalorder %v7814_v32, %v8194_v48  ;;  %v6172_v56 = vsel %vm520_vm3, 1.0, %v12206_v51  ;;  %vm12485_vm3 = vnez %v12355_v39 }
  0x94   : > { %1592 = vmatprep.mubr.bf16.mxu1 %v12194_v52  ;;  %6378 = vmatpush1.bf16.msk.msra.mxu1 %vm12470_vm9, %v12200_v44  ;;  %vm521_vm9 = vcmp.eq.s32.totalorder %v7814_v32, %v8210_v3  ;;  %v6171_v3 = vsel %vm519_vm2, 1.0, %v12206_v51  ;;  %vm12480_vm2 = vnez %v12345_v50 }
  0x95   : > { %6380 = vmatprep.subr.msk.bf16.mxu1 %vm12472_vm7, %v12200_v44  ;;  %6349 = vmatpush1.bf16.msk.msra.mxu0 %vm12473_vm15, %v12200_v44  ;;  %vm12475_vm7 = vnez %v12331_v57  ;;  %vm12477_vm15 = vnez %v12336_v61  ;;  %v6173_v37 = vsel %vm521_vm9, 1.0, %v12206_v51  ;;  %v9340_v48 = vpack.c.bf16 %v6171_v3, %v6171_v3 }
  0x96   : > { %6351 = vmatprep.subr.msk.bf16.mxu0 %vm12475_vm7, %v12200_v44  ;;  %v9345_v61 = vpack.c.bf16 %v6173_v37, %v6173_v37  ;;  %v1048_v57 = vpack.c.bf16 %v6172_v56, %v6172_v56  ;;  %vm12484_vm9 = vnez %v12352_v41  ;;  %v12520_v37 = vld [vmem:[#allocation74_spill] sm:$0xff] }
  0x97   : > { %6295 = vmatmul.mubr.msk.bf16.gmra.mrb[40].mxu0 %vm12476_vm6, %v8394_v13  ;;  %vm12479_vm6 = vnez %v12341_v54 }
  0x98   : > { %6382 = vmatpush1.bf16.msk.msra.mxu1 %vm12474_vm11, %v12200_v44  ;;  %1489 = vmatprep.mubr.bf16.mxu0 %v12194_v52  ;;  %12483 = vst [vmem:[#allocation77_spill] sm:$0xff] %v9345_v61 }
  0x99   : > { %6384 = vmatprep.subr.msk.bf16.mxu1 %vm12477_vm15, %v12200_v44  ;;  %6353 = vmatpush1.bf16.msk.msra.mxu0 %vm12479_vm6, %v12200_v44  ;;  %vm12489_vm6 = vcmask 818176  }
  0x9a   : > { %6355 = vmatprep.subr.msk.bf16.mxu0 %vm12481_vm0, %v12200_v44  ;;  %vm12486_vm0 = vcmask 1041408  }
  0x9b   : > { %6328 = vmatmul.mubr.msk.bf16.gmra.mrb[40].mxu1 %vm12478_vm5, %v8394_v13  ;;  %vm12482_vm5 = vnez %v12349_v43  ;;  %vm12491_vm15 = vmmov %vm12486_vm0 }
  0x9c   : > { %1602 = vmatprep.mubr.bf16.mxu1 %v12194_v52  ;;  %6386 = vmatpush1.bf16.msk.msra.mxu1 %vm12480_vm2, %v12200_v44  ;;  %vm12487_vm2 = vmmov %vm12486_vm0  ;;  %v9363_v35 = vsel %vm12491_vm15, %v1048_v57, 0  ;;  %v12517_v57 = vld [vmem:[#allocation73_spill] sm:$0xff] }
  0x9d   : > { %6388 = vmatprep.subr.msk.bf16.mxu1 %vm12482_vm5, %v12200_v44  ;;  %6357 = vmatpush1.bf16.msk.msra.mxu0 %vm12484_vm9, %v12200_v44  ;;  %v9356_v3 = vsel %vm12487_vm2, %v1046_v12, 0  ;;  %vm12490_vm5 = vmmov %vm12486_vm0  ;;  %12492 = vst [vmem:[#allocation79_spill] sm:$0xff] %v9363_v35  ;;  %vm12495_vm2 = vnez %v12362_v36 }
  0x9e   : > { %6358 = vmatprep.subr.msk.bf16.mxu0 %vm12486_vm0, %v9340_v48  ;;  %12488 = vst [vmem:[#allocation78_spill] sm:$0xff] %v9356_v3  ;;  %vm12493_vm9 = vmmov %vm12489_vm6 }
  0x9f   : > { %6296 = vmatmul.mubr.msk.bf16.gmra.mrb[44].mxu0 %vm12489_vm6, %v8567_v5  ;;  %vm12494_vm6 = vnez %v12358_v38  ;;  %vm12496_vm15 = vmmov %vm12493_vm9 }
  0xa0   : > { %6390 = vmatpush1.bf16.msk.msra.mxu1 %vm12485_vm3, %v12200_v44  ;;  %1499 = vmatprep.mubr.bf16.mxu0 %v12194_v52  ;;  %vm12497_vm0 = vmmov %vm12493_vm9 }
  0xa1   : > { %6391 = vmatprep.subr.msk.bf16.mxu1 %vm12490_vm5, %v9345_v61  ;;  %1666 = vmatpush1.bf16.msra.mxu0 %v9356_v3  ;;  %vm12498_vm5 = vmmov %vm12497_vm0 }
  0xa2   : > { %6401 = vmatprep.subr.msk.bf16.mxu0 %vm12494_vm6, %v12200_v44  ;;  %vm12512_vm6 = vnez %v12396_v9 }
  0xa3   : > { %6329 = vmatmul.mubr.msk.bf16.gmra.mrb[44].mxu1 %vm12493_vm9, %v8567_v5  ;;  %vm12499_vm9 = vmmov %vm12497_vm0 }
  0xa4   : > { %1612 = vmatprep.mubr.bf16.mxu1 %v12194_v52  ;;  %1779 = vmatpush1.bf16.msra.mxu1 %v9363_v35 }
  0xa5   : > { %6434 = vmatprep.subr.msk.bf16.mxu1 %vm12495_vm2, %v12200_v44  ;;  %vm12500_vm2 = vmmov %vm12497_vm0 }
  0xa7   : > { %6297 = vmatmul.mubr.msk.bf16.gmra.mrb[48].mxu0 %vm12496_vm15, %v8744_v63  ;;  %vm12501_vm15 = vmmov %vm12497_vm0 }
  0xa8   : > { %1509 = vmatprep.mubr.bf16.mxu0 %v12194_v52 }
  0xab   : > { %6330 = vmatmul.mubr.msk.bf16.gmra.mrb[48].mxu1 %vm12497_vm0, %v8744_v63 }
  0xac   : > { %1622 = vmatprep.mubr.bf16.mxu1 %v12194_v52 }
  0xaf   : > { %6298 = vmatmul.mubr.msk.bf16.gmra.mrb[52].mxu0 %vm12498_vm5, %v8898_v62  ;;  %vm12502_vm5 = vmmov %vm12497_vm0 }
  0xb0   : > { %1519 = vmatprep.mubr.bf16.mxu0 %v12194_v52 }
  0xb3   : > { %6331 = vmatmul.mubr.msk.bf16.gmra.mrb[52].mxu1 %vm12499_vm9, %v8898_v62  ;;  %vm12503_vm9 = vmmov %vm12497_vm0 }
  0xb4   : > { %1632 = vmatprep.mubr.bf16.mxu1 %v12194_v52 }
  0xb7   : > { %6299 = vmatmul.mubr.msk.bf16.gmra.mrb[56].mxu0 %vm12500_vm2, %v8998_v34  ;;  %vm12504_vm2 = vmmov %vm12497_vm0 }
  0xb8   : > { %1529 = vmatprep.mubr.bf16.mxu0 %v12194_v52 }
  0xbb   : > { %6332 = vmatmul.mubr.msk.bf16.gmra.mrb[56].mxu1 %vm12501_vm15, %v8998_v34  ;;  %vm12505_vm15 = vnez %v12366_v33 }
  0xbc   : > { %1642 = vmatprep.mubr.bf16.mxu1 %v12194_v52 }
  0xbf   : > { %6300 = vmatmul.mubr.msk.bf16.gmra.mrb[60].mxu0 %vm12497_vm0, %v9093_v10  ;;  %vm12506_vm0 = vnez %v12370_v30 }
  0xc0   : > { %1685 = vmatprep.mubr.bf16.mxu0 %v12194_v52 }
  0xc3   : > { %6333 = vmatmul.mubr.msk.bf16.gmra.mrb[60].mxu1 %vm12502_vm5, %v9093_v10  ;;  %vm12507_vm5 = vnez %v12374_v28 }
  0xc4   : > { %1798 = vmatprep.mubr.bf16.mxu1 %v12194_v52 }
  0xc7   : > { %6359 = vmatmul.mubr.msk.bf16.vlgmr.msra.gmra.mrb[64].mxu0 %vm12503_vm9, %v8116_v14  ;;  %vm12508_vm9 = vnez %v12378_v27 }
  0xc8   : > { %6403 = vmatpush1.bf16.msk.msra.mxu0 %vm12505_vm15, %v12200_v44  ;;  %1695 = vmatprep.mubr.bf16.mxu0 %v12194_v52  ;;  %vm12510_vm15 = vnez %v12388_v23 }
  0xc9   : > { %6405 = vmatprep.subr.msk.bf16.mxu0 %vm12507_vm5, %v12200_v44  ;;  %vm12513_vm5 = vcmask 818176  }
  0xcb   : > { %6392 = vmatmul.mubr.msk.bf16.vlgmr.msra.gmra.mrb[64].mxu1 %vm12504_vm2, %v8116_v14  ;;  %vm12509_vm2 = vnez %v12383_v26 }
  0xcc   : > { %6436 = vmatpush1.bf16.msk.msra.mxu1 %vm12506_vm0, %v12200_v44  ;;  %1808 = vmatprep.mubr.bf16.mxu1 %v12194_v52  ;;  %vm12511_vm0 = vnez %v12392_v22 }
  0xcd   : > { %6438 = vmatprep.subr.msk.bf16.mxu1 %vm12508_vm9, %v12200_v44  ;;  %6407 = vmatpush1.bf16.msk.msra.mxu0 %vm12509_vm2, %v12200_v44  ;;  %vm12514_vm9 = vmmov %vm12513_vm5  ;;  %vm12522_vm2 = vcmask 818176  }
  0xce   : > { %6409 = vmatprep.subr.msk.bf16.mxu0 %vm12511_vm0, %v12200_v44  ;;  %vm12519_vm0 = vnez %v12427_v15  ;;  %vm12525_vm3 = vmmov %vm12522_vm2  ;;  %v4485_v15 = vld [vmem:[%s9616_s16 + $0x558] sm:$0xff] }
  0xcf   : > { %6360 = vmatmul.mubr.msk.bf16.gmra.mrb[68].mxu0 %vm12513_vm5, %v8215_v2  ;;  %vm12516_vm5 = vnez %v12416_v19 }
  0xd0   : > { %6440 = vmatpush1.bf16.msk.msra.mxu1 %vm12510_vm15, %v12200_v44  ;;  %1705 = vmatprep.mubr.bf16.mxu0 %v12194_v52  ;;  %vm12515_vm15 = vnez %v12400_v21 }
  0xd1   : > { %6442 = vmatprep.subr.msk.bf16.mxu1 %vm12512_vm6, %v12200_v44  ;;  %6411 = vmatpush1.bf16.msk.msra.mxu0 %vm12515_vm15, %v12200_v44  ;;  %vm522_vm6 = vcmp.eq.s32.totalorder %v7814_v32, %v8610_v42  ;;  %vm12518_vm15 = vnez %v12517_v57  ;;  %v12523_v42 = vld [vmem:[#allocation75_spill] sm:$0xff] }
  0xd2   : > { %6413 = vmatprep.subr.msk.bf16.mxu0 %vm9129_vm10, %v12200_v44  ;;  %vm524_vm10 = vcmp.eq.s32.totalorder %v7814_v32, %v8614_v40 }
  0xd3   : > { %6393 = vmatmul.mubr.msk.bf16.gmra.mrb[68].mxu1 %vm12514_vm9, %v8215_v2  ;;  %vm523_vm9 = vcmp.eq.s32.totalorder %v7814_v32, %v8588_v53  ;;  %v6174_v53 = vsel %vm522_vm6, 1.0, %v12206_v51  ;;  %v6176_v40 = vsel %vm524_vm10, 1.0, %v12206_v51  ;;  %vm12528_vm6 = vnez %v12449_v24 }
  0xd4   : > { %1818 = vmatprep.mubr.bf16.mxu1 %v12194_v52  ;;  %6444 = vmatpush1.bf16.msk.msra.mxu1 %vm9115_vm12, %v12200_v44  ;;  %vm525_vm12 = vcmp.eq.s32.totalorder %v7814_v32, %v8592_v7  ;;  %v6175_v7 = vsel %vm523_vm9, 1.0, %v12206_v51  ;;  %vm12527_vm9 = vnez %v12445_v17  ;;  %v1050_v12 = vpack.c.bf16 %v6174_v53, %v6174_v53 }
  0xd5   : > { %6446 = vmatprep.subr.msk.bf16.mxu1 %vm12516_vm5, %v12200_v44  ;;  %6415 = vmatpush1.bf16.msk.msra.mxu0 %vm12518_vm15, %v12200_v44  ;;  %vm12521_vm5 = vnez %v12520_v37  ;;  %vm12524_vm15 = vnez %v12523_v42  ;;  %v6177_v32 = vsel %vm525_vm12, 1.0, %v12206_v51  ;;  %v9488_v56 = vpack.c.bf16 %v6175_v7, %v6175_v7  ;;  %v12530_v42 = vld [vmem:[#allocation76_spill] sm:$0xff] }
  0xd6   : > { %6417 = vmatprep.subr.msk.bf16.mxu0 %vm12521_vm5, %v12200_v44  ;;  %v9493_v51 = vpack.c.bf16 %v6177_v32, %v6177_v32  ;;  %v1052_v37 = vpack.c.bf16 %v6176_v40, %v6176_v40  ;;  %vm12532_vm12 = vcmask 1041408   ;;  %v12539_v32 = vld [vmem:[#allocation7_spill] sm:$0xff]  ;;  %v12541_v40 = vld [vmem:[#allocation8_spill] sm:$0xff] }
  0xd7   : > { %6361 = vmatmul.mubr.msk.bf16.gmra.mrb[72].mxu0 %vm12522_vm2, %v8394_v13  ;;  %vm12526_vm2 = vnez %v12441_v25  ;;  %12529 = vst [vmem:[#allocation73_spill] sm:$0xff] %v9488_v56  ;;  %vm12533_vm10 = vmmov %vm12532_vm12 }
  0xd8   : > { %6448 = vmatpush1.bf16.msk.msra.mxu1 %vm12519_vm0, %v12200_v44  ;;  %1715 = vmatprep.mubr.bf16.mxu0 %v12194_v52  ;;  %12531 = vst [vmem:[#allocation76_spill] sm:$0xff] %v9493_v51  ;;  %v9504_v7 = vsel %vm12533_vm10, %v1050_v12, 0  ;;  %v12553_v12 = vld [vmem:[#allocation10_spill] sm:$0xff] }
  0xd9   : > { %6450 = vmatprep.subr.msk.bf16.mxu1 %vm12524_vm15, %v12200_v44  ;;  %6419 = vmatpush1.bf16.msk.msra.mxu0 %vm12526_vm2, %v12200_v44  ;;  %12534 = vst [vmem:[#allocation80_spill] sm:$0xff] %v9504_v7 }
  0xda   : > { %6421 = vmatprep.subr.msk.bf16.mxu0 %vm12528_vm6, %v12200_v44 }
  0xdb   : > { %6394 = vmatmul.mubr.msk.bf16.gmra.mrb[72].mxu1 %vm12525_vm3, %v8394_v13 }
  0xdc   : > { %1828 = vmatprep.mubr.bf16.mxu1 %v12194_v52  ;;  %6452 = vmatpush1.bf16.msk.msra.mxu1 %vm12527_vm9, %v12200_v44 }
  0xdd   : > { %6454 = vmatprep.subr.msk.bf16.mxu1 %vm9229_vm8, %v12200_v44  ;;  %6423 = vmatpush1.bf16.msk.msra.mxu0 %vm9241_vm4, %v12200_v44  ;;  %vm12535_vm8 = vmmov %vm12533_vm10 }
  0xde   : > { %6424 = vmatprep.subr.msk.bf16.mxu0 %vm12532_vm12, %v9488_v56  ;;  %vm12536_vm6 = vmmov %vm12535_vm8  ;;  %vm12540_vm12 = vnez %v12539_v32  ;;  %v12557_v32 = vld [vmem:[#allocation12_spill] sm:$0xff] }
  0xdf   : > { %6362 = vmatmul.mubr.msk.bf16.gmra.mrb[76].mxu0 %vm12525_vm3, %v8567_v5  ;;  %v9511_v53 = vsel %vm12536_vm6, %v1052_v37, 0  ;;  %vm12538_vm4 = vmmov %vm12525_vm3  ;;  %v12551_v37 = vld [vmem:[#allocation9_spill] sm:$0xff] }
  0xe0   : > { %6456 = vmatpush1.bf16.msk.msra.mxu1 %vm9256_vm13, %v12200_v44  ;;  %12537 = vst [vmem:[#allocation81_spill] sm:$0xff] %v9511_v53  ;;  %1725 = vmatprep.mubr.bf16.mxu0 %v12194_v52  ;;  %vm12543_vm6 = vmmov %vm12525_vm3 }
  0xe1   : > { %6457 = vmatprep.subr.msk.bf16.mxu1 %vm12535_vm8, %v9493_v51  ;;  %1892 = vmatpush1.bf16.msra.mxu0 %v9504_v7  ;;  %vm12542_vm8 = vnez %v12541_v40  ;;  %vm12545_vm10 = vmmov %vm12525_vm3  ;;  %v12555_v40 = vld [vmem:[#allocation11_spill] sm:$0xff]  ;;  %v4368_v7 = vld [vmem:[%s9616_s16 + $0x1b0] sm:$0xff] }
  0xe2   : > { %6475 = vmatprep.subr.msk.bf16.mxu0 %vm12540_vm12, %v12200_v44 }
  0xe3   : > { %6395 = vmatmul.mubr.msk.bf16.gmra.mrb[76].mxu1 %vm12538_vm4, %v8567_v5  ;;  %vm12544_vm4 = vmmov %vm12525_vm3 }
  0xe4   : > { %1838 = vmatprep.mubr.bf16.mxu1 %v12194_v52  ;;  %2005 = vmatpush1.bf16.msra.mxu1 %v9511_v53  ;;  %v12565_v53 = vld [vmem:[#allocation16_spill] sm:$0xff] }
  0xe5   : > { %6508 = vmatprep.subr.msk.bf16.mxu1 %vm12542_vm8, %v12200_v44  ;;  %vm12546_vm8 = vmmov %vm12525_vm3  ;;  %vm12566_vm12 = vnez %v12565_v53  ;;  %v12573_v53 = vld [vmem:[#allocation19_spill] sm:$0xff] }
  0xe7   : > { %6363 = vmatmul.mubr.msk.bf16.gmra.mrb[80].mxu0 %vm12543_vm6, %v8744_v63  ;;  %vm12547_vm6 = vmmov %vm12525_vm3 }
  0xe8   : > { %1735 = vmatprep.mubr.bf16.mxu0 %v12194_v52 }
  0xeb   : > { %6396 = vmatmul.mubr.msk.bf16.gmra.mrb[80].mxu1 %vm12544_vm4, %v8744_v63  ;;  %vm12548_vm4 = vmmov %vm12525_vm3 }
  0xec   : > { %1848 = vmatprep.mubr.bf16.mxu1 %v12194_v52 }
  0xef   : > { %6364 = vmatmul.mubr.msk.bf16.gmra.mrb[84].mxu0 %vm12545_vm10, %v8898_v62  ;;  %vm12549_vm10 = vmmov %vm12525_vm3 }
  0xf0   : > { %1745 = vmatprep.mubr.bf16.mxu0 %v12194_v52 }
  0xf3   : > { %6397 = vmatmul.mubr.msk.bf16.gmra.mrb[84].mxu1 %vm12525_vm3, %v8898_v62 }
  0xf4   : > { %1858 = vmatprep.mubr.bf16.mxu1 %v12194_v52 }
  0xf7   : > { %6365 = vmatmul.mubr.msk.bf16.gmra.mrb[88].mxu0 %vm12546_vm8, %v8998_v34  ;;  %vm12550_vm8 = vmmov %vm12525_vm3 }
  0xf8   : > { %1755 = vmatprep.mubr.bf16.mxu0 %v12194_v52 }
  0xfb   : > { %6398 = vmatmul.mubr.msk.bf16.gmra.mrb[88].mxu1 %vm12547_vm6, %v8998_v34  ;;  %vm12552_vm6 = vnez %v12551_v37  ;;  %v12561_v37 = vld [vmem:[#allocation14_spill] sm:$0xff] }
  0xfc   : > { %1868 = vmatprep.mubr.bf16.mxu1 %v12194_v52 }
  0xff   : > { %6366 = vmatmul.mubr.msk.bf16.gmra.mrb[92].mxu0 %vm12548_vm4, %v9093_v10  ;;  %vm12554_vm4 = vnez %v12553_v12  ;;  %v12563_v12 = vld [vmem:[#allocation15_spill] sm:$0xff] }
 0x100   : > { %1911 = vmatprep.mubr.bf16.mxu0 %v12194_v52 }
 0x103   : > { %6399 = vmatmul.mubr.msk.bf16.gmra.mrb[92].mxu1 %vm12549_vm10, %v9093_v10  ;;  %vm12556_vm10 = vnez %v12555_v40  ;;  %v4367_v40 = vld [vmem:[%s9616_s16 + $0x1a8] sm:$0xff] }
 0x104   : > { %2024 = vmatprep.mubr.bf16.mxu1 %v12194_v52 }
 0x107   : > { %6425 = vmatmul.mubr.msk.bf16.vlgmr.msra.gmra.mrb[96].mxu0 %vm12525_vm3, %v8116_v14  ;;  %vm12558_vm3 = vnez %v12557_v32  ;;  %v12595_v32 = vld [vmem:[#allocation35_spill] sm:$0xff] }
 0x108   : > { %6477 = vmatpush1.bf16.msk.msra.mxu0 %vm12552_vm6, %v12200_v44  ;;  %1921 = vmatprep.mubr.bf16.mxu0 %v12194_v52  ;;  %vm12562_vm6 = vnez %v12561_v37  ;;  %v12569_v37 = vld [vmem:[#allocation17_spill] sm:$0xff] }
 0x109   : > { %6479 = vmatprep.subr.msk.bf16.mxu0 %vm12556_vm10, %v12200_v44  ;;  %vm12567_vm10 = vcmask 818176  }
 0x10b   : > { %6458 = vmatmul.mubr.msk.bf16.vlgmr.msra.gmra.mrb[96].mxu1 %vm12550_vm8, %v8116_v14  ;;  %v12559_v14 = vld [vmem:[#allocation13_spill] sm:$0xff] }
 0x10c   : > { %6510 = vmatpush1.bf16.msk.msra.mxu1 %vm12554_vm4, %v12200_v44  ;;  %2034 = vmatprep.mubr.bf16.mxu1 %v12194_v52  ;;  %vm12560_vm8 = vnez %v12559_v14  ;;  %vm12564_vm4 = vnez %v12563_v12  ;;  %v12571_v12 = vld [vmem:[#allocation18_spill] sm:$0xff]  ;;  %v12577_v14 = vld [vmem:[#allocation21_spill] sm:$0xff] }
 0x10d   : > { %6512 = vmatprep.subr.msk.bf16.mxu1 %vm12558_vm3, %v12200_v44  ;;  %6481 = vmatpush1.bf16.msk.msra.mxu0 %vm12560_vm8, %v12200_v44  ;;  %vm12568_vm3 = vmmov %vm12567_vm10 }
 0x10e   : > { %6483 = vmatprep.subr.msk.bf16.mxu0 %vm12564_vm4, %v12200_v44  ;;  %vm12572_vm4 = vnez %v12571_v12  ;;  %v12581_v12 = vld [vmem:[#allocation25_spill] sm:$0xff] }
 0x10f   : > { %6426 = vmatmul.mubr.msk.bf16.gmra.mrb[100].mxu0 %vm12567_vm10, %v8215_v2  ;;  %vm12574_vm10 = vnez %v12573_v53  ;;  %v12591_v53 = vld [vmem:[#allocation31_spill] sm:$0xff] }
 0x110   : > { %6514 = vmatpush1.bf16.msk.msra.mxu1 %vm12562_vm6, %v12200_v44  ;;  %1931 = vmatprep.mubr.bf16.mxu0 %v12194_v52  ;;  %vm12570_vm6 = vnez %v12569_v37  ;;  %v12579_v37 = vld [vmem:[#allocation23_spill] sm:$0xff] }
 0x111   : > { %6516 = vmatprep.subr.msk.bf16.mxu1 %vm12566_vm12, %v12200_v44  ;;  %6485 = vmatpush1.bf16.msk.msra.mxu0 %vm12570_vm6, %v12200_v44  ;;  %vm12578_vm12 = vnez %v12577_v14  ;;  %vm12580_vm6 = vnez %v12579_v37  ;;  %v12587_v37 = vld [vmem:[#allocation29_spill] sm:$0xff]  ;;  %v12589_v14 = vld [vmem:[#allocation30_spill] sm:$0xff] }
 0x112   : > { %6487 = vmatprep.subr.msk.bf16.mxu0 %vm12574_vm10, %v12200_v44  ;;  %vm12583_vm10 = vcmask 818176  }
 0x113   : > { %6459 = vmatmul.mubr.msk.bf16.gmra.mrb[100].mxu1 %vm12568_vm3, %v8215_v2  ;;  %v12575_v2 = vld [vmem:[#allocation20_spill] sm:$0xff] }
 0x114   : > { %2044 = vmatprep.mubr.bf16.mxu1 %v12194_v52  ;;  %6518 = vmatpush1.bf16.msk.msra.mxu1 %vm12572_vm4, %v12200_v44  ;;  %vm12576_vm3 = vnez %v12575_v2  ;;  %vm12582_vm4 = vnez %v12581_v12  ;;  %v12584_v2 = vld [vmem:[#allocation27_spill] sm:$0xff]  ;;  %v4314_v12 = vld [vmem:[%s9616_s16] sm:$0xff] }
 0x115   : > { %6520 = vmatprep.subr.msk.bf16.mxu1 %vm12576_vm3, %v12200_v44  ;;  %6489 = vmatpush1.bf16.msk.msra.mxu0 %vm12578_vm12, %v12200_v44  ;;  %vm12585_vm3 = vnez %v12584_v2  ;;  %vm12586_vm12 = vmmov %vm12583_vm10  ;;  %v4330_v2 = vld [vmem:[%s9616_s16 + $0x80] sm:$0xff] }
 0x116   : > { %6491 = vmatprep.subr.msk.bf16.mxu0 %vm12582_vm4, %v12200_v44  ;;  %vm12592_vm4 = vnez %v12591_v53  ;;  %4570 = vxpose.xlu0.b32.start [1/16] %v4314_v12, 128  ;;  %v4315_v12 = vld [vmem:[%s9616_s16 + $0x8] sm:$0xff]  ;;  %v4332_v53 = vld [vmem:[%s9616_s16 + $0x90] sm:$0xff] }
 0x117   : > { %6427 = vmatmul.mubr.msk.bf16.gmra.mrb[104].mxu0 %vm12583_vm10, %v8394_v13  ;;  %vm12588_vm10 = vnez %v12587_v37  ;;  %4602 = vxpose.xlu1.b32.start [1/16] %v4330_v2, 128  ;;  %v12597_v37 = vld [vmem:[#allocation36_spill] sm:$0xff]  ;;  %v12605_v2 = vld [vmem:[#allocation37_spill] sm:$0xff] }
 0x118   : > { %6522 = vmatpush1.bf16.msk.msra.mxu1 %vm12580_vm6, %v12200_v44  ;;  %1941 = vmatprep.mubr.bf16.mxu0 %v12194_v52  ;;  %vm12596_vm6 = vnez %v12595_v32  ;;  %v12607_v32 = vld [vmem:[#allocation39_spill] sm:$0xff] }
 0x119   : > { %6524 = vmatprep.subr.msk.bf16.mxu1 %vm12585_vm3, %v12200_v44  ;;  %6493 = vmatpush1.bf16.msk.msra.mxu0 %vm12588_vm10, %v12200_v44  ;;  %vm12590_vm3 = vnez %v12589_v14  ;;  %vm12598_vm10 = vnez %v12597_v37  ;;  %v12599_v14 = vld [vmem:[#allocation32_spill] sm:$0xff]  ;;  %v4331_v37 = vld [vmem:[%s9616_s16 + $0x88] sm:$0xff] }
 0x11a   : > { %6495 = vmatprep.subr.msk.bf16.mxu0 %vm12592_vm4, %v12200_v44  ;;  %vm12601_vm4 = vcmask 818176   ;;  %4571 = vxpose.xlu0.b32.cont [2/16] %v4315_v12, 128  ;;  %v4333_v12 = vld [vmem:[%s9616_s16 + $0x98] sm:$0xff] }
 0x11b   : > { %6460 = vmatmul.mubr.msk.bf16.gmra.mrb[104].mxu1 %vm12586_vm12, %v8394_v13  ;;  %v12593_v13 = vld [vmem:[#allocation33_spill] sm:$0xff]  ;;  %vm12604_vm8 = vmmov %vm12601_vm4  ;;  %4603 = vxpose.xlu1.b32.cont [2/16] %v4331_v37, 128  ;;  %v4318_v37 = vld [vmem:[%s9616_s16 + $0x20] sm:$0xff] }
 0x11c   : > { %2054 = vmatprep.mubr.bf16.mxu1 %v12194_v52  ;;  %6526 = vmatpush1.bf16.msk.msra.mxu1 %vm12590_vm3, %v12200_v44  ;;  %vm12594_vm12 = vnez %v12593_v13  ;;  %vm12600_vm3 = vcmask 1041408   ;;  %v12602_v13 = vld [vmem:[#allocation34_spill] sm:$0xff] }
 0x11d   : > { %6528 = vmatprep.subr.msk.bf16.mxu1 %vm12594_vm12, %v12200_v44  ;;  %6497 = vmatpush1.bf16.msk.msra.mxu0 %vm12596_vm6, %v12200_v44  ;;  %vm12603_vm12 = vmmov %vm12600_vm3 }
 0x11e   : > { %6498 = vmatprep.subr.msk.bf16.mxu0 %vm12600_vm3, %v12599_v14  ;;  %v12606_v14 = vld [vmem:[#allocation38_spill] sm:$0xff]  ;;  %vm12611_vm3 = vcmask 818176  }
 0x11f   : > { %6428 = vmatmul.mubr.msk.bf16.gmra.mrb[108].mxu0 %vm12601_vm4, %v8567_v5  ;;  %vm12608_vm4 = vnez %v12607_v32  ;;  %v4317_v32 = vld [vmem:[%s9616_s16 + $0x18] sm:$0xff]  ;;  %4604 = vxpose.xlu1.b32.cont [3/16] %v4332_v53, 128  ;;  %v4335_v53 = vld [vmem:[%s9616_s16 + $0xa8] sm:$0xff] }
 0x120   : > { %6530 = vmatpush1.bf16.msk.msra.mxu1 %vm12598_vm10, %v12200_v44  ;;  %1951 = vmatprep.mubr.bf16.mxu0 %v12194_v52 }
 0x121   : > { %6531 = vmatprep.subr.msk.bf16.mxu1 %vm12603_vm12, %v12602_v13  ;;  %2182 = vmatpush1.bf16.msra.mxu0 %v12605_v2  ;;  %v12609_v13 = vld [vmem:[#allocation40_spill] sm:$0xff]  ;;  %vm12612_vm12 = vmmov %vm12611_vm3  ;;  %v4345_v2 = vld [vmem:[%s9616_s16 + $0xf8] sm:$0xff] }
 0x122   : > { %6541 = vmatprep.subr.msk.bf16.mxu0 %vm12608_vm4, %v12200_v44 }
 0x123   : > { %6461 = vmatmul.mubr.msk.bf16.gmra.mrb[108].mxu1 %vm12604_vm8, %v8567_v5  ;;  %vm12610_vm8 = vnez %v12609_v13  ;;  %v4316_v5 = vld [vmem:[%s9616_s16 + $0x10] sm:$0xff]  ;;  %4605 = vxpose.xlu1.b32.cont [4/16] %v4333_v12, 128  ;;  %v4334_v13 = vld [vmem:[%s9616_s16 + $0xa0] sm:$0xff] }
 0x124   : > { %2064 = vmatprep.mubr.bf16.mxu1 %v12194_v52  ;;  %2295 = vmatpush1.bf16.msra.mxu1 %v12606_v14  ;;  %v4322_v12 = vld [vmem:[%s9616_s16 + $0x40] sm:$0xff] }
 0x125   : > { %6574 = vmatprep.subr.msk.bf16.mxu1 %vm12610_vm8, %v12200_v44  ;;  %4572 = vxpose.xlu0.b32.cont [3/16] %v4316_v5, 128  ;;  %v4336_v5 = vld [vmem:[%s9616_s16 + $0xb0] sm:$0xff]  ;;  %v12675_v14 = vld [vmem:[#allocation66_spill] sm:$0xff] }
 0x127   : > { %6429 = vmatmul.mubr.msk.bf16.gmra.mrb[112].mxu0 %vm12611_vm3, %v8744_v63  ;;  %4606 = vxpose.xlu1.b32.cont [5/16] %v4334_v13, 128  ;;  %v4337_v13 = vld [vmem:[%s9616_s16 + $0xb8] sm:$0xff] }
 0x128   : > { %1961 = vmatprep.mubr.bf16.mxu0 %v12194_v52 }
 0x129   : > { %4573 = vxpose.xlu0.b32.cont [4/16] %v4317_v32, 128  ;;  %v4320_v32 = vld [vmem:[%s9616_s16 + $0x30] sm:$0xff] }
 0x12b   : > { %6462 = vmatmul.mubr.msk.bf16.gmra.mrb[112].mxu1 %vm12612_vm12, %v8744_v63  ;;  %vm12613_vm12 = vmmov %vm12611_vm3  ;;  %v4319_v63 = vld [vmem:[%s9616_s16 + $0x28] sm:$0xff]  ;;  %4607 = vxpose.xlu1.b32.cont [6/16] %v4335_v53, 128  ;;  %v9705_v53 = vld [vmem:[%s11707_s0] sm:$0xff]  }
 0x12c   : > { %2074 = vmatprep.mubr.bf16.mxu1 %v12194_v52 }
 0x12d   : > { %4574 = vxpose.xlu0.b32.cont [5/16] %v4318_v37, 128  ;;  %v4338_v37 = vld [vmem:[%s9616_s16 + $0xc0] sm:$0xff] }
 0x12f   : > { %6430 = vmatmul.mubr.msk.bf16.gmra.mrb[116].mxu0 %vm12611_vm3, %v8898_v62  ;;  %4608 = vxpose.xlu1.b32.cont [7/16] %v4336_v5, 128  ;;  %v4340_v5 = vld [vmem:[%s9616_s16 + $0xd0] sm:$0xff] }
 0x130   : > { %1971 = vmatprep.mubr.bf16.mxu0 %v12194_v52 }
 0x131   : > { %4575 = vxpose.xlu0.b32.cont [6/16] %v4319_v63, 128  ;;  %v4339_v63 = vld [vmem:[%s9616_s16 + $0xc8] sm:$0xff] }
 0x133   : > { %6463 = vmatmul.mubr.msk.bf16.gmra.mrb[116].mxu1 %vm12613_vm12, %v8898_v62  ;;  %vm12614_vm12 = vmmov %vm12611_vm3  ;;  %v4321_v62 = vld [vmem:[%s9616_s16 + $0x38] sm:$0xff]  ;;  %4609 = vxpose.xlu1.b32.cont [8/16] %v4337_v13, 128 }
 0x134   : > { %2084 = vmatprep.mubr.bf16.mxu1 %v12194_v52  ;;  %v4325_v13 = vld [vmem:[%s9616_s16 + $0x58] sm:$0xff] }
 0x135   : > { %4576 = vxpose.xlu0.b32.cont [7/16] %v4320_v32, 128  ;;  %v4324_v32 = vld [vmem:[%s9616_s16 + $0x50] sm:$0xff] }
 0x137   : > { %6431 = vmatmul.mubr.msk.bf16.gmra.mrb[120].mxu0 %vm12611_vm3, %v8998_v34  ;;  %4610 = vxpose.xlu1.b32.cont [9/16] %v4338_v37, 128  ;;  %v9728_v37 = vld [vmem:[%s11707_s0 + $0x8] sm:$0xff]  }
 0x138   : > { %1981 = vmatprep.mubr.bf16.mxu0 %v12194_v52 }
 0x139   : > { %4577 = vxpose.xlu0.b32.cont [8/16] %v4321_v62, 128  ;;  %v12619_v62 = vld [vmem:[#allocation42_spill] sm:$0xff] }
 0x13a   : > { %vm12620_vm4 = vnez %v12619_v62  ;;  %v12629_v62 = vld [vmem:[#allocation47_spill] sm:$0xff] }
 0x13b   : > { %6464 = vmatmul.mubr.msk.bf16.gmra.mrb[120].mxu1 %vm12614_vm12, %v8998_v34  ;;  %vm12615_vm12 = vmmov %vm12611_vm3  ;;  %v4323_v34 = vld [vmem:[%s9616_s16 + $0x48] sm:$0xff]  ;;  %4611 = vxpose.xlu1.b32.cont [10/16] %v4339_v63, 128  ;;  %v12625_v63 = vld [vmem:[#allocation45_spill] sm:$0xff] }
 0x13c   : > { %2094 = vmatprep.mubr.bf16.mxu1 %v12194_v52 }
 0x13d   : > { %4578 = vxpose.xlu0.b32.cont [9/16] %v4322_v12, 128  ;;  %v12621_v12 = vld [vmem:[#allocation43_spill] sm:$0xff] }
 0x13f   : > { %6432 = vmatmul.mubr.msk.bf16.gmra.mrb[124].mxu0 %vm12611_vm3, %v9093_v10  ;;  %4612 = vxpose.xlu1.b32.cont [11/16] %v4340_v5, 128  ;;  %v4326_v5 = vld [vmem:[%s9616_s16 + $0x60] sm:$0xff] }
 0x140   : > { %2201 = vmatprep.mubr.bf16.mxu0 %v12194_v52 }
 0x141   : > { %4579 = vxpose.xlu0.b32.cont [10/16] %v4323_v34, 128  ;;  %v12623_v34 = vld [vmem:[#allocation44_spill] sm:$0xff] }
 0x143   : > { %6465 = vmatmul.mubr.msk.bf16.gmra.mrb[124].mxu1 %vm12615_vm12, %v9093_v10  ;;  %vm12616_vm12 = vmmov %vm12611_vm3  ;;  %v12617_v10 = vld [vmem:[#allocation41_spill] sm:$0xff] }
 0x144   : > { %2314 = vmatprep.mubr.bf16.mxu1 %v12194_v52  ;;  %vm12618_vm8 = vnez %v12617_v10  ;;  %v12631_v10 = vld [vmem:[#allocation48_spill] sm:$0xff] }
 0x145   : > { %4580 = vxpose.xlu0.b32.cont [11/16] %v4324_v32, 128  ;;  %v4341_v32 = vld [vmem:[%s9616_s16 + $0xd8] sm:$0xff]  ;;  %vm12632_vm10 = vnez %v12631_v10  ;;  %v12637_v10 = vld [vmem:[#allocation50_spill] sm:$0xff] }
 0x146   : > { %4613 = vxpose.xlu1.b32.cont [12/16] %v4341_v32, 128  ;;  %v12639_v32 = vld [vmem:[#allocation51_spill] sm:$0xff] }
 0x147   : > { %6499 = vmatmul.mubr.msk.bf16.vlgmr.msra.gmra.mrb[0].mxu0 %vm12611_vm3, %v9705_v53  ;;  %vm12622_vm3 = vnez %v12621_v12  ;;  %v12627_v12 = vld [vmem:[#allocation46_spill] sm:$0xff] }
 0x148   : > { %6543 = vmatpush1.bf16.msk.msra.mxu0 %vm12618_vm8, %v12200_v44  ;;  %2211 = vmatprep.mubr.bf16.mxu0 %v12194_v52  ;;  %vm12630_vm8 = vnez %v12629_v62  ;;  %v4342_v62 = vld [vmem:[%s9616_s16 + $0xe0] sm:$0xff] }
 0x149   : > { %6545 = vmatprep.subr.msk.bf16.mxu0 %vm12622_vm3, %v12200_v44  ;;  %4581 = vxpose.xlu0.b32.cont [12/16] %v4325_v13, 128  ;;  %vm12628_vm3 = vnez %v12627_v12  ;;  %v12635_v13 = vld [vmem:[#allocation49_spill] sm:$0xff]  ;;  %v9766_v12 = vld [vmem:[%s11707_s0 + $0x10] sm:$0xff]  }
 0x14a   : > { %4614 = vxpose.xlu1.b32.cont [13/16] %v4342_v62, 128  ;;  %v4327_v62 = vld [vmem:[%s9616_s16 + $0x68] sm:$0xff] }
 0x14b   : > { %6532 = vmatmul.mubr.msk.bf16.vlgmr.msra.gmra.mrb[0].mxu1 %vm12616_vm12, %v9705_v53  ;;  %vm12624_vm12 = vnez %v12623_v34  ;;  %v12659_v34 = vld [vmem:[#allocation62_spill] sm:$0xff] }
 0x14c   : > { %6576 = vmatpush1.bf16.msk.msra.mxu1 %vm12620_vm4, %v12200_v44  ;;  %2324 = vmatprep.mubr.bf16.mxu1 %v12194_v52  ;;  %vm12626_vm4 = vnez %v12625_v63  ;;  %v12641_v63 = vld [vmem:[#allocation52_spill] sm:$0xff] }
 0x14d   : > { %6578 = vmatprep.subr.msk.bf16.mxu1 %vm12624_vm12, %v12200_v44  ;;  %6547 = vmatpush1.bf16.msk.msra.mxu0 %vm12626_vm4, %v12200_v44  ;;  %vm12633_vm12 = vcmask 818176  }
 0x14e   : > { %6549 = vmatprep.subr.msk.bf16.mxu0 %vm12630_vm8, %v12200_v44  ;;  %vm12634_vm4 = vmmov %vm12633_vm12  ;;  %4582 = vxpose.xlu0.b32.cont [13/16] %v4326_v5, 128  ;;  %vm12649_vm8 = vcmask 818176   ;;  %v12653_v5 = vld [vmem:[#allocation59_spill] sm:$0xff] }
 0x14f   : > { %6500 = vmatmul.mubr.msk.bf16.gmra.mrb[4].mxu0 %vm12633_vm12, %v9728_v37  ;;  %vm12640_vm12 = vnez %v12639_v32  ;;  %v12647_v32 = vld [vmem:[#allocation55_spill] sm:$0xff]  ;;  %vm12652_vm6 = vmmov %vm12649_vm8 }
 0x150   : > { %6580 = vmatpush1.bf16.msk.msra.mxu1 %vm12628_vm3, %v12200_v44  ;;  %2221 = vmatprep.mubr.bf16.mxu0 %v12194_v52  ;;  %vm12636_vm3 = vnez %v12635_v13  ;;  %v12643_v13 = vld [vmem:[#allocation53_spill] sm:$0xff] }
 0x151   : > { %6582 = vmatprep.subr.msk.bf16.mxu1 %vm12632_vm10, %v12200_v44  ;;  %6551 = vmatpush1.bf16.msk.msra.mxu0 %vm12636_vm3, %v12200_v44  ;;  %vm12638_vm10 = vnez %v12637_v10  ;;  %vm12644_vm3 = vnez %v12643_v13  ;;  %v12645_v10 = vld [vmem:[#allocation54_spill] sm:$0xff]  ;;  %v9803_v13 = vld [vmem:[%s11707_s0 + $0x18] sm:$0xff]  }
 0x152   : > { %6553 = vmatprep.subr.msk.bf16.mxu0 %vm12640_vm12, %v12200_v44  ;;  %vm12648_vm12 = vnez %v12647_v32  ;;  %v4343_v32 = vld [vmem:[%s9616_s16 + $0xe8] sm:$0xff]  ;;  %4583 = vxpose.xlu0.b32.cont [14/16] %v4327_v62, 128 }
 0x153   : > { %6533 = vmatmul.mubr.msk.bf16.gmra.mrb[4].mxu1 %vm12634_vm4, %v9728_v37  ;;  %vm12642_vm4 = vnez %v12641_v63  ;;  %v12650_v63 = vld [vmem:[#allocation56_spill] sm:$0xff]  ;;  %4615 = vxpose.xlu1.b32.cont [14/16] %v4343_v32, 128  ;;  %v12671_v62 = vld [vmem:[#allocation67_spill] sm:$0xff] }
 0x154   : > { %2334 = vmatprep.mubr.bf16.mxu1 %v12194_v52  ;;  %6584 = vmatpush1.bf16.msk.msra.mxu1 %vm12638_vm10, %v12200_v44  ;;  %vm12646_vm10 = vnez %v12645_v10  ;;  %v12655_v10 = vld [vmem:[#allocation60_spill] sm:$0xff] }
 0x155   : > { %6586 = vmatprep.subr.msk.bf16.mxu1 %vm12642_vm4, %v12200_v44  ;;  %6555 = vmatpush1.bf16.msk.msra.mxu0 %vm12644_vm3, %v12200_v44  ;;  %vm12651_vm4 = vnez %v12650_v63  ;;  %v12657_v63 = vld [vmem:[#allocation61_spill] sm:$0xff]  ;;  %v4328_v32 = vld [vmem:[%s9616_s16 + $0x70] sm:$0xff] }
 0x156   : > { %6557 = vmatprep.subr.msk.bf16.mxu0 %vm12648_vm12, %v12200_v44  ;;  %vm12667_vm12 = vcmask 818176   ;;  %4584 = vxpose.xlu0.b32.cont [15/16] %v4328_v32, 128  ;;  %v4362_v32 = vld [vmem:[%s9616_s16 + $0x180] sm:$0xff] }
 0x157   : > { %6501 = vmatmul.mubr.msk.bf16.gmra.mrb[8].mxu0 %vm12649_vm8, %v9766_v12  ;;  %vm12656_vm8 = vnez %v12655_v10  ;;  %v12663_v10 = vld [vmem:[#allocation64_spill] sm:$0xff]  ;;  %vm12670_vm3 = vmmov %vm12667_vm12 }
 0x158   : > { %6588 = vmatpush1.bf16.msk.msra.mxu1 %vm12646_vm10, %v12200_v44  ;;  %2231 = vmatprep.mubr.bf16.mxu0 %v12194_v52  ;;  %vm12654_vm10 = vnez %v12653_v5  ;;  %v12661_v5 = vld [vmem:[#allocation63_spill] sm:$0xff] }
 0x159   : > { %6590 = vmatprep.subr.msk.bf16.mxu1 %vm12651_vm4, %v12200_v44  ;;  %6559 = vmatpush1.bf16.msk.msra.mxu0 %vm12654_vm10, %v12200_v44  ;;  %vm12658_vm4 = vnez %v12657_v63  ;;  %vm12662_vm10 = vnez %v12661_v5  ;;  %v12665_v63 = vld [vmem:[#allocation57_spill] sm:$0xff] }
 0x15a   : > { %6561 = vmatprep.subr.msk.bf16.mxu0 %vm12658_vm4, %v12200_v44  ;;  %vm12666_vm4 = vcmask 1041408   ;;  %v12673_v5 = vld [vmem:[#allocation65_spill] sm:$0xff] }
 0x15b   : > { %6534 = vmatmul.mubr.msk.bf16.gmra.mrb[8].mxu1 %vm12652_vm6, %v9766_v12  ;;  %vm12660_vm6 = vnez %v12659_v34  ;;  %v12668_v34 = vld [vmem:[#allocation58_spill] sm:$0xff] }
 0x15c   : > { %2344 = vmatprep.mubr.bf16.mxu1 %v12194_v52  ;;  %6592 = vmatpush1.bf16.msk.msra.mxu1 %vm12656_vm8, %v12200_v44  ;;  %vm12664_vm8 = vnez %v12663_v10  ;;  %v4344_v10 = vld [vmem:[%s9616_s16 + $0xf0] sm:$0xff] }
 0x15d   : > { %6594 = vmatprep.subr.msk.bf16.mxu1 %vm12660_vm6, %v12200_v44  ;;  %6563 = vmatpush1.bf16.msk.msra.mxu0 %vm12662_vm10, %v12200_v44  ;;  %vm12669_vm6 = vmmov %vm12666_vm4 }
 0x15e   : > { %6564 = vmatprep.subr.msk.bf16.mxu0 %vm12666_vm4, %v12665_v63  ;;  %v12672_v63 = vld [vmem:[#allocation68_spill] sm:$0xff]  ;;  %4616 = vxpose.xlu1.b32.cont [15/16] %v4344_v10, 128  ;;  %vm12677_vm4 = vcmask 818176   ;;  %v9852_v10 = vld [vmem:[%s11707_s0 + $0x28] sm:$0xff]  }
 0x15f   : > { %6502 = vmatmul.mubr.msk.bf16.gmra.mrb[12].mxu0 %vm12667_vm12, %v9803_v13  ;;  %vm12674_vm12 = vnez %v12673_v5  ;;  %v4346_v5 = vld [vmem:[%s9616_s16 + $0x100] sm:$0xff] }
 0x160   : > { %6596 = vmatpush1.bf16.msk.msra.mxu1 %vm12664_vm8, %v12200_v44  ;;  %2241 = vmatprep.mubr.bf16.mxu0 %v12194_v52 }
 0x161   : > { %6597 = vmatprep.subr.msk.bf16.mxu1 %vm12669_vm6, %v12668_v34  ;;  %2408 = vmatpush1.bf16.msra.mxu0 %v12671_v62  ;;  %v9834_v34 = vld [vmem:[%s11707_s0 + $0x20] sm:$0xff]   ;;  %v4329_v62 = vld [vmem:[%s9616_s16 + $0x78] sm:$0xff]  ;;  %vm12678_vm6 = vmmov %vm12677_vm4 }
 0x162   : > { %6607 = vmatprep.subr.msk.bf16.mxu0 %vm12674_vm12, %v12200_v44  ;;  %4585 = vxpose.xlu0.b32.end [16/16] %v4329_v62, 128  ;;  %v4347_v62 = vld [vmem:[%s9616_s16 + $0x108] sm:$0xff] }
 0x163   : > { %6535 = vmatmul.mubr.msk.bf16.gmra.mrb[12].mxu1 %vm12670_vm3, %v9803_v13  ;;  %vm12676_vm3 = vnez %v12675_v14  ;;  %4617 = vxpose.xlu1.b32.end [16/16] %v4345_v2, 128  ;;  %v4363_v14 = vld [vmem:[%s9616_s16 + $0x188] sm:$0xff]  ;;  %v4348_v2 = vld [vmem:[%s9616_s16 + $0x110] sm:$0xff] }
 0x164   : > { %2354 = vmatprep.mubr.bf16.mxu1 %v12194_v52  ;;  %2521 = vmatpush1.bf16.msra.mxu1 %v12672_v63  ;;  %v4365_v63 = vld [vmem:[%s9616_s16 + $0x198] sm:$0xff] }
 0x165   : > { %6640 = vmatprep.subr.msk.bf16.mxu1 %vm12676_vm3, %v12200_v44  ;;  %vm12682_vm3 = vmmov %vm12677_vm4 }
 0x166   : > { %4634 = vxpose.xlu0.b32.start [1/16] %v4346_v5, 128  ;;  %v4364_v5 = vld [vmem:[%s9616_s16 + $0x190] sm:$0xff] }
 0x167   : > { %6503 = vmatmul.mubr.msk.bf16.gmra.mrb[16].mxu0 %vm12677_vm4, %v9834_v34  ;;  %4666 = vxpose.xlu1.b32.start [1/16] %v4362_v32, 128  ;;  %v9867_v32 = vld [vmem:[%s11707_s0 + $0x30] sm:$0xff]  }
 0x168   : > { %2251 = vmatprep.mubr.bf16.mxu0 %v12194_v52 }
 0x16a   : > { %4635 = vxpose.xlu0.b32.cont [2/16] %v4347_v62, 128  ;;  %v4349_v62 = vld [vmem:[%s9616_s16 + $0x118] sm:$0xff] }
 0x16b   : > { %6536 = vmatmul.mubr.msk.bf16.gmra.mrb[16].mxu1 %vm12678_vm6, %v9834_v34  ;;  %vm12679_vm6 = vmmov %vm12677_vm4  ;;  %4667 = vxpose.xlu1.b32.cont [2/16] %v4363_v14, 128  ;;  %v4350_v14 = vld [vmem:[%s9616_s16 + $0x120] sm:$0xff] }
 0x16c   : > { %2364 = vmatprep.mubr.bf16.mxu1 %v12194_v52 }
 0x16e   : > { %4636 = vxpose.xlu0.b32.cont [3/16] %v4348_v2, 128  ;;  %v4366_v2 = vld [vmem:[%s9616_s16 + $0x1a0] sm:$0xff] }
 0x16f   : > { %6504 = vmatmul.mubr.msk.bf16.gmra.mrb[20].mxu0 %vm12677_vm4, %v9852_v10  ;;  %4668 = vxpose.xlu1.b32.cont [3/16] %v4364_v5, 128  ;;  %v9882_v5 = vld [vmem:[%s11707_s0 + $0x38] sm:$0xff]  }
 0x170   : > { %2261 = vmatprep.mubr.bf16.mxu0 %v12194_v52 }
 0x172   : > { %4637 = vxpose.xlu0.b32.cont [4/16] %v4349_v62, 128  ;;  %v4351_v62 = vld [vmem:[%s9616_s16 + $0x128] sm:$0xff] }
 0x173   : > { %6537 = vmatmul.mubr.msk.bf16.gmra.mrb[20].mxu1 %vm12679_vm6, %v9852_v10  ;;  %vm12680_vm6 = vmmov %vm12677_vm4  ;;  %4669 = vxpose.xlu1.b32.cont [4/16] %v4365_v63, 128  ;;  %v4352_v63 = vld [vmem:[%s9616_s16 + $0x130] sm:$0xff] }
 0x174   : > { %2374 = vmatprep.mubr.bf16.mxu1 %v12194_v52 }
 0x176   : > { %4638 = vxpose.xlu0.b32.cont [5/16] %v4350_v14, 128  ;;  %v4353_v14 = vld [vmem:[%s9616_s16 + $0x138] sm:$0xff] }
 0x177   : > { %6505 = vmatmul.mubr.msk.bf16.gmra.mrb[24].mxu0 %vm12677_vm4, %v9867_v32  ;;  %4670 = vxpose.xlu1.b32.cont [5/16] %v4366_v2, 128  ;;  %v4369_v2 = vld [vmem:[%s9616_s16 + $0x1b8] sm:$0xff] }
 0x178   : > { %2271 = vmatprep.mubr.bf16.mxu0 %v12194_v52 }
 0x17a   : > { %4639 = vxpose.xlu0.b32.cont [6/16] %v4351_v62, 128  ;;  %v4355_v62 = vld [vmem:[%s9616_s16 + $0x148] sm:$0xff] }
 0x17b   : > { %6538 = vmatmul.mubr.msk.bf16.gmra.mrb[24].mxu1 %vm12680_vm6, %v9867_v32  ;;  %vm12681_vm6 = vmmov %vm12677_vm4  ;;  %4671 = vxpose.xlu1.b32.cont [6/16] %v4367_v40, 128  ;;  %v4370_v40 = vld [vmem:[%s9616_s16 + $0x1c0] sm:$0xff] }
 0x17c   : > { %2384 = vmatprep.mubr.bf16.mxu1 %v12194_v52 }
 0x17e   : > { %4640 = vxpose.xlu0.b32.cont [7/16] %v4352_v63, 128  ;;  %v4371_v63 = vld [vmem:[%s9616_s16 + $0x1c8] sm:$0xff] }
 0x17f   : > { %6506 = vmatmul.mubr.msk.bf16.gmra.mrb[28].mxu0 %vm12677_vm4, %v9882_v5  ;;  %4672 = vxpose.xlu1.b32.cont [7/16] %v4368_v7, 128  ;;  %vm12683_vm4 = vmmov %vm12682_vm3  ;;  %v4354_v7 = vld [vmem:[%s9616_s16 + $0x140] sm:$0xff] }
 0x180   : > { %2427 = vmatprep.mubr.bf16.mxu0 %v12194_v52 }
 0x182   : > { %4641 = vxpose.xlu0.b32.cont [8/16] %v4353_v14, 128  ;;  %v12697_v14 = vld [vmem:[#allocation69_spill] sm:$0xff] }
 0x183   : > { %6539 = vmatmul.mubr.msk.bf16.gmra.mrb[28].mxu1 %vm12681_vm6, %v9882_v5  ;;  %vm12685_vm6 = vnez %v12280_v49  ;;  %4673 = vxpose.xlu1.b32.cont [8/16] %v4369_v2, 128  ;;  %v12699_v2 = vld [vmem:[#allocation70_spill] sm:$0xff] }
 0x184   : > { %2540 = vmatprep.mubr.bf16.mxu1 %v12194_v52 }
 0x186   : > { %4642 = vxpose.xlu0.b32.cont [9/16] %v4354_v7, 128  ;;  %v4356_v7 = vld [vmem:[%s9616_s16 + $0x150] sm:$0xff] }
 0x187   : > { %6565 = vmatmul.mubr.msk.bf16.vlgmr.msra.gmra.mrb[32].mxu0 %vm12682_vm3, %v9705_v53  ;;  %vm12684_vm3 = vnez %v12273_v4  ;;  %4674 = vxpose.xlu1.b32.cont [9/16] %v4370_v40, 128  ;;  %v4372_v40 = vld [vmem:[%s9616_s16 + $0x1d0] sm:$0xff] }
 0x188   : > { %6609 = vmatpush1.bf16.msk.msra.mxu0 %vm9119_vm1, %v12200_v44  ;;  %2437 = vmatprep.mubr.bf16.mxu0 %v12194_v52  ;;  %vm12688_vm1 = vnez %v12297_v0 }
 0x189   : > { %6611 = vmatprep.subr.msk.bf16.mxu0 %vm12684_vm3, %v12200_v44  ;;  %vm12689_vm3 = vnez %v12301_v58 }
 0x18a   : > { %4643 = vxpose.xlu0.b32.cont [10/16] %v4355_v62, 128  ;;  %v4357_v62 = vld [vmem:[%s9616_s16 + $0x158] sm:$0xff] }
 0x18b   : > { %6598 = vmatmul.mubr.msk.bf16.vlgmr.msra.gmra.mrb[32].mxu1 %vm12683_vm4, %v9705_v53  ;;  %vm12686_vm4 = vnez %v12288_v46  ;;  %4675 = vxpose.xlu1.b32.cont [10/16] %v4371_v63, 128  ;;  %v4373_v63 = vld [vmem:[%s9616_s16 + $0x1d8] sm:$0xff] }
 0x18c   : > { %6642 = vmatpush1.bf16.msk.msra.mxu1 %vm9133_vm14, %v12200_v44  ;;  %2550 = vmatprep.mubr.bf16.mxu1 %v12194_v52  ;;  %vm12687_vm14 = vnez %v12293_v11 }
 0x18d   : > { %6644 = vmatprep.subr.msk.bf16.mxu1 %vm12685_vm6, %v12200_v44  ;;  %6613 = vmatpush1.bf16.msk.msra.mxu0 %vm12686_vm4, %v12200_v44  ;;  %vm12690_vm6 = vcmask 818176  }
 0x18e   : > { %6615 = vmatprep.subr.msk.bf16.mxu0 %vm12688_vm1, %v12200_v44  ;;  %vm12691_vm4 = vmmov %vm12690_vm6  ;;  %vm12692_vm1 = vnez %v12305_v60  ;;  %4644 = vxpose.xlu0.b32.cont [11/16] %v4356_v7, 128  ;;  %v4358_v7 = vld [vmem:[%s9616_s16 + $0x160] sm:$0xff] }
 0x18f   : > { %6566 = vmatmul.mubr.msk.bf16.gmra.mrb[36].mxu0 %vm12690_vm6, %v9728_v37  ;;  %vm12694_vm6 = vnez %v12313_v8  ;;  %4676 = vxpose.xlu1.b32.cont [11/16] %v4372_v40, 128  ;;  %v4374_v40 = vld [vmem:[%s9616_s16 + $0x1e0] sm:$0xff] }
 0x190   : > { %6646 = vmatpush1.bf16.msk.msra.mxu1 %vm12687_vm14, %v12200_v44  ;;  %2447 = vmatprep.mubr.bf16.mxu0 %v12194_v52  ;;  %vm12696_vm14 = vnez %v12322_v55 }
 0x191   : > { %6648 = vmatprep.subr.msk.bf16.mxu1 %vm12689_vm3, %v12200_v44  ;;  %6617 = vmatpush1.bf16.msk.msra.mxu0 %vm12692_vm1, %v12200_v44  ;;  %vm12693_vm3 = vnez %v12309_v16 }
 0x192   : > { %6619 = vmatprep.subr.msk.bf16.mxu0 %vm12694_vm6, %v12200_v44  ;;  %vm12698_vm6 = vcmask 818176   ;;  %4645 = vxpose.xlu0.b32.cont [12/16] %v4357_v62, 128 }
 0x193   : > { %6599 = vmatmul.mubr.msk.bf16.gmra.mrb[36].mxu1 %vm12691_vm4, %v9728_v37  ;;  %vm12695_vm4 = vnez %v12317_v59  ;;  %4677 = vxpose.xlu1.b32.cont [12/16] %v4373_v63, 128  ;;  %v4360_v63 = vld [vmem:[%s9616_s16 + $0x170] sm:$0xff] }
 0x194   : > { %2560 = vmatprep.mubr.bf16.mxu1 %v12194_v52  ;;  %6650 = vmatpush1.bf16.msk.msra.mxu1 %vm12693_vm3, %v12200_v44  ;;  %vm12701_vm3 = vmmov %vm12698_vm6 }
 0x195   : > { %6652 = vmatprep.subr.msk.bf16.mxu1 %vm12695_vm4, %v12200_v44  ;;  %6621 = vmatpush1.bf16.msk.msra.mxu0 %vm12696_vm14, %v12200_v44  ;;  %vm12700_vm4 = vnez %v12699_v2 }
 0x196   : > { %6623 = vmatprep.subr.msk.bf16.mxu0 %vm12475_vm7, %v12200_v44  ;;  %vm12706_vm7 = vnez %v12352_v41  ;;  %4646 = vxpose.xlu0.b32.cont [13/16] %v4358_v7, 128  ;;  %v4376_v7 = vld [vmem:[%s9616_s16 + $0x1f0] sm:$0xff] }
 0x197   : > { %6567 = vmatmul.mubr.msk.bf16.gmra.mrb[40].mxu0 %vm12698_vm6, %v9766_v12  ;;  %vm12703_vm6 = vnez %v12345_v50  ;;  %4678 = vxpose.xlu1.b32.cont [13/16] %v4374_v40, 128  ;;  %v4377_v40 = vld [vmem:[%s9616_s16 + $0x1f8] sm:$0xff] }
 0x198   : > { %6654 = vmatpush1.bf16.msk.msra.mxu1 %vm12474_vm11, %v12200_v44  ;;  %2457 = vmatprep.mubr.bf16.mxu0 %v12194_v52  ;;  %vm12702_vm11 = vnez %v12341_v54 }
 0x199   : > { %6656 = vmatprep.subr.msk.bf16.mxu1 %vm12700_vm4, %v12200_v44  ;;  %6625 = vmatpush1.bf16.msk.msra.mxu0 %vm12702_vm11, %v12200_v44  ;;  %vm12704_vm4 = vnez %v12347_v47  ;;  %vm12707_vm11 = vnez %v12355_v39 }
 0x19a   : > { %6627 = vmatprep.subr.msk.bf16.mxu0 %vm12704_vm4, %v12200_v44  ;;  %vm12709_vm4 = vcmask 818176  }
 0x19b   : > { %6600 = vmatmul.mubr.msk.bf16.gmra.mrb[40].mxu1 %vm12701_vm3, %v9766_v12  ;;  %vm12705_vm3 = vnez %v12349_v43  ;;  %vm12711_vm14 = vmmov %vm12709_vm4 }
 0x19c   : > { %2570 = vmatprep.mubr.bf16.mxu1 %v12194_v52  ;;  %6658 = vmatpush1.bf16.msk.msra.mxu1 %vm12703_vm6, %v12200_v44  ;;  %vm12708_vm6 = vcmask 1041408  }
 0x19d   : > { %6660 = vmatprep.subr.msk.bf16.mxu1 %vm12705_vm3, %v12200_v44  ;;  %6629 = vmatpush1.bf16.msk.msra.mxu0 %vm12706_vm7, %v12200_v44  ;;  %vm12710_vm3 = vmmov %vm12708_vm6 }
 0x19e   : > { %6630 = vmatprep.subr.msk.bf16.mxu0 %vm12708_vm6, %v9340_v48  ;;  %vm12713_vm6 = vnez %v12362_v36  ;;  %v4375_v36 = vld [vmem:[%s9616_s16 + $0x1e8] sm:$0xff] }
 0x19f   : > { %6568 = vmatmul.mubr.msk.bf16.gmra.mrb[44].mxu0 %vm12709_vm4, %v9803_v13  ;;  %vm12712_vm4 = vnez %v12358_v38  ;;  %v4359_v38 = vld [vmem:[%s9616_s16 + $0x168] sm:$0xff]  ;;  %4679 = vxpose.xlu1.b32.cont [14/16] %v4375_v36, 128 }
 0x1a0   : > { %6662 = vmatpush1.bf16.msk.msra.mxu1 %vm12707_vm11, %v12200_v44  ;;  %2467 = vmatprep.mubr.bf16.mxu0 %v12194_v52  ;;  %vm12745_vm11 = vcmask 818176  }
 0x1a1   : > { %6663 = vmatprep.subr.msk.bf16.mxu1 %vm12710_vm3, %v9345_v61  ;;  %2634 = vmatpush1.bf16.msra.mxu0 %v9356_v3  ;;  %vm12714_vm3 = vmmov %vm12711_vm14 }
 0x1a2   : > { %6673 = vmatprep.subr.msk.bf16.mxu0 %vm12712_vm4, %v12200_v44  ;;  %4647 = vxpose.xlu0.b32.cont [14/16] %v4359_v38, 128  ;;  %v4361_v38 = vld [vmem:[%s9616_s16 + $0x178] sm:$0xff]  ;;  %vm12735_vm4 = vnez %v12370_v30 }
 0x1a3   : > { %6601 = vmatmul.mubr.msk.bf16.gmra.mrb[44].mxu1 %vm12711_vm14, %v9803_v13  ;;  %4680 = vxpose.xlu1.b32.cont [15/16] %v4376_v7, 128  ;;  %v4379_v7 = vld [vmem:[%s9616_s16 + $0x208] sm:$0xff] }
 0x1a4   : > { %2580 = vmatprep.mubr.bf16.mxu1 %v12194_v52  ;;  %2747 = vmatpush1.bf16.msra.mxu1 %v9363_v35 }
 0x1a5   : > { %6706 = vmatprep.subr.msk.bf16.mxu1 %vm12713_vm6, %v12200_v44  ;;  %vm12734_vm6 = vnez %v12366_v33 }
 0x1a6   : > { %v10016_v62 = vpop.trf.xlu0  ;;  %4648 = vxpose.xlu0.b32.cont [15/16] %v4360_v63, 128  ;;  %v4378_v63 = vld [vmem:[%s9616_s16 + $0x200] sm:$0xff] }
 0x1a7   : > { %6569 = vmatmul.mubr.msk.bf16.gmra.mrb[48].mxu0 %vm12711_vm14, %v9834_v34  ;;  %12715 = vst [vmem:[#allocation69_spill] sm:$0xff] %v10016_v62  ;;  %v10019_v35 = vpop.trf.xlu1  ;;  %vm12717_vm14 = vmmov %vm12714_vm3  ;;  %4681 = vxpose.xlu1.b32.end [16/16] %v4377_v40, 128  ;;  %v4394_v62 = vld [vmem:[%s9616_s16 + $0x280] sm:$0xff]  ;;  %v4395_v40 = vld [vmem:[%s9616_s16 + $0x288] sm:$0xff] }
 0x1a8   : > { %2477 = vmatprep.mubr.bf16.mxu0 %v12194_v52  ;;  %12716 = vst [vmem:[#allocation70_spill] sm:$0xff] %v10019_v35 }
 0x1aa   : > { %v10024_v3 = vpop.trf.xlu0  ;;  %4649 = vxpose.xlu0.b32.end [16/16] %v4361_v38, 128 }
 0x1ab   : > { %6602 = vmatmul.mubr.msk.bf16.gmra.mrb[48].mxu1 %vm12714_vm3, %v9834_v34  ;;  %12718 = vst [vmem:[#allocation82_spill] sm:$0xff] %v10024_v3  ;;  %v10031_v36 = vpop.trf.xlu1  ;;  %4730 = vxpose.xlu1.b32.start [1/16] %v4394_v62, 128  ;;  %v4381_v62 = vld [vmem:[%s9616_s16 + $0x218] sm:$0xff] }
 0x1ac   : > { %2590 = vmatprep.mubr.bf16.mxu1 %v12194_v52  ;;  %12719 = vst [vmem:[#allocation83_spill] sm:$0xff] %v10031_v36 }
 0x1ae   : > { %v10034_v35 = vpop.trf.xlu0  ;;  %4698 = vxpose.xlu0.b32.start [1/16] %v4378_v63, 128  ;;  %v4380_v63 = vld [vmem:[%s9616_s16 + $0x210] sm:$0xff] }
 0x1af   : > { %6570 = vmatmul.mubr.msk.bf16.gmra.mrb[52].mxu0 %vm12717_vm14, %v9852_v10  ;;  %12720 = vst [vmem:[#allocation84_spill] sm:$0xff] %v10034_v35  ;;  %v10037_v3 = vpop.trf.xlu1  ;;  %vm12722_vm14 = vmmov %vm12714_vm3  ;;  %4731 = vxpose.xlu1.b32.cont [2/16] %v4395_v40, 128  ;;  %v4396_v35 = vld [vmem:[%s9616_s16 + $0x290] sm:$0xff]  ;;  %v4397_v40 = vld [vmem:[%s9616_s16 + $0x298] sm:$0xff] }
 0x1b0   : > { %2487 = vmatprep.mubr.bf16.mxu0 %v12194_v52  ;;  %12721 = vst [vmem:[#allocation85_spill] sm:$0xff] %v10037_v3 }
 0x1b2   : > { %v10042_v61 = vpop.trf.xlu0  ;;  %4699 = vxpose.xlu0.b32.cont [2/16] %v4379_v7, 128 }
 0x1b3   : > { %6603 = vmatmul.mubr.msk.bf16.gmra.mrb[52].mxu1 %vm12714_vm3, %v9852_v10  ;;  %12723 = vst [vmem:[#allocation86_spill] sm:$0xff] %v10042_v61  ;;  %v10049_v38 = vpop.trf.xlu1  ;;  %4732 = vxpose.xlu1.b32.cont [3/16] %v4396_v35, 128  ;;  %v4398_v35 = vld [vmem:[%s9616_s16 + $0x2a0] sm:$0xff] }
 0x1b4   : > { %2600 = vmatprep.mubr.bf16.mxu1 %v12194_v52  ;;  %12724 = vst [vmem:[#allocation87_spill] sm:$0xff] %v10049_v38  ;;  %v12773_v38 = vld [vmem:[#allocation7_spill] sm:$0xff] }
 0x1b6   : > { %v10052_v3 = vpop.trf.xlu0  ;;  %4700 = vxpose.xlu0.b32.cont [3/16] %v4380_v63, 128  ;;  %v4382_v63 = vld [vmem:[%s9616_s16 + $0x220] sm:$0xff] }
 0x1b7   : > { %6571 = vmatmul.mubr.msk.bf16.gmra.mrb[56].mxu0 %vm12722_vm14, %v9867_v32  ;;  %12725 = vst [vmem:[#allocation88_spill] sm:$0xff] %v10052_v3  ;;  %v10055_v61 = vpop.trf.xlu1  ;;  %vm12727_vm14 = vmmov %vm12714_vm3  ;;  %4733 = vxpose.xlu1.b32.cont [4/16] %v4397_v40, 128 }
 0x1b8   : > { %2497 = vmatprep.mubr.bf16.mxu0 %v12194_v52  ;;  %12726 = vst [vmem:[#allocation89_spill] sm:$0xff] %v10055_v61 }
 0x1ba   : > { %v10060_v36 = vpop.trf.xlu0  ;;  %4701 = vxpose.xlu0.b32.cont [4/16] %v4381_v62, 128  ;;  %v4383_v62 = vld [vmem:[%s9616_s16 + $0x228] sm:$0xff] }
 0x1bb   : > { %6604 = vmatmul.mubr.msk.bf16.gmra.mrb[56].mxu1 %vm12714_vm3, %v9867_v32  ;;  %12728 = vst [vmem:[#allocation90_spill] sm:$0xff] %v10060_v36  ;;  %v10067_v7 = vpop.trf.xlu1  ;;  %4734 = vxpose.xlu1.b32.cont [5/16] %v4398_v35, 128 }
 0x1bc   : > { %2610 = vmatprep.mubr.bf16.mxu1 %v12194_v52  ;;  %12729 = vst [vmem:[#allocation91_spill] sm:$0xff] %v10067_v7  ;;  %v12772_v7 = vld [vmem:[#allocation81_spill] sm:$0xff] }
 0x1be   : > { %v10070_v61 = vpop.trf.xlu0  ;;  %4702 = vxpose.xlu0.b32.cont [5/16] %v4382_v63, 128 }
 0x1bf   : > { %6572 = vmatmul.mubr.msk.bf16.gmra.mrb[60].mxu0 %vm12727_vm14, %v9882_v5  ;;  %12730 = vst [vmem:[#allocation92_spill] sm:$0xff] %v10070_v61  ;;  %v10073_v36 = vpop.trf.xlu1  ;;  %vm12732_vm14 = vmmov %vm12714_vm3 }
 0x1c0   : > { %2653 = vmatprep.mubr.bf16.mxu0 %v12194_v52  ;;  %12731 = vst [vmem:[#allocation93_spill] sm:$0xff] %v10073_v36 }
 0x1c2   : > { %v10077_v3 = vpop.trf.xlu0  ;;  %4703 = vxpose.xlu0.b32.cont [6/16] %v4383_v62, 128  ;;  %v4384_v62 = vld [vmem:[%s9616_s16 + $0x230] sm:$0xff] }
 0x1c3   : > { %6605 = vmatmul.mubr.msk.bf16.gmra.mrb[60].mxu1 %vm12714_vm3, %v9882_v5  ;;  %12733 = vst [vmem:[#allocation94_spill] sm:$0xff] %v10077_v3  ;;  %v10090_v40 = vpop.trf.xlu1 }
 0x1c4   : > { %2766 = vmatprep.mubr.bf16.mxu1 %v12194_v52  ;;  %12736 = vst [vmem:[#allocation95_spill] sm:$0xff] %v10090_v40  ;;  %v4399_v40 = vld [vmem:[%s9616_s16 + $0x2a8] sm:$0xff] }
 0x1c5   : > { %4735 = vxpose.xlu1.b32.cont [6/16] %v4399_v40, 128 }
 0x1c6   : > { %v10099_v63 = vpop.trf.xlu0  ;;  %4704 = vxpose.xlu0.b32.cont [7/16] %v4384_v62, 128  ;;  %v12758_v62 = vld [vmem:[#allocation75_spill] sm:$0xff] }
 0x1c7   : > { %6631 = vmatmul.mubr.msk.bf16.vlgmr.msra.gmra.mrb[64].mxu0 %vm12732_vm14, %v9705_v53  ;;  %vm12737_vm14 = vnez %v12374_v28  ;;  %12739 = vst [vmem:[#allocation96_spill] sm:$0xff] %v10099_v63  ;;  %v10111_v3 = vpop.trf.xlu1 }
 0x1c8   : > { %6675 = vmatpush1.bf16.msk.msra.mxu0 %vm12734_vm6, %v12200_v44  ;;  %2663 = vmatprep.mubr.bf16.mxu0 %v12194_v52  ;;  %vm12741_vm6 = vnez %v12388_v23  ;;  %12743 = vst [vmem:[#allocation97_spill] sm:$0xff] %v10111_v3  ;;  %v4400_v3 = vld [vmem:[%s9616_s16 + $0x2b0] sm:$0xff] }
 0x1c9   : > { %6677 = vmatprep.subr.msk.bf16.mxu0 %vm12737_vm14, %v12200_v44  ;;  %vm12742_vm14 = vnez %v12392_v22  ;;  %4736 = vxpose.xlu1.b32.cont [7/16] %v4400_v3, 128  ;;  %v4385_v3 = vld [vmem:[%s9616_s16 + $0x238] sm:$0xff]  ;;  %v4484_v23 = vld [vmem:[%s9616_s16 + $0x550] sm:$0xff] }
 0x1ca   : > { %v10118_v35 = vpop.trf.xlu0  ;;  %4705 = vxpose.xlu0.b32.cont [8/16] %v4385_v3, 128  ;;  %v4386_v3 = vld [vmem:[%s9616_s16 + $0x240] sm:$0xff] }
 0x1cb   : > { %6664 = vmatmul.mubr.msk.bf16.vlgmr.msra.gmra.mrb[64].mxu1 %vm12714_vm3, %v9705_v53  ;;  %vm12738_vm3 = vnez %v12378_v27  ;;  %12746 = vst [vmem:[#allocation98_spill] sm:$0xff] %v10118_v35  ;;  %v10129_v63 = vpop.trf.xlu1  ;;  %v4488_v35 = vld [vmem:[%s9616_s16 + $0x570] sm:$0xff] }
 0x1cc   : > { %6708 = vmatpush1.bf16.msk.msra.mxu1 %vm12735_vm4, %v12200_v44  ;;  %2776 = vmatprep.mubr.bf16.mxu1 %v12194_v52  ;;  %vm12740_vm4 = vnez %v12383_v26  ;;  %12749 = vst [vmem:[#allocation99_spill] sm:$0xff] %v10129_v63 }
 0x1cd   : > { %6710 = vmatprep.subr.msk.bf16.mxu1 %vm12738_vm3, %v12200_v44  ;;  %6679 = vmatpush1.bf16.msk.msra.mxu0 %vm12740_vm4, %v12200_v44  ;;  %vm12744_vm3 = vnez %v12396_v9  ;;  %vm12747_vm4 = vmmov %vm12745_vm11 }
 0x1ce   : > { %6681 = vmatprep.subr.msk.bf16.mxu0 %vm12742_vm14, %v12200_v44  ;;  %vm12748_vm14 = vnez %v12400_v21  ;;  %v10140_v40 = vpop.trf.xlu0  ;;  %4706 = vxpose.xlu0.b32.cont [9/16] %v4386_v3, 128  ;;  %v4389_v3 = vld [vmem:[%s9616_s16 + $0x258] sm:$0xff] }
 0x1cf   : > { %6632 = vmatmul.mubr.msk.bf16.gmra.mrb[68].mxu0 %vm12745_vm11, %v9728_v37  ;;  %vm12750_vm11 = vnez %v12404_v1  ;;  %12753 = vst [vmem:[#allocation100_spill] sm:$0xff] %v10140_v40  ;;  %v10145_v63 = vpop.trf.xlu1 }
 0x1d0   : > { %6712 = vmatpush1.bf16.msk.msra.mxu1 %vm12741_vm6, %v12200_v44  ;;  %2673 = vmatprep.mubr.bf16.mxu0 %v12194_v52  ;;  %12755 = vst [vmem:[#allocation101_spill] sm:$0xff] %v10145_v63  ;;  %v4401_v63 = vld [vmem:[%s9616_s16 + $0x2b8] sm:$0xff] }
 0x1d1   : > { %6714 = vmatprep.subr.msk.bf16.mxu1 %vm12744_vm3, %v12200_v44  ;;  %6683 = vmatpush1.bf16.msk.msra.mxu0 %vm12748_vm14, %v12200_v44  ;;  %vm12752_vm3 = vnez %v12416_v19  ;;  %vm12754_vm14 = vnez %v12517_v57  ;;  %v4487_v57 = vld [vmem:[%s9616_s16 + $0x568] sm:$0xff] }
 0x1d2   : > { %v10167_v40 = vpop.trf.xlu0  ;;  %4737 = vxpose.xlu1.b32.cont [8/16] %v4401_v63, 128 }
 0x1d3   : > { %6665 = vmatmul.mubr.msk.bf16.gmra.mrb[68].mxu1 %vm12747_vm4, %v9728_v37  ;;  %vm12751_vm4 = vnez %v12410_v20  ;;  %12760 = vst [vmem:[#allocation74_spill] sm:$0xff] %v10167_v40  ;;  %v10178_v36 = vpop.trf.xlu1  ;;  %v4402_v40 = vld [vmem:[%s9616_s16 + $0x2c0] sm:$0xff] }
 0x1d4   : > { %2786 = vmatprep.mubr.bf16.mxu1 %v12194_v52  ;;  %6716 = vmatpush1.bf16.msk.msra.mxu1 %vm12750_vm11, %v12200_v44  ;;  %12763 = vst [vmem:[#allocation75_spill] sm:$0xff] %v10178_v36  ;;  %v12770_v36 = vld [vmem:[#allocation80_spill] sm:$0xff] }
 0x1d5   : > { %6685 = vmatprep.subr.msk.bf16.mxu0 %vm12751_vm4, %v12200_v44  ;;  %6718 = vmatprep.subr.msk.bf16.mxu1 %vm12752_vm3, %v12200_v44  ;;  %vm12757_vm3 = vcmask 818176  }
 0x1d6   : > { %6687 = vmatpush1.bf16.msk.msra.mxu0 %vm12754_vm14, %v12200_v44  ;;  %vm12759_vm4 = vmmov %vm12757_vm3  ;;  %v10192_v63 = vpop.trf.xlu0  ;;  %4738 = vxpose.xlu1.b32.cont [9/16] %v4402_v40, 128  ;;  %v4404_v40 = vld [vmem:[%s9616_s16 + $0x2d0] sm:$0xff] }
 0x1d7   : > { %6689 = vmatprep.subr.msk.bf16.mxu0 %vm12521_vm5, %v12200_v44  ;;  %6633 = vmatmul.mubr.msk.bf16.gmra.mrb[72].mxu0 %vm12757_vm3, %v9766_v12  ;;  %vm12761_vm3 = vnez %v12449_v24  ;;  %12768 = vst [vmem:[#allocation102_spill] sm:$0xff] %v10192_v63  ;;  %v10201_v61 = vpop.trf.xlu1  ;;  %v12775_v63 = vld [vmem:[#allocation8_spill] sm:$0xff] }
 0x1d8   : > { %6720 = vmatpush1.bf16.msk.msra.mxu1 %vm12519_vm0, %v12200_v44  ;;  %2683 = vmatprep.mubr.bf16.mxu0 %v12194_v52  ;;  %12771 = vst [vmem:[#allocation103_spill] sm:$0xff] %v10201_v61 }
 0x1d9   : > { %6722 = vmatprep.subr.msk.bf16.mxu1 %vm12524_vm15, %v12200_v44 }
 0x1da   : > { %6691 = vmatpush1.bf16.msk.msra.mxu0 %vm12526_vm2, %v12200_v44  ;;  %vm12764_vm2 = vnez %v12459_v31 }
 0x1db   : > { %6666 = vmatmul.mubr.msk.bf16.gmra.mrb[72].mxu1 %vm12759_vm4, %v9766_v12  ;;  %6693 = vmatprep.subr.msk.bf16.mxu0 %vm12761_vm3, %v12200_v44  ;;  %vm12762_vm4 = vnez %v12530_v42  ;;  %vm12766_vm3 = vcmask 818176   ;;  %v10216_v61 = vpop.trf.xlu1 }
 0x1dc   : > { %2796 = vmatprep.mubr.bf16.mxu1 %v12194_v52  ;;  %6724 = vmatpush1.bf16.msk.msra.mxu1 %vm12527_vm9, %v12200_v44  ;;  %vm12765_vm9 = vcmask 1041408   ;;  %vm12769_vm15 = vmmov %vm12766_vm3  ;;  %12778 = vst [vmem:[#allocation8_spill] sm:$0xff] %v10216_v61  ;;  %v4405_v61 = vld [vmem:[%s9616_s16 + $0x2d8] sm:$0xff] }
 0x1dd   : > { %6726 = vmatprep.subr.msk.bf16.mxu1 %vm12762_vm4, %v12200_v44  ;;  %vm12767_vm4 = vmmov %vm12765_vm9 }
 0x1de   : > { %6695 = vmatpush1.bf16.msk.msra.mxu0 %vm12764_vm2, %v12200_v44 }
 0x1df   : > { %6696 = vmatprep.subr.msk.bf16.mxu0 %vm12765_vm9, %v9488_v56  ;;  %6634 = vmatmul.mubr.msk.bf16.gmra.mrb[76].mxu0 %vm12766_vm3, %v9803_v13  ;;  %vm12774_vm9 = vnez %v12773_v38  ;;  %v4403_v56 = vld [vmem:[%s9616_s16 + $0x2c8] sm:$0xff]  ;;  %v4388_v38 = vld [vmem:[%s9616_s16 + $0x250] sm:$0xff] }
 0x1e0   : > { %6728 = vmatpush1.bf16.msk.msra.mxu1 %vm9256_vm13, %v12200_v44  ;;  %2693 = vmatprep.mubr.bf16.mxu0 %v12194_v52  ;;  %vm12817_vm13 = vcmask 818176  }
 0x1e1   : > { %6729 = vmatprep.subr.msk.bf16.mxu1 %vm12767_vm4, %v9493_v51  ;;  %v4387_v51 = vld [vmem:[%s9616_s16 + $0x248] sm:$0xff]  ;;  %vm12779_vm4 = vmmov %vm12766_vm3  ;;  %4739 = vxpose.xlu1.b32.cont [10/16] %v4403_v56, 128  ;;  %v4390_v56 = vld [vmem:[%s9616_s16 + $0x260] sm:$0xff] }
 0x1e2   : > { %2860 = vmatpush1.bf16.msra.mxu0 %v12770_v36  ;;  %v10211_v36 = vpop.trf.xlu0  ;;  %4707 = vxpose.xlu0.b32.cont [10/16] %v4387_v51, 128  ;;  %v10227_v51 = vpop.trf.xlu1 }
 0x1e3   : > { %6667 = vmatmul.mubr.msk.bf16.gmra.mrb[76].mxu1 %vm12769_vm15, %v9803_v13  ;;  %6763 = vmatprep.subr.msk.bf16.mxu0 %vm12774_vm9, %v12200_v44  ;;  %vm12776_vm15 = vnez %v12775_v63  ;;  %12777 = vst [vmem:[#allocation7_spill] sm:$0xff] %v10211_v36  ;;  %12781 = vst [vmem:[#allocation105_spill] sm:$0xff] %v10227_v51 }
 0x1e4   : > { %2806 = vmatprep.mubr.bf16.mxu1 %v12194_v52  ;;  %2973 = vmatpush1.bf16.msra.mxu1 %v12772_v7  ;;  %vm12782_vm9 = vmmov %vm12766_vm3 }
 0x1e5   : > { %6796 = vmatprep.subr.msk.bf16.mxu1 %vm12776_vm15, %v12200_v44  ;;  %4740 = vxpose.xlu1.b32.cont [11/16] %v4404_v40, 128  ;;  %vm12783_vm15 = vmmov %vm12766_vm3  ;;  %v4406_v40 = vld [vmem:[%s9616_s16 + $0x2e0] sm:$0xff] }
 0x1e6   : > { %4708 = vxpose.xlu0.b32.cont [11/16] %v4388_v38, 128  ;;  %v10224_v63 = vpop.trf.xlu0  ;;  %v10240_v51 = vpop.trf.xlu1 }
 0x1e7   : > { %6635 = vmatmul.mubr.msk.bf16.gmra.mrb[80].mxu0 %vm12766_vm3, %v9834_v34  ;;  %12780 = vst [vmem:[#allocation104_spill] sm:$0xff] %v10224_v63  ;;  %12785 = vst [vmem:[#allocation107_spill] sm:$0xff] %v10240_v51  ;;  %v4391_v63 = vld [vmem:[%s9616_s16 + $0x268] sm:$0xff] }
 0x1e8   : > { %2703 = vmatprep.mubr.bf16.mxu0 %v12194_v52 }
 0x1e9   : > { %4741 = vxpose.xlu1.b32.cont [12/16] %v4405_v61, 128  ;;  %v4392_v61 = vld [vmem:[%s9616_s16 + $0x270] sm:$0xff] }
 0x1ea   : > { %4709 = vxpose.xlu0.b32.cont [12/16] %v4389_v3, 128  ;;  %v10237_v38 = vpop.trf.xlu0  ;;  %v4407_v3 = vld [vmem:[%s9616_s16 + $0x2e8] sm:$0xff] }
 0x1eb   : > { %6668 = vmatmul.mubr.msk.bf16.gmra.mrb[80].mxu1 %vm12779_vm4, %v9834_v34  ;;  %12784 = vst [vmem:[#allocation106_spill] sm:$0xff] %v10237_v38  ;;  %vm12787_vm4 = vmmov %vm12766_vm3 }
 0x1ec   : > { %2816 = vmatprep.mubr.bf16.mxu1 %v12194_v52 }
 0x1ed   : > { %4742 = vxpose.xlu1.b32.cont [13/16] %v4406_v40, 128  ;;  %v4408_v40 = vld [vmem:[%s9616_s16 + $0x2f0] sm:$0xff] }
 0x1ee   : > { %4710 = vxpose.xlu0.b32.cont [13/16] %v4390_v56, 128  ;;  %v10246_v36 = vpop.trf.xlu0  ;;  %v10253_v56 = vpop.trf.xlu1 }
 0x1ef   : > { %6636 = vmatmul.mubr.msk.bf16.gmra.mrb[84].mxu0 %vm12782_vm9, %v9852_v10  ;;  %12786 = vst [vmem:[#allocation108_spill] sm:$0xff] %v10246_v36  ;;  %12788 = vst [vmem:[#allocation109_spill] sm:$0xff] %v10253_v56  ;;  %v4409_v36 = vld [vmem:[%s9616_s16 + $0x2f8] sm:$0xff] }
 0x1f0   : > { %2713 = vmatprep.mubr.bf16.mxu0 %v12194_v52  ;;  %vm12790_vm9 = vmmov %vm12766_vm3 }
 0x1f1   : > { %4743 = vxpose.xlu1.b32.cont [14/16] %v4407_v3, 128  ;;  %v4410_v3 = vld [vmem:[%s9616_s16 + $0x300] sm:$0xff] }
 0x1f2   : > { %4711 = vxpose.xlu0.b32.cont [14/16] %v4391_v63, 128  ;;  %v10256_v51 = vpop.trf.xlu0  ;;  %v4393_v63 = vld [vmem:[%s9616_s16 + $0x278] sm:$0xff]  ;;  %v10259_v38 = vpop.trf.xlu1 }
 0x1f3   : > { %6669 = vmatmul.mubr.msk.bf16.gmra.mrb[84].mxu1 %vm12783_vm15, %v9852_v10  ;;  %12789 = vst [vmem:[#allocation110_spill] sm:$0xff] %v10259_v38  ;;  %vm12792_vm15 = vmmov %vm12766_vm3 }
 0x1f4   : > { %2826 = vmatprep.mubr.bf16.mxu1 %v12194_v52 }
 0x1f5   : > { %4744 = vxpose.xlu1.b32.cont [15/16] %v4408_v40, 128  ;;  %v4426_v40 = vld [vmem:[%s9616_s16 + $0x380] sm:$0xff] }
 0x1f6   : > { %4712 = vxpose.xlu0.b32.cont [15/16] %v4392_v61, 128  ;;  %v10264_v7 = vpop.trf.xlu0  ;;  %v10271_v61 = vpop.trf.xlu1 }
 0x1f7   : > { %6637 = vmatmul.mubr.msk.bf16.gmra.mrb[88].mxu0 %vm12766_vm3, %v9867_v32  ;;  %12791 = vst [vmem:[#allocation111_spill] sm:$0xff] %v10264_v7  ;;  %12793 = vst [vmem:[#allocation112_spill] sm:$0xff] %v10271_v61 }
 0x1f8   : > { %2723 = vmatprep.mubr.bf16.mxu0 %v12194_v52 }
 0x1f9   : > { %4745 = vxpose.xlu1.b32.end [16/16] %v4409_v36, 128  ;;  %v12798_v36 = vld [vmem:[#allocation9_spill] sm:$0xff] }
 0x1fa   : > { %4713 = vxpose.xlu0.b32.end [16/16] %v4393_v63, 128  ;;  %v10274_v38 = vpop.trf.xlu0  ;;  %v4411_v63 = vld [vmem:[%s9616_s16 + $0x308] sm:$0xff]  ;;  %v10277_v7 = vpop.trf.xlu1 }
 0x1fb   : > { %6670 = vmatmul.mubr.msk.bf16.gmra.mrb[88].mxu1 %vm12787_vm4, %v9867_v32  ;;  %12794 = vst [vmem:[#allocation113_spill] sm:$0xff] %v10274_v38  ;;  %12795 = vst [vmem:[#allocation114_spill] sm:$0xff] %v10277_v7  ;;  %v12800_v38 = vld [vmem:[#allocation10_spill] sm:$0xff] }
 0x1fc   : > { %2836 = vmatprep.mubr.bf16.mxu1 %v12194_v52  ;;  %vm12797_vm4 = vmmov %vm12766_vm3 }
 0x1fd   : > { %4794 = vxpose.xlu1.b32.start [1/16] %v4426_v40, 128  ;;  %v4412_v40 = vld [vmem:[%s9616_s16 + $0x310] sm:$0xff] }
 0x1fe   : > { %4762 = vxpose.xlu0.b32.start [1/16] %v4410_v3, 128  ;;  %v10281_v56 = vpop.trf.xlu0  ;;  %v4427_v3 = vld [vmem:[%s9616_s16 + $0x388] sm:$0xff]  ;;  %v10294_v7 = vpop.trf.xlu1 }
 0x1ff   : > { %6638 = vmatmul.mubr.msk.bf16.gmra.mrb[92].mxu0 %vm12790_vm9, %v9882_v5  ;;  %12796 = vst [vmem:[#allocation115_spill] sm:$0xff] %v10281_v56  ;;  %vm12799_vm9 = vnez %v12798_v36  ;;  %12802 = vst [vmem:[#allocation9_spill] sm:$0xff] %v10294_v7  ;;  %v4428_v7 = vld [vmem:[%s9616_s16 + $0x390] sm:$0xff]  ;;  %v12810_v56 = vld [vmem:[#allocation14_spill] sm:$0xff] }
 0x200   : > { %2879 = vmatprep.mubr.bf16.mxu0 %v12194_v52 }
 0x201   : > { %4795 = vxpose.xlu1.b32.cont [2/16] %v4427_v3, 128  ;;  %v12815_v3 = vld [vmem:[#allocation16_spill] sm:$0xff] }
 0x202   : > { %4763 = vxpose.xlu0.b32.cont [2/16] %v4411_v63, 128  ;;  %v12803_v63 = vld [vmem:[#allocation11_spill] sm:$0xff]  ;;  %v10303_v36 = vpop.trf.xlu0 }
 0x203   : > { %6671 = vmatmul.mubr.msk.bf16.gmra.mrb[92].mxu1 %vm12792_vm15, %v9882_v5  ;;  %vm12801_vm15 = vnez %v12800_v38  ;;  %12807 = vst [vmem:[#allocation10_spill] sm:$0xff] %v10303_v36  ;;  %v12808_v38 = vld [vmem:[#allocation13_spill] sm:$0xff]  ;;  %v4467_v36 = vld [vmem:[%s9616_s16 + $0x4c8] sm:$0xff] }
 0x204   : > { %2992 = vmatprep.mubr.bf16.mxu1 %v12194_v52 }
 0x205   : > { %4796 = vxpose.xlu1.b32.cont [3/16] %v4428_v7, 128  ;;  %v12825_v7 = vld [vmem:[#allocation19_spill] sm:$0xff] }
 0x206   : > { %4764 = vxpose.xlu0.b32.cont [3/16] %v4412_v40, 128  ;;  %v10322_v40 = vpop.trf.xlu0 }
 0x207   : > { %6697 = vmatmul.mubr.msk.bf16.vlgmr.msra.gmra.mrb[96].mxu0 %vm12766_vm3, %v9705_v53  ;;  %vm12804_vm3 = vnez %v12803_v63  ;;  %v12812_v63 = vld [vmem:[#allocation15_spill] sm:$0xff] }
 0x208   : > { %6765 = vmatpush1.bf16.msk.msra.mxu0 %vm12799_vm9, %v12200_v44  ;;  %2889 = vmatprep.mubr.bf16.mxu0 %v12194_v52  ;;  %vm12809_vm9 = vnez %v12808_v38  ;;  %v12820_v38 = vld [vmem:[#allocation17_spill] sm:$0xff] }
 0x209   : > { %6767 = vmatprep.subr.msk.bf16.mxu0 %vm12804_vm3, %v12200_v44  ;;  %vm12813_vm3 = vnez %v12812_v63  ;;  %v4429_v63 = vld [vmem:[%s9616_s16 + $0x398] sm:$0xff] }
 0x20a   : > { %4797 = vxpose.xlu1.b32.cont [4/16] %v4429_v63, 128 }
 0x20b   : > { %6730 = vmatmul.mubr.msk.bf16.vlgmr.msra.gmra.mrb[96].mxu1 %vm12797_vm4, %v9705_v53  ;;  %v12805_v53 = vld [vmem:[#allocation12_spill] sm:$0xff] }
 0x20c   : > { %6798 = vmatpush1.bf16.msk.msra.mxu1 %vm12801_vm15, %v12200_v44  ;;  %3002 = vmatprep.mubr.bf16.mxu1 %v12194_v52  ;;  %vm12806_vm4 = vnez %v12805_v53  ;;  %vm12811_vm15 = vnez %v12810_v56  ;;  %v10315_v53 = vpop.trf.xlu1  ;;  %12818 = vst [vmem:[#allocation12_spill] sm:$0xff] %v10322_v40  ;;  %v4413_v56 = vld [vmem:[%s9616_s16 + $0x318] sm:$0xff]  ;;  %v12833_v40 = vld [vmem:[#allocation23_spill] sm:$0xff] }
 0x20d   : > { %6800 = vmatprep.subr.msk.bf16.mxu1 %vm12806_vm4, %v12200_v44  ;;  %6769 = vmatpush1.bf16.msk.msra.mxu0 %vm12809_vm9, %v12200_v44  ;;  %12814 = vst [vmem:[#allocation11_spill] sm:$0xff] %v10315_v53  ;;  %vm12816_vm4 = vnez %v12815_v3  ;;  %vm12819_vm9 = vmmov %vm12817_vm13  ;;  %v12823_v53 = vld [vmem:[#allocation18_spill] sm:$0xff] }
 0x20e   : > { %6771 = vmatprep.subr.msk.bf16.mxu0 %vm12813_vm3, %v12200_v44  ;;  %vm12826_vm3 = vnez %v12825_v7  ;;  %4765 = vxpose.xlu0.b32.cont [4/16] %v4413_v56, 128  ;;  %v12835_v7 = vld [vmem:[#allocation25_spill] sm:$0xff]  ;;  %v12838_v56 = vld [vmem:[#allocation27_spill] sm:$0xff] }
 0x20f   : > { %6698 = vmatmul.mubr.msk.bf16.gmra.mrb[100].mxu0 %vm12817_vm13, %v9728_v37  ;;  %vm12824_vm13 = vnez %v12823_v53 }
 0x210   : > { %6802 = vmatpush1.bf16.msk.msra.mxu1 %vm12811_vm15, %v12200_v44  ;;  %2899 = vmatprep.mubr.bf16.mxu0 %v12194_v52  ;;  %vm12821_vm15 = vnez %v12820_v38  ;;  %v10333_v3 = vpop.trf.xlu1  ;;  %v10344_v38 = vpop.trf.xlu0 }
 0x211   : > { %6804 = vmatprep.subr.msk.bf16.mxu1 %vm12816_vm4, %v12200_v44  ;;  %6773 = vmatpush1.bf16.msk.msra.mxu0 %vm12821_vm15, %v12200_v44  ;;  %12822 = vst [vmem:[#allocation13_spill] sm:$0xff] %v10333_v3  ;;  %12829 = vst [vmem:[#allocation14_spill] sm:$0xff] %v10344_v38  ;;  %v12830_v3 = vld [vmem:[#allocation21_spill] sm:$0xff]  ;;  %vm12834_vm15 = vnez %v12833_v40  ;;  %v4414_v40 = vld [vmem:[%s9616_s16 + $0x320] sm:$0xff] }
 0x212   : > { %6775 = vmatprep.subr.msk.bf16.mxu0 %vm12826_vm3, %v12200_v44  ;;  %vm12837_vm3 = vcmask 818176   ;;  %4766 = vxpose.xlu0.b32.cont [5/16] %v4414_v40, 128  ;;  %v12860_v40 = vld [vmem:[#allocation34_spill] sm:$0xff]  ;;  %v4465_v38 = vld [vmem:[%s9616_s16 + $0x4b8] sm:$0xff] }
 0x213   : > { %6731 = vmatmul.mubr.msk.bf16.gmra.mrb[100].mxu1 %vm12819_vm9, %v9728_v37  ;;  %v12827_v37 = vld [vmem:[#allocation20_spill] sm:$0xff]  ;;  %vm12831_vm9 = vnez %v12830_v3  ;;  %v12842_v3 = vld [vmem:[#allocation29_spill] sm:$0xff] }
 0x214   : > { %3012 = vmatprep.mubr.bf16.mxu1 %v12194_v52  ;;  %6806 = vmatpush1.bf16.msk.msra.mxu1 %vm12824_vm13, %v12200_v44  ;;  %vm12828_vm4 = vnez %v12827_v37  ;;  %v10349_v53 = vpop.trf.xlu1  ;;  %vm12836_vm13 = vnez %v12835_v7  ;;  %v10362_v63 = vpop.trf.xlu0  ;;  %v4430_v37 = vld [vmem:[%s9616_s16 + $0x3a0] sm:$0xff] }
 0x215   : > { %6808 = vmatprep.subr.msk.bf16.mxu1 %vm12828_vm4, %v12200_v44  ;;  %6777 = vmatpush1.bf16.msk.msra.mxu0 %vm12831_vm9, %v12200_v44  ;;  %12832 = vst [vmem:[#allocation15_spill] sm:$0xff] %v10349_v53  ;;  %vm12839_vm4 = vnez %v12838_v56  ;;  %12840 = vst [vmem:[#allocation16_spill] sm:$0xff] %v10362_v63  ;;  %v12845_v56 = vld [vmem:[#allocation30_spill] sm:$0xff]  ;;  %v12847_v63 = vld [vmem:[#allocation31_spill] sm:$0xff] }
 0x216   : > { %6779 = vmatprep.subr.msk.bf16.mxu0 %vm12836_vm13, %v12200_v44  ;;  %vm12841_vm9 = vmmov %vm12837_vm3  ;;  %vm12846_vm13 = vnez %v12845_v56  ;;  %4798 = vxpose.xlu1.b32.cont [5/16] %v4430_v37, 128  ;;  %v12855_v53 = vld [vmem:[#allocation36_spill] sm:$0xff] }
 0x217   : > { %6699 = vmatmul.mubr.msk.bf16.gmra.mrb[104].mxu0 %vm12837_vm3, %v9766_v12  ;;  %vm12848_vm3 = vnez %v12847_v63  ;;  %v12857_v63 = vld [vmem:[#allocation32_spill] sm:$0xff] }
 0x218   : > { %6810 = vmatpush1.bf16.msk.msra.mxu1 %vm12834_vm15, %v12200_v44  ;;  %2909 = vmatprep.mubr.bf16.mxu0 %v12194_v52  ;;  %vm12843_vm15 = vnez %v12842_v3  ;;  %v10373_v7 = vpop.trf.xlu1  ;;  %v10384_v3 = vpop.trf.xlu0 }
 0x219   : > { %6812 = vmatprep.subr.msk.bf16.mxu1 %vm12839_vm4, %v12200_v44  ;;  %6781 = vmatpush1.bf16.msk.msra.mxu0 %vm12843_vm15, %v12200_v44  ;;  %12844 = vst [vmem:[#allocation17_spill] sm:$0xff] %v10373_v7  ;;  %12851 = vst [vmem:[#allocation18_spill] sm:$0xff] %v10384_v3  ;;  %v12852_v7 = vld [vmem:[#allocation35_spill] sm:$0xff]  ;;  %vm12856_vm15 = vnez %v12855_v53  ;;  %v4432_v3 = vld [vmem:[%s9616_s16 + $0x3b0] sm:$0xff] }
 0x21a   : > { %6783 = vmatprep.subr.msk.bf16.mxu0 %vm12848_vm3, %v12200_v44  ;;  %vm12859_vm3 = vcmask 818176   ;;  %v4415_v53 = vld [vmem:[%s9616_s16 + $0x328] sm:$0xff] }
 0x21b   : > { %6732 = vmatmul.mubr.msk.bf16.gmra.mrb[104].mxu1 %vm12841_vm9, %v9766_v12  ;;  %v12849_v12 = vld [vmem:[#allocation33_spill] sm:$0xff]  ;;  %vm12853_vm9 = vnez %v12852_v7  ;;  %4767 = vxpose.xlu0.b32.cont [6/16] %v4415_v53, 128 }
 0x21c   : > { %3022 = vmatprep.mubr.bf16.mxu1 %v12194_v52  ;;  %6814 = vmatpush1.bf16.msk.msra.mxu1 %vm12846_vm13, %v12200_v44  ;;  %vm12850_vm4 = vnez %v12849_v12  ;;  %v10389_v56 = vpop.trf.xlu1  ;;  %vm12858_vm13 = vcmask 1041408   ;;  %v10400_v37 = vpop.trf.xlu0  ;;  %v12864_v7 = vld [vmem:[#allocation37_spill] sm:$0xff]  ;;  %v4431_v12 = vld [vmem:[%s9616_s16 + $0x3a8] sm:$0xff] }
 0x21d   : > { %6816 = vmatprep.subr.msk.bf16.mxu1 %vm12850_vm4, %v12200_v44  ;;  %6785 = vmatpush1.bf16.msk.msra.mxu0 %vm12853_vm9, %v12200_v44  ;;  %12854 = vst [vmem:[#allocation19_spill] sm:$0xff] %v10389_v56  ;;  %vm12861_vm4 = vmmov %vm12858_vm13  ;;  %v12866_v56 = vld [vmem:[#allocation38_spill] sm:$0xff]  ;;  %v4417_v53 = vld [vmem:[%s9616_s16 + $0x338] sm:$0xff] }
 0x21e   : > { %6786 = vmatprep.subr.msk.bf16.mxu0 %vm12858_vm13, %v12857_v63  ;;  %12862 = vst [vmem:[#allocation20_spill] sm:$0xff] %v10400_v37  ;;  %vm12863_vm9 = vmmov %vm12859_vm3  ;;  %4799 = vxpose.xlu1.b32.cont [6/16] %v4431_v12, 128  ;;  %v4416_v37 = vld [vmem:[%s9616_s16 + $0x330] sm:$0xff]  ;;  %v4433_v12 = vld [vmem:[%s9616_s16 + $0x3b8] sm:$0xff] }
 0x21f   : > { %6700 = vmatmul.mubr.msk.bf16.gmra.mrb[108].mxu0 %vm12859_vm3, %v9803_v13  ;;  %4768 = vxpose.xlu0.b32.cont [7/16] %v4416_v37, 128 }
 0x220   : > { %6818 = vmatpush1.bf16.msk.msra.mxu1 %vm12856_vm15, %v12200_v44  ;;  %2919 = vmatprep.mubr.bf16.mxu0 %v12194_v52  ;;  %v10409_v63 = vpop.trf.xlu1 }
 0x221   : > { %6819 = vmatprep.subr.msk.bf16.mxu1 %vm12861_vm4, %v12860_v40  ;;  %3167 = vmatpush1.bf16.msra.mxu0 %v12864_v7  ;;  %12865 = vst [vmem:[#allocation21_spill] sm:$0xff] %v10409_v63  ;;  %v12867_v40 = vld [vmem:[#allocation39_spill] sm:$0xff]  ;;  %v10419_v7 = vpop.trf.xlu0  ;;  %vm12873_vm4 = vmmov %vm12859_vm3 }
 0x222   : > { %vm12868_vm15 = vnez %v12867_v40  ;;  %12871 = vst [vmem:[#allocation23_spill] sm:$0xff] %v10419_v7  ;;  %4800 = vxpose.xlu1.b32.cont [7/16] %v4432_v3, 128  ;;  %v12949_v7 = vld [vmem:[#allocation57_spill] sm:$0xff] }
 0x223   : > { %6733 = vmatmul.mubr.msk.bf16.gmra.mrb[108].mxu1 %vm12863_vm9, %v9803_v13  ;;  %6829 = vmatprep.subr.msk.bf16.mxu0 %vm12868_vm15, %v12200_v44  ;;  %v12869_v13 = vld [vmem:[#allocation40_spill] sm:$0xff]  ;;  %vm12876_vm9 = vmmov %vm12859_vm3 }
 0x224   : > { %3032 = vmatprep.mubr.bf16.mxu1 %v12194_v52  ;;  %3280 = vmatpush1.bf16.msra.mxu1 %v12866_v56  ;;  %vm12870_vm13 = vnez %v12869_v13  ;;  %v10424_v56 = vpop.trf.xlu1  ;;  %v4418_v13 = vld [vmem:[%s9616_s16 + $0x340] sm:$0xff]  ;;  %vm12877_vm15 = vmmov %vm12859_vm3 }
 0x225   : > { %6862 = vmatprep.subr.msk.bf16.mxu1 %vm12870_vm13, %v12200_v44  ;;  %12872 = vst [vmem:[#allocation25_spill] sm:$0xff] %v10424_v56  ;;  %4769 = vxpose.xlu0.b32.cont [8/16] %v4417_v53, 128  ;;  %v10432_v40 = vpop.trf.xlu0  ;;  %v4434_v56 = vld [vmem:[%s9616_s16 + $0x3c0] sm:$0xff]  ;;  %v4435_v53 = vld [vmem:[%s9616_s16 + $0x3c8] sm:$0xff]  ;;  %vm12880_vm13 = vmmov %vm12859_vm3 }
 0x226   : > { %12874 = vst [vmem:[#allocation27_spill] sm:$0xff] %v10432_v40  ;;  %4801 = vxpose.xlu1.b32.cont [8/16] %v4433_v12, 128  ;;  %v12929_v40 = vld [vmem:[#allocation55_spill] sm:$0xff] }
 0x227   : > { %6701 = vmatmul.mubr.msk.bf16.gmra.mrb[112].mxu0 %vm12859_vm3, %v9834_v34 }
 0x228   : > { %2929 = vmatprep.mubr.bf16.mxu0 %v12194_v52  ;;  %v10435_v37 = vpop.trf.xlu1 }
 0x229   : > { %12875 = vst [vmem:[#allocation29_spill] sm:$0xff] %v10435_v37  ;;  %4770 = vxpose.xlu0.b32.cont [9/16] %v4418_v13, 128  ;;  %v10445_v3 = vpop.trf.xlu0  ;;  %v4420_v37 = vld [vmem:[%s9616_s16 + $0x350] sm:$0xff] }
 0x22a   : > { %4802 = vxpose.xlu1.b32.cont [9/16] %v4434_v56, 128  ;;  %12878 = vst [vmem:[#allocation30_spill] sm:$0xff] %v10445_v3  ;;  %v4436_v13 = vld [vmem:[%s9616_s16 + $0x3d0] sm:$0xff]  ;;  %v4421_v56 = vld [vmem:[%s9616_s16 + $0x358] sm:$0xff]  ;;  %v12906_v3 = vld [vmem:[#allocation47_spill] sm:$0xff] }
 0x22b   : > { %6734 = vmatmul.mubr.msk.bf16.gmra.mrb[112].mxu1 %vm12873_vm4, %v9834_v34  ;;  %v4419_v34 = vld [vmem:[%s9616_s16 + $0x348] sm:$0xff]  ;;  %vm12884_vm4 = vmmov %vm12859_vm3 }
 0x22c   : > { %3042 = vmatprep.mubr.bf16.mxu1 %v12194_v52  ;;  %v10448_v12 = vpop.trf.xlu1 }
 0x22d   : > { %4771 = vxpose.xlu0.b32.cont [10/16] %v4419_v34, 128  ;;  %12879 = vst [vmem:[#allocation31_spill] sm:$0xff] %v10448_v12  ;;  %v4422_v12 = vld [vmem:[%s9616_s16 + $0x360] sm:$0xff] }
 0x22e   : > { %4803 = vxpose.xlu1.b32.cont [10/16] %v4435_v53, 128  ;;  %v4437_v53 = vld [vmem:[%s9616_s16 + $0x3d8] sm:$0xff] }
 0x22f   : > { %6702 = vmatmul.mubr.msk.bf16.gmra.mrb[116].mxu0 %vm12876_vm9, %v9852_v10  ;;  %vm12886_vm9 = vmmov %vm12859_vm3 }
 0x230   : > { %2939 = vmatprep.mubr.bf16.mxu0 %v12194_v52  ;;  %v10461_v34 = vpop.trf.xlu1 }
 0x231   : > { %4772 = vxpose.xlu0.b32.cont [11/16] %v4420_v37, 128  ;;  %12882 = vst [vmem:[#allocation35_spill] sm:$0xff] %v10461_v34  ;;  %v12904_v34 = vld [vmem:[#allocation46_spill] sm:$0xff] }
 0x232   : > { %4804 = vxpose.xlu1.b32.cont [11/16] %v4436_v13, 128  ;;  %v4423_v13 = vld [vmem:[%s9616_s16 + $0x368] sm:$0xff] }
 0x233   : > { %6735 = vmatmul.mubr.msk.bf16.gmra.mrb[116].mxu1 %vm12877_vm15, %v9852_v10  ;;  %v10454_v10 = vpop.trf.xlu0  ;;  %vm12889_vm15 = vmmov %vm12859_vm3 }
 0x234   : > { %3052 = vmatprep.mubr.bf16.mxu1 %v12194_v52  ;;  %12881 = vst [vmem:[#allocation33_spill] sm:$0xff] %v10454_v10  ;;  %v4438_v10 = vld [vmem:[%s9616_s16 + $0x3e0] sm:$0xff] }
 0x235   : > { %4773 = vxpose.xlu0.b32.cont [12/16] %v4421_v56, 128  ;;  %v4439_v56 = vld [vmem:[%s9616_s16 + $0x3e8] sm:$0xff] }
 0x236   : > { %4805 = vxpose.xlu1.b32.cont [12/16] %v4437_v53, 128  ;;  %v10481_v53 = vld [vmem:[%s11707_s0 + $0x80] sm:$0xff]  }
 0x237   : > { %6703 = vmatmul.mubr.msk.bf16.gmra.mrb[120].mxu0 %vm12880_vm13, %v9867_v32  ;;  %v10465_v37 = vpop.trf.xlu0  ;;  %vm12891_vm13 = vmmov %vm12859_vm3 }
 0x238   : > { %2949 = vmatprep.mubr.bf16.mxu0 %v12194_v52  ;;  %12883 = vst [vmem:[#allocation36_spill] sm:$0xff] %v10465_v37 }
 0x239   : > { %4774 = vxpose.xlu0.b32.cont [13/16] %v4422_v12, 128 }
 0x23a   : > { %4806 = vxpose.xlu1.b32.cont [13/16] %v4438_v10, 128  ;;  %v12892_v10 = vld [vmem:[#allocation41_spill] sm:$0xff] }
 0x23b   : > { %6736 = vmatmul.mubr.msk.bf16.gmra.mrb[120].mxu1 %vm12859_vm3, %v9867_v32  ;;  %v10470_v32 = vpop.trf.xlu1  ;;  %vm12893_vm3 = vnez %v12892_v10  ;;  %v10512_v10 = vld [vmem:[%s11707_s0 + $0x88] sm:$0xff]  }
 0x23c   : > { %3062 = vmatprep.mubr.bf16.mxu1 %v12194_v52  ;;  %12885 = vst [vmem:[#allocation32_spill] sm:$0xff] %v10470_v32  ;;  %v4424_v32 = vld [vmem:[%s9616_s16 + $0x370] sm:$0xff] }
 0x23d   : > { %4775 = vxpose.xlu0.b32.cont [14/16] %v4423_v13, 128  ;;  %v4440_v13 = vld [vmem:[%s9616_s16 + $0x3f0] sm:$0xff] }
 0x23e   : > { %v10483_v12 = vpop.trf.xlu0  ;;  %4807 = vxpose.xlu1.b32.cont [14/16] %v4439_v56, 128  ;;  %v4425_v56 = vld [vmem:[%s9616_s16 + $0x378] sm:$0xff] }
 0x23f   : > { %6704 = vmatmul.mubr.msk.bf16.gmra.mrb[124].mxu0 %vm12884_vm4, %v9882_v5  ;;  %12887 = vst [vmem:[#allocation34_spill] sm:$0xff] %v10483_v12  ;;  %v12894_v12 = vld [vmem:[#allocation42_spill] sm:$0xff] }
 0x240   : > { %3186 = vmatprep.mubr.bf16.mxu0 %v12194_v52  ;;  %vm12895_vm4 = vnez %v12894_v12 }
 0x241   : > { %4776 = vxpose.xlu0.b32.cont [15/16] %v4424_v32, 128  ;;  %v12897_v32 = vld [vmem:[#allocation43_spill] sm:$0xff] }
 0x242   : > { %v10490_v37 = vpop.trf.xlu0  ;;  %4808 = vxpose.xlu1.b32.cont [15/16] %v4440_v13, 128  ;;  %v12909_v13 = vld [vmem:[#allocation48_spill] sm:$0xff] }
 0x243   : > { %6737 = vmatmul.mubr.msk.bf16.gmra.mrb[124].mxu1 %vm12886_vm9, %v9882_v5  ;;  %v10486_v5 = vpop.trf.xlu1  ;;  %12890 = vst [vmem:[#allocation38_spill] sm:$0xff] %v10490_v37  ;;  %vm12898_vm9 = vnez %v12897_v32  ;;  %v12899_v37 = vld [vmem:[#allocation44_spill] sm:$0xff]  ;;  %v4441_v32 = vld [vmem:[%s9616_s16 + $0x3f8] sm:$0xff] }
 0x244   : > { %3299 = vmatprep.mubr.bf16.mxu1 %v12194_v52  ;;  %12888 = vst [vmem:[#allocation37_spill] sm:$0xff] %v10486_v5 }
 0x245   : > { %4777 = vxpose.xlu0.b32.end [16/16] %v4425_v56, 128  ;;  %v4458_v56 = vld [vmem:[%s9616_s16 + $0x480] sm:$0xff] }
 0x246   : > { %v10517_v12 = vpop.trf.xlu0  ;;  %4809 = vxpose.xlu1.b32.end [16/16] %v4441_v32, 128  ;;  %v12919_v32 = vld [vmem:[#allocation51_spill] sm:$0xff] }
 0x247   : > { %6787 = vmatmul.mubr.msk.bf16.vlgmr.msra.gmra.mrb[0].mxu0 %vm12889_vm15, %v10481_v53  ;;  %v10503_v5 = vpop.trf.xlu1  ;;  %vm12900_vm15 = vnez %v12899_v37  ;;  %12901 = vst [vmem:[#allocation40_spill] sm:$0xff] %v10517_v12  ;;  %v12927_v12 = vld [vmem:[#allocation54_spill] sm:$0xff] }
 0x248   : > { %6831 = vmatpush1.bf16.msk.msra.mxu0 %vm12893_vm3, %v12200_v44  ;;  %3196 = vmatprep.mubr.bf16.mxu0 %v12194_v52  ;;  %12896 = vst [vmem:[#allocation39_spill] sm:$0xff] %v10503_v5  ;;  %v12902_v5 = vld [vmem:[#allocation45_spill] sm:$0xff]  ;;  %vm12905_vm3 = vnez %v12904_v34  ;;  %v4442_v34 = vld [vmem:[%s9616_s16 + $0x400] sm:$0xff] }
 0x249   : > { %6833 = vmatprep.subr.msk.bf16.mxu0 %vm12898_vm9, %v12200_v44  ;;  %vm12910_vm9 = vnez %v12909_v13  ;;  %4826 = vxpose.xlu0.b32.start [1/16] %v4442_v34, 128  ;;  %v12932_v34 = vld [vmem:[#allocation56_spill] sm:$0xff] }
 0x24a   : > { %4858 = vxpose.xlu1.b32.start [1/16] %v4458_v56, 128 }
 0x24b   : > { %6820 = vmatmul.mubr.msk.bf16.vlgmr.msra.gmra.mrb[0].mxu1 %vm12891_vm13, %v10481_v53  ;;  %vm12903_vm13 = vnez %v12902_v5  ;;  %v10529_v37 = vpop.trf.xlu1  ;;  %v10536_v5 = vpop.trf.xlu0 }
 0x24c   : > { %6864 = vmatpush1.bf16.msk.msra.mxu1 %vm12895_vm4, %v12200_v44  ;;  %3309 = vmatprep.mubr.bf16.mxu1 %v12194_v52  ;;  %vm12907_vm4 = vnez %v12906_v3  ;;  %12908 = vst [vmem:[#allocation41_spill] sm:$0xff] %v10529_v37  ;;  %12912 = vst [vmem:[#allocation42_spill] sm:$0xff] %v10536_v5  ;;  %v12914_v3 = vld [vmem:[#allocation49_spill] sm:$0xff]  ;;  %v12917_v37 = vld [vmem:[#allocation50_spill] sm:$0xff] }
 0x24d   : > { %6866 = vmatprep.subr.msk.bf16.mxu1 %vm12900_vm15, %v12200_v44  ;;  %6835 = vmatpush1.bf16.msk.msra.mxu0 %vm12903_vm13, %v12200_v44  ;;  %vm12911_vm15 = vcmask 818176   ;;  %v10558_v5 = vld [vmem:[%s11707_s0 + $0x90] sm:$0xff]  }
 0x24e   : > { %6837 = vmatprep.subr.msk.bf16.mxu0 %vm12907_vm4, %v12200_v44  ;;  %vm12913_vm13 = vmmov %vm12911_vm15  ;;  %vm12918_vm4 = vnez %v12917_v37  ;;  %v12924_v37 = vld [vmem:[#allocation53_spill] sm:$0xff] }
 0x24f   : > { %6788 = vmatmul.mubr.msk.bf16.gmra.mrb[4].mxu0 %vm12911_vm15, %v10512_v10  ;;  %v10547_v13 = vpop.trf.xlu1 }
 0x250   : > { %6868 = vmatpush1.bf16.msk.msra.mxu1 %vm12905_vm3, %v12200_v44  ;;  %3206 = vmatprep.mubr.bf16.mxu0 %v12194_v52  ;;  %vm12915_vm3 = vnez %v12914_v3  ;;  %12916 = vst [vmem:[#allocation43_spill] sm:$0xff] %v10547_v13  ;;  %v12921_v3 = vld [vmem:[#allocation52_spill] sm:$0xff]  ;;  %v10563_v13 = vpop.trf.xlu0 }
 0x251   : > { %6870 = vmatprep.subr.msk.bf16.mxu1 %vm12910_vm9, %v12200_v44  ;;  %6839 = vmatpush1.bf16.msk.msra.mxu0 %vm12915_vm3, %v12200_v44  ;;  %vm12920_vm9 = vnez %v12919_v32  ;;  %vm12922_vm15 = vnez %v12921_v3  ;;  %12923 = vst [vmem:[#allocation44_spill] sm:$0xff] %v10563_v13  ;;  %vm12928_vm3 = vnez %v12927_v12  ;;  %v4443_v12 = vld [vmem:[%s9616_s16 + $0x408] sm:$0xff]  ;;  %v4444_v13 = vld [vmem:[%s9616_s16 + $0x410] sm:$0xff] }
 0x252   : > { %6841 = vmatprep.subr.msk.bf16.mxu0 %vm12920_vm9, %v12200_v44  ;;  %vm12931_vm9 = vcmask 818176   ;;  %v4459_v3 = vld [vmem:[%s9616_s16 + $0x488] sm:$0xff]  ;;  %4827 = vxpose.xlu0.b32.cont [2/16] %v4443_v12, 128  ;;  %v12952_v12 = vld [vmem:[#allocation58_spill] sm:$0xff] }
 0x253   : > { %6821 = vmatmul.mubr.msk.bf16.gmra.mrb[4].mxu1 %vm12913_vm13, %v10512_v10  ;;  %vm12925_vm13 = vnez %v12924_v37  ;;  %v10568_v32 = vpop.trf.xlu1  ;;  %4859 = vxpose.xlu1.b32.cont [2/16] %v4459_v3, 128 }
 0x254   : > { %3319 = vmatprep.mubr.bf16.mxu1 %v12194_v52  ;;  %6872 = vmatpush1.bf16.msk.msra.mxu1 %vm12918_vm4, %v12200_v44  ;;  %12926 = vst [vmem:[#allocation45_spill] sm:$0xff] %v10568_v32  ;;  %vm12930_vm4 = vnez %v12929_v40  ;;  %v10581_v56 = vpop.trf.xlu0  ;;  %v12936_v40 = vld [vmem:[#allocation59_spill] sm:$0xff]  ;;  %v10603_v32 = vld [vmem:[%s11707_s0 + $0x98] sm:$0xff]  }
 0x255   : > { %6874 = vmatprep.subr.msk.bf16.mxu1 %vm12922_vm15, %v12200_v44  ;;  %6843 = vmatpush1.bf16.msk.msra.mxu0 %vm12925_vm13, %v12200_v44  ;;  %vm12933_vm15 = vnez %v12932_v34  ;;  %12934 = vst [vmem:[#allocation46_spill] sm:$0xff] %v10581_v56  ;;  %vm12935_vm13 = vmmov %vm12931_vm9  ;;  %v12939_v34 = vld [vmem:[#allocation60_spill] sm:$0xff]  ;;  %v12941_v56 = vld [vmem:[#allocation61_spill] sm:$0xff] }
 0x256   : > { %6845 = vmatprep.subr.msk.bf16.mxu0 %vm12930_vm4, %v12200_v44  ;;  %vm12940_vm4 = vnez %v12939_v34  ;;  %4828 = vxpose.xlu0.b32.cont [3/16] %v4444_v13, 128 }
 0x257   : > { %6789 = vmatmul.mubr.msk.bf16.gmra.mrb[8].mxu0 %vm12931_vm9, %v10558_v5  ;;  %v10592_v37 = vpop.trf.xlu1  ;;  %vm12942_vm9 = vnez %v12941_v56 }
 0x258   : > { %6876 = vmatpush1.bf16.msk.msra.mxu1 %vm12928_vm3, %v12200_v44  ;;  %3216 = vmatprep.mubr.bf16.mxu0 %v12194_v52  ;;  %vm12937_vm3 = vnez %v12936_v40  ;;  %12938 = vst [vmem:[#allocation47_spill] sm:$0xff] %v10592_v37  ;;  %v12943_v40 = vld [vmem:[#allocation62_spill] sm:$0xff]  ;;  %v10608_v37 = vpop.trf.xlu0 }
 0x259   : > { %6878 = vmatprep.subr.msk.bf16.mxu1 %vm12933_vm15, %v12200_v44  ;;  %6847 = vmatpush1.bf16.msk.msra.mxu0 %vm12937_vm3, %v12200_v44  ;;  %vm12944_vm15 = vnez %v12943_v40  ;;  %12945 = vst [vmem:[#allocation48_spill] sm:$0xff] %v10608_v37  ;;  %vm12951_vm3 = vcmask 818176   ;;  %v12956_v40 = vld [vmem:[#allocation67_spill] sm:$0xff]  ;;  %v12960_v37 = vld [vmem:[#allocation66_spill] sm:$0xff] }
 0x25a   : > { %6849 = vmatprep.subr.msk.bf16.mxu0 %vm12942_vm9, %v12200_v44  ;;  %vm12966_vm9 = vmmov %vm12951_vm3 }
 0x25b   : > { %6822 = vmatmul.mubr.msk.bf16.gmra.mrb[8].mxu1 %vm12935_vm13, %v10558_v5  ;;  %v10613_v56 = vpop.trf.xlu1  ;;  %vm12950_vm13 = vcmask 1041408  }
 0x25c   : > { %3329 = vmatprep.mubr.bf16.mxu1 %v12194_v52  ;;  %6880 = vmatpush1.bf16.msk.msra.mxu1 %vm12940_vm4, %v12200_v44  ;;  %12947 = vst [vmem:[#allocation49_spill] sm:$0xff] %v10613_v56  ;;  %vm12953_vm4 = vmmov %vm12950_vm13  ;;  %v10624_v3 = vpop.trf.xlu0  ;;  %v12958_v56 = vld [vmem:[#allocation68_spill] sm:$0xff] }
 0x25d   : > { %6882 = vmatprep.subr.msk.bf16.mxu1 %vm12944_vm15, %v12200_v44  ;;  %6851 = vmatpush1.bf16.msk.msra.mxu0 %vm12662_vm10, %v12200_v44  ;;  %12954 = vst [vmem:[#allocation50_spill] sm:$0xff] %v10624_v3  ;;  %vm12955_vm10 = vmmov %vm12951_vm3  ;;  %v10642_v3 = vld [vmem:[%s11707_s0 + $0xa0] sm:$0xff]  }
 0x25e   : > { %6852 = vmatprep.subr.msk.bf16.mxu0 %vm12950_vm13, %v12949_v7  ;;  %v4460_v7 = vld [vmem:[%s9616_s16 + $0x490] sm:$0xff]  ;;  %vm12969_vm15 = vmmov %vm12951_vm3 }
 0x25f   : > { %6790 = vmatmul.mubr.msk.bf16.gmra.mrb[12].mxu0 %vm12951_vm3, %v10603_v32  ;;  %v10633_v34 = vpop.trf.xlu1  ;;  %4860 = vxpose.xlu1.b32.cont [3/16] %v4460_v7, 128  ;;  %v4462_v7 = vld [vmem:[%s9616_s16 + $0x4a0] sm:$0xff]  ;;  %vm12971_vm13 = vmmov %vm12951_vm3 }
 0x260   : > { %6884 = vmatpush1.bf16.msk.msra.mxu1 %vm12664_vm8, %v12200_v44  ;;  %3226 = vmatprep.mubr.bf16.mxu0 %v12194_v52  ;;  %12957 = vst [vmem:[#allocation51_spill] sm:$0xff] %v10633_v34  ;;  %vm12961_vm8 = vnez %v12960_v37  ;;  %v4446_v37 = vld [vmem:[%s9616_s16 + $0x420] sm:$0xff] }
 0x261   : > { %6885 = vmatprep.subr.msk.bf16.mxu1 %vm12953_vm4, %v12952_v12  ;;  %3393 = vmatpush1.bf16.msra.mxu0 %v12956_v40  ;;  %v10647_v40 = vpop.trf.xlu0  ;;  %v4461_v12 = vld [vmem:[%s9616_s16 + $0x498] sm:$0xff]  ;;  %vm12974_vm4 = vmmov %vm12951_vm3 }
 0x262   : > { %6895 = vmatprep.subr.msk.bf16.mxu0 %vm12674_vm12, %v12200_v44  ;;  %12962 = vst [vmem:[#allocation52_spill] sm:$0xff] %v10647_v40  ;;  %vm12964_vm12 = vmmov %vm12951_vm3  ;;  %v4463_v40 = vld [vmem:[%s9616_s16 + $0x4a8] sm:$0xff] }
 0x263   : > { %6823 = vmatmul.mubr.msk.bf16.gmra.mrb[12].mxu1 %vm12955_vm10, %v10603_v32  ;;  %v10650_v34 = vpop.trf.xlu1  ;;  %4861 = vxpose.xlu1.b32.cont [4/16] %v4461_v12, 128  ;;  %vm12977_vm10 = vmmov %vm12951_vm3 }
 0x264   : > { %3339 = vmatprep.mubr.bf16.mxu1 %v12194_v52  ;;  %3506 = vmatpush1.bf16.msra.mxu1 %v12958_v56  ;;  %v4445_v56 = vld [vmem:[%s9616_s16 + $0x418] sm:$0xff]  ;;  %12963 = vst [vmem:[#allocation53_spill] sm:$0xff] %v10650_v34 }
 0x265   : > { %6928 = vmatprep.subr.msk.bf16.mxu1 %vm12961_vm8, %v12200_v44  ;;  %4829 = vxpose.xlu0.b32.cont [4/16] %v4445_v56, 128  ;;  %v10655_v63 = vpop.trf.xlu0  ;;  %v10668_v56 = vld [vmem:[%s11707_s0 + $0xa8] sm:$0xff]   ;;  %vm12978_vm8 = vmmov %vm12951_vm3 }
 0x266   : > { %12965 = vst [vmem:[#allocation54_spill] sm:$0xff] %v10655_v63  ;;  %v4447_v63 = vld [vmem:[%s9616_s16 + $0x428] sm:$0xff] }
 0x267   : > { %6791 = vmatmul.mubr.msk.bf16.gmra.mrb[16].mxu0 %vm12964_vm12, %v10642_v3  ;;  %v10662_v13 = vpop.trf.xlu1  ;;  %4862 = vxpose.xlu1.b32.cont [5/16] %v4462_v7, 128  ;;  %vm12979_vm12 = vmmov %vm12951_vm3 }
 0x268   : > { %3236 = vmatprep.mubr.bf16.mxu0 %v12194_v52  ;;  %12967 = vst [vmem:[#allocation55_spill] sm:$0xff] %v10662_v13 }
 0x269   : > { %4830 = vxpose.xlu0.b32.cont [5/16] %v4446_v37, 128  ;;  %v10671_v34 = vpop.trf.xlu0  ;;  %v4448_v37 = vld [vmem:[%s9616_s16 + $0x430] sm:$0xff] }
 0x26a   : > { %12968 = vst [vmem:[#allocation56_spill] sm:$0xff] %v10671_v34  ;;  %v4464_v34 = vld [vmem:[%s9616_s16 + $0x4b0] sm:$0xff] }
 0x26b   : > { %6824 = vmatmul.mubr.msk.bf16.gmra.mrb[16].mxu1 %vm12966_vm9, %v10642_v3  ;;  %v10676_v12 = vpop.trf.xlu1  ;;  %4863 = vxpose.xlu1.b32.cont [6/16] %v4463_v40, 128  ;;  %v4450_v40 = vld [vmem:[%s9616_s16 + $0x440] sm:$0xff]  ;;  %vm12981_vm9 = vmmov %vm12951_vm3 }
 0x26c   : > { %3349 = vmatprep.mubr.bf16.mxu1 %v12194_v52  ;;  %12970 = vst [vmem:[#allocation59_spill] sm:$0xff] %v10676_v12  ;;  %v4449_v12 = vld [vmem:[%s9616_s16 + $0x438] sm:$0xff] }
 0x26d   : > { %4831 = vxpose.xlu0.b32.cont [6/16] %v4447_v63, 128  ;;  %v10684_v7 = vpop.trf.xlu0  ;;  %v10689_v63 = vld [vmem:[%s11707_s0 + $0xb0] sm:$0xff]  }
 0x26e   : > { %12972 = vst [vmem:[#allocation60_spill] sm:$0xff] %v10684_v7 }
 0x26f   : > { %6792 = vmatmul.mubr.msk.bf16.gmra.mrb[20].mxu0 %vm12969_vm15, %v10668_v56  ;;  %4864 = vxpose.xlu1.b32.cont [7/16] %v4464_v34, 128  ;;  %v10692_v13 = vpop.trf.xlu1  ;;  %v4466_v34 = vld [vmem:[%s9616_s16 + $0x4c0] sm:$0xff]  ;;  %vm12982_vm15 = vnez %v12406_v6 }
 0x270   : > { %3246 = vmatprep.mubr.bf16.mxu0 %v12194_v52  ;;  %12973 = vst [vmem:[#allocation61_spill] sm:$0xff] %v10692_v13  ;;  %v4451_v13 = vld [vmem:[%s9616_s16 + $0x448] sm:$0xff]  ;;  %v4470_v6 = vld [vmem:[%s9616_s16 + $0x4e0] sm:$0xff] }
 0x271   : > { %4832 = vxpose.xlu0.b32.cont [7/16] %v4448_v37, 128  ;;  %v10701_v7 = vpop.trf.xlu0  ;;  %v10708_v37 = vld [vmem:[%s11707_s0 + $0xb8] sm:$0xff]  }
 0x273   : > { %6825 = vmatmul.mubr.msk.bf16.gmra.mrb[20].mxu1 %vm12971_vm13, %v10668_v56  ;;  %4865 = vxpose.xlu1.b32.cont [8/16] %v4465_v38, 128  ;;  %v4452_v38 = vld [vmem:[%s9616_s16 + $0x450] sm:$0xff]  ;;  %vm12983_vm13 = vnez %v12412_v18  ;;  %v13013_v18 = vld [vmem:[#allocation79_spill] sm:$0xff] }
 0x274   : > { %3359 = vmatprep.mubr.bf16.mxu1 %v12194_v52 }
 0x275   : > { %4833 = vxpose.xlu0.b32.cont [8/16] %v4449_v12, 128  ;;  %v10710_v12 = vpop.trf.xlu1  ;;  %v10714_v61 = vpop.trf.xlu0 }
 0x276   : > { %12975 = vst [vmem:[#allocation62_spill] sm:$0xff] %v10710_v12  ;;  %12976 = vst [vmem:[#allocation63_spill] sm:$0xff] %v10714_v61  ;;  %v4453_v61 = vld [vmem:[%s9616_s16 + $0x458] sm:$0xff] }
 0x277   : > { %6793 = vmatmul.mubr.msk.bf16.gmra.mrb[24].mxu0 %vm12951_vm3, %v10689_v63  ;;  %4866 = vxpose.xlu1.b32.cont [9/16] %v4466_v34, 128  ;;  %v4468_v34 = vld [vmem:[%s9616_s16 + $0x4d0] sm:$0xff]  ;;  %vm12984_vm3 = vnez %v12273_v4 }
 0x278   : > { %3256 = vmatprep.mubr.bf16.mxu0 %v12194_v52 }
 0x279   : > { %4834 = vxpose.xlu0.b32.cont [9/16] %v4450_v40, 128  ;;  %v10723_v40 = vpop.trf.xlu1  ;;  %v10727_v12 = vpop.trf.xlu0 }
 0x27b   : > { %6826 = vmatmul.mubr.msk.bf16.gmra.mrb[24].mxu1 %vm12974_vm4, %v10689_v63  ;;  %4867 = vxpose.xlu1.b32.cont [10/16] %v4467_v36, 128  ;;  %v4469_v36 = vld [vmem:[%s9616_s16 + $0x4d8] sm:$0xff]  ;;  %vm12986_vm4 = vnez %v12280_v49 }
 0x27c   : > { %3369 = vmatprep.mubr.bf16.mxu1 %v12194_v52 }
 0x27d   : > { %4835 = vxpose.xlu0.b32.cont [10/16] %v4451_v13, 128  ;;  %v10731_v13 = vpop.trf.xlu1 }
 0x27e   : > { %12980 = vst [vmem:[#allocation64_spill] sm:$0xff] %v10731_v13  ;;  %v13117_v13 = vld [vmem:[#allocation114_spill] sm:$0xff] }
 0x27f   : > { %6794 = vmatmul.mubr.msk.bf16.gmra.mrb[28].mxu0 %vm12977_vm10, %v10708_v37  ;;  %4868 = vxpose.xlu1.b32.cont [11/16] %v4468_v34, 128  ;;  %vm12987_vm10 = vnez %v12288_v46  ;;  %v4455_v46 = vld [vmem:[%s9616_s16 + $0x468] sm:$0xff]  ;;  %v4474_v34 = vld [vmem:[%s9616_s16 + $0x500] sm:$0xff] }
 0x280   : > { %3412 = vmatprep.mubr.bf16.mxu0 %v12194_v52 }
 0x281   : > { %4836 = vxpose.xlu0.b32.cont [11/16] %v4452_v38, 128  ;;  %v4454_v38 = vld [vmem:[%s9616_s16 + $0x460] sm:$0xff]  ;;  %v10763_v4 = vpop.trf.xlu1 }
 0x282   : > { %12990 = vst [vmem:[#allocation58_spill] sm:$0xff] %v10763_v4  ;;  %v4482_v4 = vld [vmem:[%s9616_s16 + $0x540] sm:$0xff] }
 0x283   : > { %6827 = vmatmul.mubr.msk.bf16.gmra.mrb[28].mxu1 %vm12978_vm8, %v10708_v37  ;;  %4869 = vxpose.xlu1.b32.cont [12/16] %v4469_v36, 128  ;;  %vm12988_vm8 = vnez %v12293_v11  ;;  %v4473_v11 = vld [vmem:[%s9616_s16 + $0x4f8] sm:$0xff] }
 0x284   : > { %3525 = vmatprep.mubr.bf16.mxu1 %v12194_v52 }
 0x285   : > { %4837 = vxpose.xlu0.b32.cont [12/16] %v4453_v61, 128  ;;  %v10748_v61 = vpop.trf.xlu0 }
 0x286   : > { %12985 = vst [vmem:[#allocation57_spill] sm:$0xff] %v10748_v61 }
 0x287   : > { %6853 = vmatmul.mubr.msk.bf16.vlgmr.msra.gmra.mrb[32].mxu0 %vm12979_vm12, %v10481_v53  ;;  %vm12989_vm12 = vnez %v12297_v0  ;;  %4870 = vxpose.xlu1.b32.cont [13/16] %v4470_v6, 128  ;;  %v4471_v0 = vld [vmem:[%s9616_s16 + $0x4e8] sm:$0xff] }
 0x288   : > { %6897 = vmatpush1.bf16.msk.msra.mxu0 %vm12982_vm15, %v12200_v44  ;;  %3422 = vmatprep.mubr.bf16.mxu0 %v12194_v52  ;;  %vm12992_vm15 = vcmask 818176  }
 0x289   : > { %6899 = vmatprep.subr.msk.bf16.mxu0 %vm12984_vm3, %v12200_v44  ;;  %4838 = vxpose.xlu0.b32.cont [13/16] %v4454_v38, 128  ;;  %v10774_v49 = vpop.trf.xlu0  ;;  %vm12994_vm3 = vnez %v12309_v16  ;;  %v4490_v38 = vld [vmem:[%s9616_s16 + $0x580] sm:$0xff] }
 0x28b   : > { %6886 = vmatmul.mubr.msk.bf16.vlgmr.msra.gmra.mrb[32].mxu1 %vm12981_vm9, %v10481_v53  ;;  %vm12991_vm9 = vnez %v12301_v58  ;;  %v10790_v58 = vpop.trf.xlu1  ;;  %4871 = vxpose.xlu1.b32.cont [14/16] %v4471_v0, 128  ;;  %v4491_v0 = vld [vmem:[%s9616_s16 + $0x588] sm:$0xff] }
 0x28c   : > { %6930 = vmatpush1.bf16.msk.msra.mxu1 %vm12983_vm13, %v12200_v44  ;;  %3535 = vmatprep.mubr.bf16.mxu1 %v12194_v52  ;;  %vm12993_vm13 = vmmov %vm12992_vm15 }
 0x28d   : > { %6932 = vmatprep.subr.msk.bf16.mxu1 %vm12986_vm4, %v12200_v44  ;;  %6901 = vmatpush1.bf16.msk.msra.mxu0 %vm12987_vm10, %v12200_v44  ;;  %vm12995_vm4 = vnez %v12313_v8  ;;  %vm12996_vm10 = vnez %v12317_v59  ;;  %v10792_v60 = vpop.trf.xlu0 }
 0x28e   : > { %6903 = vmatprep.subr.msk.bf16.mxu0 %vm12989_vm12, %v12200_v44  ;;  %4839 = vxpose.xlu0.b32.cont [14/16] %v4455_v46, 128  ;;  %vm12999_vm12 = vnez %v12697_v14  ;;  %v13016_v14 = vld [vmem:[#allocation72_spill] sm:$0xff]  ;;  %v4475_v46 = vld [vmem:[%s9616_s16 + $0x508] sm:$0xff] }
 0x28f   : > { %6854 = vmatmul.mubr.msk.bf16.gmra.mrb[36].mxu0 %vm12992_vm15, %v10512_v10  ;;  %vm13001_vm15 = vnez %v12699_v2  ;;  %v10808_v8 = vpop.trf.xlu1 }
 0x290   : > { %6934 = vmatpush1.bf16.msk.msra.mxu1 %vm12988_vm8, %v12200_v44  ;;  %3432 = vmatprep.mubr.bf16.mxu0 %v12194_v52  ;;  %vm12998_vm8 = vnez %v12327_v45  ;;  %v4456_v45 = vld [vmem:[%s9616_s16 + $0x470] sm:$0xff] }
 0x291   : > { %6936 = vmatprep.subr.msk.bf16.mxu1 %vm12991_vm9, %v12200_v44  ;;  %6905 = vmatpush1.bf16.msk.msra.mxu0 %vm12692_vm1, %v12200_v44  ;;  %vm12997_vm1 = vnez %v12322_v55  ;;  %vm13000_vm9 = vmmov %vm12993_vm13  ;;  %v10814_v16 = vpop.trf.xlu0  ;;  %v4472_v55 = vld [vmem:[%s9616_s16 + $0x4f0] sm:$0xff] }
 0x292   : > { %6907 = vmatprep.subr.msk.bf16.mxu0 %vm12995_vm4, %v12200_v44  ;;  %vm13004_vm4 = vnez %v12345_v50  ;;  %4840 = vxpose.xlu0.b32.cont [15/16] %v4456_v45, 128  ;;  %v13012_v50 = vld [vmem:[#allocation78_spill] sm:$0xff] }
 0x293   : > { %6887 = vmatmul.mubr.msk.bf16.gmra.mrb[36].mxu1 %vm12993_vm13, %v10512_v10  ;;  %vm13002_vm13 = vmmov %vm13000_vm9  ;;  %v10830_v59 = vpop.trf.xlu1  ;;  %4872 = vxpose.xlu1.b32.cont [15/16] %v4472_v55, 128  ;;  %v4476_v55 = vld [vmem:[%s9616_s16 + $0x510] sm:$0xff] }
 0x294   : > { %3545 = vmatprep.mubr.bf16.mxu1 %v12194_v52  ;;  %6938 = vmatpush1.bf16.msk.msra.mxu1 %vm12994_vm3, %v12200_v44  ;;  %vm13003_vm3 = vnez %v12341_v54 }
 0x295   : > { %6940 = vmatprep.subr.msk.bf16.mxu1 %vm12996_vm10, %v12200_v44  ;;  %6909 = vmatpush1.bf16.msk.msra.mxu0 %vm12997_vm1, %v12200_v44  ;;  %vm13005_vm10 = vnez %v12347_v47  ;;  %vm13006_vm1 = vnez %v12349_v43  ;;  %v10832_v54 = vpop.trf.xlu0  ;;  %v13009_v43 = vld [vmem:[#allocation77_spill] sm:$0xff] }
 0x296   : > { %6911 = vmatprep.subr.msk.bf16.mxu0 %vm12999_vm12, %v12200_v44  ;;  %vm13008_vm12 = vcmask 1041408  }
 0x297   : > { %6855 = vmatmul.mubr.msk.bf16.gmra.mrb[40].mxu0 %vm13000_vm9, %v10558_v5  ;;  %v10846_v47 = vpop.trf.xlu1  ;;  %4873 = vxpose.xlu1.b32.end [16/16] %v4473_v11, 128 }
 0x298   : > { %6942 = vmatpush1.bf16.msk.msra.mxu1 %vm12998_vm8, %v12200_v44  ;;  %3442 = vmatprep.mubr.bf16.mxu0 %v12194_v52  ;;  %vm13007_vm8 = vnez %v12355_v39  ;;  %v4457_v39 = vld [vmem:[%s9616_s16 + $0x478] sm:$0xff] }
 0x299   : > { %6944 = vmatprep.subr.msk.bf16.mxu1 %vm13001_vm15, %v12200_v44  ;;  %6913 = vmatpush1.bf16.msk.msra.mxu0 %vm13003_vm3, %v12200_v44  ;;  %vm13010_vm15 = vmmov %vm13008_vm12  ;;  %v10852_v41 = vpop.trf.xlu0  ;;  %vm13017_vm3 = vnez %v13016_v14  ;;  %v4478_v14 = vld [vmem:[%s9616_s16 + $0x520] sm:$0xff] }
 0x29a   : > { %6915 = vmatprep.subr.msk.bf16.mxu0 %vm13005_vm10, %v12200_v44  ;;  %4841 = vxpose.xlu0.b32.end [16/16] %v4457_v39, 128  ;;  %v4492_v39 = vld [vmem:[%s9616_s16 + $0x590] sm:$0xff] }
 0x29b   : > { %6888 = vmatmul.mubr.msk.bf16.gmra.mrb[40].mxu1 %vm13002_vm13, %v10558_v5  ;;  %vm13011_vm13 = vmmov %vm13000_vm9  ;;  %v10864_v2 = vpop.trf.xlu1  ;;  %4922 = vxpose.xlu1.b32.start [1/16] %v4490_v38, 128 }
 0x29c   : > { %3555 = vmatprep.mubr.bf16.mxu1 %v12194_v52  ;;  %6946 = vmatpush1.bf16.msk.msra.mxu1 %vm13004_vm4, %v12200_v44  ;;  %vm13018_vm4 = vmmov %vm13000_vm9 }
 0x29d   : > { %6948 = vmatprep.subr.msk.bf16.mxu1 %vm13006_vm1, %v12200_v44  ;;  %6917 = vmatpush1.bf16.msk.msra.mxu0 %vm12706_vm7, %v12200_v44  ;;  %v10867_v36 = vpop.trf.xlu0  ;;  %vm13019_vm10 = vmmov %vm13018_vm4 }
 0x29e   : > { %6918 = vmatprep.subr.msk.bf16.mxu0 %vm13008_vm12, %v9340_v48  ;;  %v13014_v48 = vld [vmem:[#allocation71_spill] sm:$0xff]  ;;  %4890 = vxpose.xlu0.b32.start [1/16] %v4474_v34, 128  ;;  %vm13020_vm1 = vmmov %vm13018_vm4  ;;  %v4494_v34 = vld [vmem:[%s9616_s16 + $0x5a0] sm:$0xff] }
 0x29f   : > { %6856 = vmatmul.mubr.msk.bf16.gmra.mrb[44].mxu0 %vm13000_vm9, %v10603_v32  ;;  %vm13015_vm7 = vnez %v13014_v48  ;;  %v10872_v6 = vpop.trf.xlu1  ;;  %4923 = vxpose.xlu1.b32.cont [2/16] %v4491_v0, 128  ;;  %vm13022_vm12 = vmmov %vm13020_vm1 }
 0x2a0   : > { %6950 = vmatpush1.bf16.msk.msra.mxu1 %vm13007_vm8, %v12200_v44  ;;  %3452 = vmatprep.mubr.bf16.mxu0 %v12194_v52  ;;  %vm13021_vm8 = vmmov %vm13020_vm1 }
 0x2a1   : > { %6951 = vmatprep.subr.msk.bf16.mxu1 %vm13010_vm15, %v13009_v43  ;;  %3619 = vmatpush1.bf16.msra.mxu0 %v13012_v50  ;;  %v10880_v45 = vpop.trf.xlu0  ;;  %v4477_v50 = vld [vmem:[%s9616_s16 + $0x518] sm:$0xff]  ;;  %vm13023_vm9 = vmmov %vm13020_vm1 }
 0x2a2   : > { %6961 = vmatprep.subr.msk.bf16.mxu0 %vm13015_vm7, %v12200_v44  ;;  %4891 = vxpose.xlu0.b32.cont [2/16] %v4475_v46, 128  ;;  %v4479_v46 = vld [vmem:[%s9616_s16 + $0x528] sm:$0xff]  ;;  %vm13024_vm15 = vmmov %vm13020_vm1 }
 0x2a3   : > { %6889 = vmatmul.mubr.msk.bf16.gmra.mrb[44].mxu1 %vm13011_vm13, %v10603_v32  ;;  %v10883_v43 = vpop.trf.xlu1  ;;  %4924 = vxpose.xlu1.b32.cont [3/16] %v4492_v39, 128  ;;  %v4480_v39 = vld [vmem:[%s9616_s16 + $0x530] sm:$0xff]  ;;  %vm13025_vm13 = vmmov %vm13020_vm1 }
 0x2a4   : > { %3565 = vmatprep.mubr.bf16.mxu1 %v12194_v52  ;;  %3732 = vmatpush1.bf16.msra.mxu1 %v13013_v18  ;;  %v4493_v18 = vld [vmem:[%s9616_s16 + $0x598] sm:$0xff]  ;;  %vm13026_vm7 = vmmov %vm13020_vm1 }
 0x2a5   : > { %6994 = vmatprep.subr.msk.bf16.mxu1 %vm13017_vm3, %v12200_v44  ;;  %v10893_v11 = vpop.trf.xlu0  ;;  %vm13027_vm3 = vmmov %vm13020_vm1 }
 0x2a6   : > { %4892 = vxpose.xlu0.b32.cont [3/16] %v4476_v55, 128  ;;  %v4495_v55 = vld [vmem:[%s9616_s16 + $0x5a8] sm:$0xff] }
 0x2a7   : > { %6857 = vmatmul.mubr.msk.bf16.gmra.mrb[48].mxu0 %vm13018_vm4, %v10642_v3  ;;  %v10896_v48 = vpop.trf.xlu1  ;;  %4925 = vxpose.xlu1.b32.cont [4/16] %v4493_v18, 128  ;;  %v4496_v18 = vld [vmem:[%s9616_s16 + $0x5b0] sm:$0xff]  ;;  %vm13028_vm4 = vnez %v12366_v33 }
 0x2a8   : > { %3462 = vmatprep.mubr.bf16.mxu0 %v12194_v52 }
 0x2a9   : > { %v10902_v38 = vpop.trf.xlu0 }
 0x2aa   : > { %4893 = vxpose.xlu0.b32.cont [4/16] %v4477_v50, 128 }
 0x2ab   : > { %6890 = vmatmul.mubr.msk.bf16.gmra.mrb[48].mxu1 %vm13019_vm10, %v10642_v3  ;;  %v10908_v0 = vpop.trf.xlu1  ;;  %4926 = vxpose.xlu1.b32.cont [5/16] %v4494_v34, 128  ;;  %v4481_v34 = vld [vmem:[%s9616_s16 + $0x538] sm:$0xff]  ;;  %vm13029_vm10 = vnez %v12370_v30  ;;  %v4499_v30 = vld [vmem:[%s9616_s16 + $0x5c8] sm:$0xff] }
 0x2ac   : > { %3575 = vmatprep.mubr.bf16.mxu1 %v12194_v52 }
 0x2ad   : > { %v10913_v50 = vpop.trf.xlu0 }
 0x2ae   : > { %4894 = vxpose.xlu0.b32.cont [5/16] %v4478_v14, 128 }
 0x2af   : > { %6858 = vmatmul.mubr.msk.bf16.gmra.mrb[52].mxu0 %vm13020_vm1, %v10668_v56  ;;  %4927 = vxpose.xlu1.b32.cont [6/16] %v4495_v55, 128  ;;  %v10916_v14 = vpop.trf.xlu1  ;;  %vm13030_vm1 = vnez %v12374_v28 }
 0x2b0   : > { %3472 = vmatprep.mubr.bf16.mxu0 %v12194_v52 }
 0x2b1   : > { %v10926_v55 = vpop.trf.xlu0 }
 0x2b2   : > { %4895 = vxpose.xlu0.b32.cont [6/16] %v4479_v46, 128  ;;  %v4497_v46 = vld [vmem:[%s9616_s16 + $0x5b8] sm:$0xff] }
 0x2b3   : > { %6891 = vmatmul.mubr.msk.bf16.gmra.mrb[52].mxu1 %vm13021_vm8, %v10668_v56  ;;  %4928 = vxpose.xlu1.b32.cont [7/16] %v4496_v18, 128  ;;  %v10929_v61 = vpop.trf.xlu1  ;;  %v4483_v18 = vld [vmem:[%s9616_s16 + $0x548] sm:$0xff]  ;;  %vm13031_vm8 = vnez %v12378_v27 }
 0x2b4   : > { %3585 = vmatprep.mubr.bf16.mxu1 %v12194_v52 }
 0x2b6   : > { %4896 = vxpose.xlu0.b32.cont [7/16] %v4480_v39, 128  ;;  %v4498_v39 = vld [vmem:[%s9616_s16 + $0x5c0] sm:$0xff] }
 0x2b7   : > { %6859 = vmatmul.mubr.msk.bf16.gmra.mrb[56].mxu0 %vm13022_vm12, %v10689_v63  ;;  %4929 = vxpose.xlu1.b32.cont [8/16] %v4497_v46, 128  ;;  %vm13032_vm12 = vnez %v12383_v26  ;;  %v4504_v46 = vld [vmem:[%s9616_s16 + $0x5f0] sm:$0xff] }
 0x2b8   : > { %3482 = vmatprep.mubr.bf16.mxu0 %v12194_v52 }
 0x2ba   : > { %4897 = vxpose.xlu0.b32.cont [8/16] %v4481_v34, 128  ;;  %v10944_v34 = vpop.trf.xlu0 }
 0x2bb   : > { %6892 = vmatmul.mubr.msk.bf16.gmra.mrb[56].mxu1 %vm13023_vm9, %v10689_v63  ;;  %4930 = vxpose.xlu1.b32.cont [9/16] %v4498_v39, 128  ;;  %vm13033_vm9 = vnez %v12392_v22  ;;  %v4500_v22 = vld [vmem:[%s9616_s16 + $0x5d0] sm:$0xff] }
 0x2bc   : > { %3595 = vmatprep.mubr.bf16.mxu1 %v12194_v52 }
 0x2be   : > { %4898 = vxpose.xlu0.b32.cont [9/16] %v4482_v4, 128  ;;  %v10950_v4 = vpop.trf.xlu1  ;;  %v10970_v26 = vpop.trf.xlu0 }
 0x2bf   : > { %6860 = vmatmul.mubr.msk.bf16.gmra.mrb[60].mxu0 %vm13024_vm15, %v10708_v37  ;;  %vm13034_vm15 = vnez %v12396_v9  ;;  %4931 = vxpose.xlu1.b32.cont [10/16] %v4499_v30, 128  ;;  %v13052_v9 = vld [vmem:[#allocation76_spill] sm:$0xff] }
 0x2c0   : > { %3638 = vmatprep.mubr.bf16.mxu0 %v12194_v52 }
 0x2c2   : > { %4899 = vxpose.xlu0.b32.cont [10/16] %v4483_v18, 128  ;;  %v10976_v27 = vpop.trf.xlu1  ;;  %v4489_v18 = vld [vmem:[%s9616_s16 + $0x578] sm:$0xff] }
 0x2c3   : > { %6893 = vmatmul.mubr.msk.bf16.gmra.mrb[60].mxu1 %vm13025_vm13, %v10708_v37  ;;  %vm13035_vm13 = vmmov %vm13027_vm3  ;;  %4932 = vxpose.xlu1.b32.cont [11/16] %v4500_v22, 128 }
 0x2c4   : > { %3751 = vmatprep.mubr.bf16.mxu1 %v12194_v52 }
 0x2c6   : > { %4900 = vxpose.xlu0.b32.cont [11/16] %v4484_v23, 128  ;;  %v11003_v1 = vpop.trf.xlu1  ;;  %v4505_v23 = vld [vmem:[%s9616_s16 + $0x5f8] sm:$0xff] }
 0x2c7   : > { %6919 = vmatmul.mubr.msk.bf16.vlgmr.msra.gmra.mrb[64].mxu0 %vm13026_vm7, %v10481_v53  ;;  %vm13036_vm7 = vmmov %vm13027_vm3 }
 0x2c8   : > { %6963 = vmatpush1.bf16.msk.msra.mxu0 %vm13028_vm4, %v12200_v44  ;;  %3648 = vmatprep.mubr.bf16.mxu0 %v12194_v52  ;;  %vm13039_vm4 = vnez %v12416_v19  ;;  %v4486_v19 = vld [vmem:[%s9616_s16 + $0x560] sm:$0xff] }
 0x2c9   : > { %6965 = vmatprep.subr.msk.bf16.mxu0 %vm13030_vm1, %v12200_v44  ;;  %vm13045_vm1 = vnez %v12449_v24  ;;  %v4502_v24 = vld [vmem:[%s9616_s16 + $0x5e0] sm:$0xff] }
 0x2ca   : > { %4901 = vxpose.xlu0.b32.cont [12/16] %v4485_v15, 128  ;;  %v11030_v33 = vpop.trf.xlu1  ;;  %v4506_v15 = vld [vmem:[%s9616_s16 + $0x600] sm:$0xff] }
 0x2cb   : > { %6952 = vmatmul.mubr.msk.bf16.vlgmr.msra.gmra.mrb[64].mxu1 %vm13027_vm3, %v10481_v53  ;;  %vm13038_vm3 = vnez %v12410_v20  ;;  %v4501_v20 = vld [vmem:[%s9616_s16 + $0x5d8] sm:$0xff]  ;;  %13047 = vst [vmem:[#allocation67_spill] sm:$0xff] %v11030_v33  ;;  %v13116_v33 = vld [vmem:[#allocation87_spill] sm:$0xff] }
 0x2cc   : > { %6996 = vmatpush1.bf16.msk.msra.mxu1 %vm13029_vm10, %v12200_v44  ;;  %3761 = vmatprep.mubr.bf16.mxu1 %v12194_v52  ;;  %vm13041_vm10 = vnez %v12758_v62 }
 0x2cd   : > { %6998 = vmatprep.subr.msk.bf16.mxu1 %vm13031_vm8, %v12200_v44  ;;  %6967 = vmatpush1.bf16.msk.msra.mxu0 %vm13032_vm12, %v12200_v44  ;;  %vm13046_vm8 = vnez %v12530_v42  ;;  %vm13048_vm12 = vnez %v12464_v29  ;;  %v13056_v29 = vld [vmem:[#allocation81_spill] sm:$0xff]  ;;  %v4503_v42 = vld [vmem:[%s9616_s16 + $0x5e8] sm:$0xff] }
 0x2ce   : > { %6969 = vmatprep.subr.msk.bf16.mxu0 %vm13033_vm9, %v12200_v44  ;;  %4933 = vxpose.xlu1.b32.cont [12/16] %v4501_v20, 128  ;;  %vm13050_vm9 = vcmask 1041408   ;;  %v11054_v31 = vpop.trf.xlu1 }
 0x2cf   : > { %6920 = vmatmul.mubr.msk.bf16.gmra.mrb[68].mxu0 %vm13035_vm13, %v10512_v10  ;;  %vm13053_vm13 = vmmov %vm13050_vm9  ;;  %4902 = vxpose.xlu0.b32.cont [13/16] %v4486_v19, 128  ;;  %13057 = vst [vmem:[#allocation65_spill] sm:$0xff] %v11054_v31  ;;  %v4507_v19 = vld [vmem:[%s9616_s16 + $0x608] sm:$0xff]  ;;  %v13104_v31 = vld [vmem:[#allocation109_spill] sm:$0xff] }
 0x2d0   : > { %7000 = vmatpush1.bf16.msk.msra.mxu1 %vm12741_vm6, %v12200_v44  ;;  %3658 = vmatprep.mubr.bf16.mxu0 %v12194_v52  ;;  %vm13037_vm6 = vnez %v12400_v21  ;;  %v10995_v21 = vpop.trf.xlu0 }
 0x2d1   : > { %7002 = vmatprep.subr.msk.bf16.mxu1 %vm13034_vm15, %v12200_v44  ;;  %6971 = vmatpush1.bf16.msk.msra.mxu0 %vm13037_vm6, %v12200_v44  ;;  %vm13051_vm15 = vmmov %vm13036_vm7 }
 0x2d2   : > { %6973 = vmatprep.subr.msk.bf16.mxu0 %vm13038_vm3, %v12200_v44  ;;  %4934 = vxpose.xlu1.b32.cont [13/16] %v4502_v24, 128 }
 0x2d3   : > { %6953 = vmatmul.mubr.msk.bf16.gmra.mrb[68].mxu1 %vm13036_vm7, %v10512_v10  ;;  %4903 = vxpose.xlu0.b32.cont [14/16] %v4487_v57, 128  ;;  %v4508_v57 = vld [vmem:[%s9616_s16 + $0x610] sm:$0xff] }
 0x2d4   : > { %3771 = vmatprep.mubr.bf16.mxu1 %v12194_v52  ;;  %7004 = vmatpush1.bf16.msk.msra.mxu1 %vm12750_vm11, %v12200_v44  ;;  %vm13040_vm11 = vmmov %vm13036_vm7  ;;  %v11028_v28 = vpop.trf.xlu0 }
 0x2d5   : > { %7006 = vmatprep.subr.msk.bf16.mxu1 %vm13039_vm4, %v12200_v44  ;;  %6975 = vmatpush1.bf16.msk.msra.mxu0 %vm12754_vm14, %v12200_v44  ;;  %vm13042_vm14 = vmmov %vm13036_vm7 }
 0x2d6   : > { %6977 = vmatprep.subr.msk.bf16.mxu0 %vm12521_vm5, %v12200_v44  ;;  %vm13044_vm5 = vnez %v12445_v17  ;;  %v13049_v17 = vld [vmem:[#allocation73_spill] sm:$0xff]  ;;  %4935 = vxpose.xlu1.b32.cont [14/16] %v4503_v42, 128 }
 0x2d7   : > { %6921 = vmatmul.mubr.msk.bf16.gmra.mrb[72].mxu0 %vm13040_vm11, %v10558_v5  ;;  %4904 = vxpose.xlu0.b32.cont [15/16] %v4488_v35, 128  ;;  %v4524_v35 = vld [vmem:[%s9616_s16 + $0x690] sm:$0xff] }
 0x2d8   : > { %7008 = vmatpush1.bf16.msk.msra.mxu1 %vm12519_vm0, %v12200_v44  ;;  %3668 = vmatprep.mubr.bf16.mxu0 %v12194_v52  ;;  %vm13043_vm0 = vnez %v12441_v25  ;;  %v11051_v25 = vpop.trf.xlu0 }
 0x2d9   : > { %7010 = vmatprep.subr.msk.bf16.mxu1 %vm13041_vm10, %v12200_v44  ;;  %6979 = vmatpush1.bf16.msk.msra.mxu0 %vm13043_vm0, %v12200_v44  ;;  %13055 = vst [vmem:[#allocation68_spill] sm:$0xff] %v11051_v25  ;;  %v13105_v25 = vld [vmem:[#allocation110_spill] sm:$0xff] }
 0x2da   : > { %6981 = vmatprep.subr.msk.bf16.mxu0 %vm13045_vm1, %v12200_v44  ;;  %4936 = vxpose.xlu1.b32.cont [15/16] %v4504_v46, 128 }
 0x2db   : > { %6954 = vmatmul.mubr.msk.bf16.gmra.mrb[72].mxu1 %vm13042_vm14, %v10558_v5  ;;  %v11067_v39 = vpop.trf.xlu1  ;;  %4905 = vxpose.xlu0.b32.end [16/16] %v4489_v18, 128  ;;  %v4509_v18 = vld [vmem:[%s9616_s16 + $0x618] sm:$0xff] }
 0x2dc   : > { %3781 = vmatprep.mubr.bf16.mxu1 %v12194_v52  ;;  %7012 = vmatpush1.bf16.msk.msra.mxu1 %vm13044_vm5, %v12200_v44  ;;  %13061 = vst [vmem:[#allocation77_spill] sm:$0xff] %v11067_v39 }
 0x2dd   : > { %7014 = vmatprep.subr.msk.bf16.mxu1 %vm13046_vm8, %v12200_v44  ;;  %6983 = vmatpush1.bf16.msk.msra.mxu0 %vm12764_vm2, %v12200_v44  ;;  %vm13058_vm2 = vmmov %vm13036_vm7 }
 0x2de   : > { %6984 = vmatprep.subr.msk.bf16.mxu0 %vm13050_vm9, %v13049_v17  ;;  %v11061_v62 = vpop.trf.xlu0  ;;  %vm13060_vm6 = vmmov %vm13058_vm2  ;;  %4937 = vxpose.xlu1.b32.end [16/16] %v4505_v23, 128  ;;  %v4522_v17 = vld [vmem:[%s9616_s16 + $0x680] sm:$0xff] }
 0x2df   : > { %6922 = vmatmul.mubr.msk.bf16.gmra.mrb[76].mxu0 %vm13051_vm15, %v10603_v32  ;;  %13059 = vst [vmem:[#allocation66_spill] sm:$0xff] %v11061_v62  ;;  %v11074_v22 = vpop.trf.xlu1  ;;  %vm13064_vm3 = vmmov %vm13058_vm2  ;;  %4954 = vxpose.xlu0.b32.start [1/16] %v4506_v15, 128  ;;  %v4525_v15 = vld [vmem:[%s9616_s16 + $0x698] sm:$0xff] }
 0x2e0   : > { %7016 = vmatpush1.bf16.msk.msra.mxu1 %vm13048_vm12, %v12200_v44  ;;  %3678 = vmatprep.mubr.bf16.mxu0 %v12194_v52  ;;  %v13054_v44 = vld [vmem:[#allocation80_spill] sm:$0xff]  ;;  %13063 = vst [vmem:[#allocation79_spill] sm:$0xff] %v11074_v22  ;;  %vm13066_vm4 = vmmov %vm13058_vm2  ;;  %v13101_v22 = vld [vmem:[#allocation70_spill] sm:$0xff] }
 0x2e1   : > { %7017 = vmatprep.subr.msk.bf16.mxu1 %vm13053_vm13, %v13052_v9  ;;  %3845 = vmatpush1.bf16.msra.mxu0 %v13054_v44  ;;  %v4523_v44 = vld [vmem:[%s9616_s16 + $0x688] sm:$0xff]  ;;  %vm13070_vm11 = vmmov %vm13058_vm2 }
 0x2e2   : > { %v11071_v30 = vpop.trf.xlu0  ;;  %4986 = vxpose.xlu1.b32.start [1/16] %v4522_v17, 128  ;;  %vm13072_vm10 = vmmov %vm13058_vm2 }
 0x2e3   : > { %6955 = vmatmul.mubr.msk.bf16.gmra.mrb[76].mxu1 %vm13036_vm7, %v10603_v32  ;;  %13062 = vst [vmem:[#allocation78_spill] sm:$0xff] %v11071_v30  ;;  %v11085_v9 = vpop.trf.xlu1  ;;  %4955 = vxpose.xlu0.b32.cont [2/16] %v4507_v19, 128  ;;  %vm13076_vm14 = vmmov %vm13058_vm2  ;;  %v4510_v19 = vld [vmem:[%s9616_s16 + $0x620] sm:$0xff]  ;;  %v13102_v30 = vld [vmem:[#allocation83_spill] sm:$0xff] }
 0x2e4   : > { %3791 = vmatprep.mubr.bf16.mxu1 %v12194_v52  ;;  %3958 = vmatpush1.bf16.msra.mxu1 %v13056_v29  ;;  %13067 = vst [vmem:[#allocation72_spill] sm:$0xff] %v11085_v9  ;;  %vm13078_vm0 = vmmov %vm13058_vm2  ;;  %v13100_v9 = vld [vmem:[#allocation108_spill] sm:$0xff] }
 0x2e5   : > { %vm13082_vm5 = vmmov %vm13078_vm0 }
 0x2e6   : > { %v11079_v20 = vpop.trf.xlu0  ;;  %4987 = vxpose.xlu1.b32.cont [2/16] %v4523_v44, 128  ;;  %vm13084_vm1 = vmmov %vm13078_vm0 }
 0x2e7   : > { %6923 = vmatmul.mubr.msk.bf16.gmra.mrb[80].mxu0 %vm13058_vm2, %v10642_v3  ;;  %13065 = vst [vmem:[#allocation71_spill] sm:$0xff] %v11079_v20  ;;  %v11092_v29 = vpop.trf.xlu1  ;;  %4956 = vxpose.xlu0.b32.cont [3/16] %v4508_v57, 128  ;;  %v4526_v57 = vld [vmem:[%s9616_s16 + $0x6a0] sm:$0xff]  ;;  %vm13088_vm8 = vmmov %vm13078_vm0 }
 0x2e8   : > { %3688 = vmatprep.mubr.bf16.mxu0 %v12194_v52  ;;  %13069 = vst [vmem:[#allocation76_spill] sm:$0xff] %v11092_v29  ;;  %vm13090_vm12 = vmmov %vm13078_vm0 }
 0x2e9   : > { %vm13094_vm9 = vmmov %vm13078_vm0 }
 0x2ea   : > { %v11089_v24 = vpop.trf.xlu0  ;;  %4988 = vxpose.xlu1.b32.cont [3/16] %v4524_v35, 128  ;;  %vm13095_vm15 = vmmov %vm13078_vm0 }
 0x2eb   : > { %6956 = vmatmul.mubr.msk.bf16.gmra.mrb[80].mxu1 %vm13060_vm6, %v10642_v3  ;;  %13068 = vst [vmem:[#allocation73_spill] sm:$0xff] %v11089_v24  ;;  %v11103_v46 = vpop.trf.xlu1  ;;  %4957 = vxpose.xlu0.b32.cont [4/16] %v4509_v18, 128  ;;  %v4511_v18 = vld [vmem:[%s9616_s16 + $0x628] sm:$0xff]  ;;  %vm13106_vm13 = vmmov %vm13078_vm0 }
 0x2ec   : > { %3801 = vmatprep.mubr.bf16.mxu1 %v12194_v52  ;;  %13073 = vst [vmem:[#allocation81_spill] sm:$0xff] %v11103_v46  ;;  %v13098_v46 = vld [vmem:[#allocation69_spill] sm:$0xff]  ;;  %vm13107_vm7 = vmmov %vm13078_vm0 }
 0x2ed   : > { %vm13118_vm2 = vmmov %vm13078_vm0 }
 0x2ee   : > { %v11097_v42 = vpop.trf.xlu0  ;;  %4989 = vxpose.xlu1.b32.cont [4/16] %v4525_v15, 128  ;;  %vm13119_vm6 = vmmov %vm13078_vm0 }
 0x2ef   : > { %6924 = vmatmul.mubr.msk.bf16.gmra.mrb[84].mxu0 %vm13064_vm3, %v10668_v56  ;;  %13071 = vst [vmem:[#allocation80_spill] sm:$0xff] %v11097_v42  ;;  %v11110_v17 = vpop.trf.xlu1  ;;  %4958 = vxpose.xlu0.b32.cont [5/16] %v4510_v19, 128  ;;  %v4528_v19 = vld [vmem:[%s9616_s16 + $0x6b0] sm:$0xff]  ;;  %v13099_v42 = vld [vmem:[#allocation82_spill] sm:$0xff]  ;;  %vm13130_vm3 = vmmov %vm13078_vm0 }
 0x2f0   : > { %3698 = vmatprep.mubr.bf16.mxu0 %v12194_v52  ;;  %13075 = vst [vmem:[#allocation117_spill] sm:$0xff] %v11110_v17  ;;  %v4527_v17 = vld [vmem:[%s9616_s16 + $0x6a8] sm:$0xff] }
 0x2f2   : > { %v11107_v23 = vpop.trf.xlu0  ;;  %4990 = vxpose.xlu1.b32.cont [5/16] %v4526_v57, 128 }
 0x2f3   : > { %6957 = vmatmul.mubr.msk.bf16.gmra.mrb[84].mxu1 %vm13066_vm4, %v10668_v56  ;;  %13074 = vst [vmem:[#allocation116_spill] sm:$0xff] %v11107_v23  ;;  %v11121_v35 = vpop.trf.xlu1  ;;  %4959 = vxpose.xlu0.b32.cont [6/16] %v4511_v18, 128  ;;  %v4513_v18 = vld [vmem:[%s9616_s16 + $0x638] sm:$0xff]  ;;  %vm13131_vm4 = vmmov %vm13078_vm0 }
 0x2f4   : > { %3811 = vmatprep.mubr.bf16.mxu1 %v12194_v52  ;;  %13079 = vst [vmem:[#allocation119_spill] sm:$0xff] %v11121_v35  ;;  %v4533_v23 = vld [vmem:[%s9616_s16 + $0x6d8] sm:$0xff] }
 0x2f6   : > { %v11115_v44 = vpop.trf.xlu0  ;;  %4991 = vxpose.xlu1.b32.cont [6/16] %v4527_v17, 128 }
 0x2f7   : > { %6925 = vmatmul.mubr.msk.bf16.gmra.mrb[88].mxu0 %vm13070_vm11, %v10689_v63  ;;  %13077 = vst [vmem:[#allocation118_spill] sm:$0xff] %v11115_v44  ;;  %v11128_v44 = vpop.trf.xlu1  ;;  %vm13143_vm11 = vmmov %vm13078_vm0 }
 0x2f8   : > { %3708 = vmatprep.mubr.bf16.mxu0 %v12194_v52  ;;  %13081 = vst [vmem:[#allocation121_spill] sm:$0xff] %v11128_v44  ;;  %v4529_v44 = vld [vmem:[%s9616_s16 + $0x6b8] sm:$0xff] }
 0x2fa   : > { %v11125_v15 = vpop.trf.xlu0  ;;  %4992 = vxpose.xlu1.b32.cont [7/16] %v4528_v19, 128 }
 0x2fb   : > { %6958 = vmatmul.mubr.msk.bf16.gmra.mrb[88].mxu1 %vm13072_vm10, %v10689_v63  ;;  %13080 = vst [vmem:[#allocation120_spill] sm:$0xff] %v11125_v15  ;;  %v11139_v57 = vpop.trf.xlu1  ;;  %vm13144_vm10 = vmmov %vm13078_vm0 }
 0x2fc   : > { %3821 = vmatprep.mubr.bf16.mxu1 %v12194_v52  ;;  %13085 = vst [vmem:[#allocation123_spill] sm:$0xff] %v11139_v57 }
 0x2fe   : > { %v11133_v35 = vpop.trf.xlu0  ;;  %4993 = vxpose.xlu1.b32.cont [8/16] %v4529_v44, 128  ;;  %v4531_v44 = vld [vmem:[%s9616_s16 + $0x6c8] sm:$0xff] }
 0x2ff   : > { %6926 = vmatmul.mubr.msk.bf16.gmra.mrb[92].mxu0 %vm13076_vm14, %v10708_v37  ;;  %13083 = vst [vmem:[#allocation122_spill] sm:$0xff] %v11133_v35  ;;  %v11146_v35 = vpop.trf.xlu1  ;;  %vm13156_vm14 = vmmov %vm13078_vm0 }
 0x300   : > { %3864 = vmatprep.mubr.bf16.mxu0 %v12194_v52  ;;  %13087 = vst [vmem:[#allocation125_spill] sm:$0xff] %v11146_v35 }
 0x302   : > { %v11143_v17 = vpop.trf.xlu0 }
 0x303   : > { %6959 = vmatmul.mubr.msk.bf16.gmra.mrb[92].mxu1 %vm13078_vm0, %v10708_v37  ;;  %v4512_v37 = vld [vmem:[%s9616_s16 + $0x630] sm:$0xff]  ;;  %13086 = vst [vmem:[#allocation124_spill] sm:$0xff] %v11143_v17  ;;  %v11157_v19 = vpop.trf.xlu1 }
 0x304   : > { %3977 = vmatprep.mubr.bf16.mxu1 %v12194_v52  ;;  %4960 = vxpose.xlu0.b32.cont [7/16] %v4512_v37, 128  ;;  %v4530_v37 = vld [vmem:[%s9616_s16 + $0x6c0] sm:$0xff]  ;;  %13091 = vst [vmem:[#allocation127_spill] sm:$0xff] %v11157_v19 }
 0x305   : > { %4994 = vxpose.xlu1.b32.cont [9/16] %v4530_v37, 128 }
 0x306   : > { %v11151_v57 = vpop.trf.xlu0 }
 0x307   : > { %6985 = vmatmul.mubr.msk.bf16.vlgmr.msra.gmra.mrb[96].mxu0 %vm13082_vm5, %v10481_v53  ;;  %13089 = vst [vmem:[#allocation126_spill] sm:$0xff] %v11151_v57  ;;  %v11164_v17 = vpop.trf.xlu1 }
 0x308   : > { %3874 = vmatprep.mubr.bf16.mxu0 %v12194_v52  ;;  %4961 = vxpose.xlu0.b32.cont [8/16] %v4513_v18, 128  ;;  %v4515_v18 = vld [vmem:[%s9616_s16 + $0x648] sm:$0xff]  ;;  %13093 = vst [vmem:[#allocation129_spill] sm:$0xff] %v11164_v17 }
 0x309   : > { %4995 = vxpose.xlu1.b32.cont [10/16] %v4531_v44, 128  ;;  %v4517_v44 = vld [vmem:[%s9616_s16 + $0x658] sm:$0xff] }
 0x30a   : > { %v11161_v35 = vpop.trf.xlu0 }
 0x30b   : > { %7018 = vmatmul.mubr.msk.bf16.vlgmr.msra.gmra.mrb[96].mxu1 %vm13084_vm1, %v10481_v53  ;;  %v4514_v53 = vld [vmem:[%s9616_s16 + $0x640] sm:$0xff]  ;;  %13092 = vst [vmem:[#allocation128_spill] sm:$0xff] %v11161_v35  ;;  %v11176_v17 = vpop.trf.xlu1 }
 0x30c   : > { %3987 = vmatprep.mubr.bf16.mxu1 %v12194_v52  ;;  %4962 = vxpose.xlu0.b32.cont [9/16] %v4514_v53, 128  ;;  %v4532_v53 = vld [vmem:[%s9616_s16 + $0x6d0] sm:$0xff]  ;;  %13097 = vst [vmem:[#allocation131_spill] sm:$0xff] %v11176_v17 }
 0x30d   : > { %4996 = vxpose.xlu1.b32.cont [11/16] %v4532_v53, 128 }
 0x30e   : > { %v11173_v37 = vpop.trf.xlu0 }
 0x30f   : > { %6986 = vmatmul.mubr.msk.bf16.gmra.mrb[100].mxu0 %vm13088_vm8, %v10512_v10  ;;  %13096 = vst [vmem:[#allocation130_spill] sm:$0xff] %v11173_v37 }
 0x310   : > { %3884 = vmatprep.mubr.bf16.mxu0 %v12194_v52  ;;  %4963 = vxpose.xlu0.b32.cont [10/16] %v4515_v18, 128 }
 0x311   : > { %4997 = vxpose.xlu1.b32.cont [12/16] %v4533_v23, 128 }
 0x312   : > { %v11186_v62 = vpop.trf.xlu0 }
 0x313   : > { %7019 = vmatmul.mubr.msk.bf16.gmra.mrb[100].mxu1 %vm13090_vm12, %v10512_v10  ;;  %v4516_v10 = vld [vmem:[%s9616_s16 + $0x650] sm:$0xff]  ;;  %13103 = vst [vmem:[#allocation69_spill] sm:$0xff] %v11186_v62 }
 0x314   : > { %3997 = vmatprep.mubr.bf16.mxu1 %v12194_v52  ;;  %4964 = vxpose.xlu0.b32.cont [11/16] %v4516_v10, 128 }
 0x317   : > { %6987 = vmatmul.mubr.msk.bf16.gmra.mrb[104].mxu0 %vm13094_vm9, %v10558_v5 }
 0x318   : > { %3894 = vmatprep.mubr.bf16.mxu0 %v12194_v52  ;;  %4965 = vxpose.xlu0.b32.cont [12/16] %v4517_v44, 128 }
 0x31a   : > { %v3188_v35 = vpop.f32.mrb[0].mxu0 }
 0x31b   : > { %7020 = vmatmul.mubr.msk.bf16.gmra.mrb[104].mxu1 %vm13095_vm15, %v10558_v5  ;;  %v3190_v19 = vpop.f32.mrb[1].mxu0  ;;  %v5082_v5 = vmul.f32 %v13098_v46, %v3188_v35 }
 0x31c   : > { %4007 = vmatprep.mubr.bf16.mxu1 %v12194_v52  ;;  %v3192_v15 = vpop.f32.mrb[2].mxu0  ;;  %v5083_v10 = vmul.f32 %v13101_v22, %v3190_v19  ;;  %v13112_v19 = vld [vmem:[#allocation85_spill] sm:$0xff] }
 0x31d   : > { %v5098_v29 = vmul.f32 %v13099_v42, %v3192_v15  ;;  %v3194_v37 = vpop.f32.mrb[3].mxu0 }
 0x31e   : > { %v3301_v18 = vpop.f32.mrb[0].mxu1  ;;  %v5099_v53 = vmul.f32 %v13102_v30, %v3194_v37 }
 0x31f   : > { %v3303_v57 = vpop.f32.mrb[1].mxu1  ;;  %v5084_v20 = vmul.f32 %v13100_v9, %v3301_v18  ;;  %v5338_v35 = vadd.f32 %v5098_v29, %v5082_v5  ;;  %6988 = vmatmul.mubr.msk.bf16.gmra.mrb[108].mxu0 %vm13106_vm13, %v10603_v32  ;;  %v4518_v9 = vld [vmem:[%s9616_s16 + $0x660] sm:$0xff]  ;;  %v4535_v5 = vld [vmem:[%s9616_s16 + $0x6e8] sm:$0xff] }
 0x320   : > { %v3305_v24 = vpop.f32.mrb[2].mxu1  ;;  %v5085_v46 = vmul.f32 %v13104_v31, %v3303_v57  ;;  %v5359_v15 = vadd.f32 %v5099_v53, %v5083_v10  ;;  %3904 = vmatprep.mubr.bf16.mxu0 %v12194_v52  ;;  %v11198_v31 = vpop.trf.xlu1  ;;  %4966 = vxpose.xlu0.b32.cont [13/16] %v4518_v9, 128  ;;  %v4519_v57 = vld [vmem:[%s9616_s16 + $0x668] sm:$0xff]  ;;  %v13113_v53 = vld [vmem:[#allocation112_spill] sm:$0xff] }
 0x321   : > { %v5100_v17 = vmul.f32 %v10256_v51, %v3305_v24  ;;  %v3307_v39 = vpop.f32.mrb[3].mxu1  ;;  %v4534_v51 = vld [vmem:[%s9616_s16 + $0x6e0] sm:$0xff]  ;;  %13108 = vst [vmem:[#allocation82_spill] sm:$0xff] %v11198_v31  ;;  %v13110_v24 = vld [vmem:[#allocation84_spill] sm:$0xff] }
 0x322   : > { %v5101_v42 = vmul.f32 %v13105_v25, %v3307_v39  ;;  %v3198_v25 = vpop.f32.mrb[4].mxu0  ;;  %v11200_v39 = vpop.trf.xlu0  ;;  %4998 = vxpose.xlu1.b32.cont [13/16] %v4534_v51, 128  ;;  %v13115_v51 = vld [vmem:[#allocation113_spill] sm:$0xff] }
 0x323   : > { %v5380_v22 = vadd.f32 %v5100_v17, %v5084_v20  ;;  %7021 = vmatmul.mubr.msk.bf16.gmra.mrb[108].mxu1 %vm13107_vm7, %v10603_v32  ;;  %13109 = vst [vmem:[#allocation108_spill] sm:$0xff] %v11200_v39  ;;  %v5114_v29 = vmul.f32 %v13110_v24, %v3198_v25  ;;  %v3200_v23 = vpop.f32.mrb[5].mxu0  ;;  %v13111_v32 = vld [vmem:[#allocation111_spill] sm:$0xff] }
 0x324   : > { %v5401_v30 = vadd.f32 %v5101_v42, %v5085_v46  ;;  %4017 = vmatprep.mubr.bf16.mxu1 %v12194_v52  ;;  %v5115_v37 = vmul.f32 %v13112_v19, %v3200_v23  ;;  %v3202_v44 = vpop.f32.mrb[6].mxu0  ;;  %v13114_v42 = vld [vmem:[#allocation86_spill] sm:$0xff]  ;;  %4967 = vxpose.xlu0.b32.cont [14/16] %v4519_v57, 128 }
 0x325   : > { %v5339_v10 = vadd.f32 %v5338_v35, %v5114_v29  ;;  %v5130_v9 = vmul.f32 %v13114_v42, %v3202_v44  ;;  %v3204_v31 = vpop.f32.mrb[7].mxu0  ;;  %v4520_v29 = vld [vmem:[%s9616_s16 + $0x670] sm:$0xff]  ;;  %v4537_v42 = vld [vmem:[%s9616_s16 + $0x6f8] sm:$0xff] }
 0x326   : > { %v3311_v20 = vpop.f32.mrb[4].mxu1  ;;  %v5360_v24 = vadd.f32 %v5359_v15, %v5115_v37  ;;  %4999 = vxpose.xlu1.b32.cont [14/16] %v4535_v5, 128  ;;  %v4521_v37 = vld [vmem:[%s9616_s16 + $0x678] sm:$0xff] }
 0x327   : > { %v5116_v17 = vmul.f32 %v13111_v32, %v3311_v20  ;;  %v3313_v18 = vpop.f32.mrb[5].mxu1  ;;  %v5131_v20 = vmul.f32 %v13116_v33, %v3204_v31  ;;  %v5340_v19 = vadd.f32 %v5339_v10, %v5130_v9  ;;  %6989 = vmatmul.mubr.msk.bf16.gmra.mrb[112].mxu0 %vm13118_vm2, %v10642_v3  ;;  %v4536_v33 = vld [vmem:[%s9616_s16 + $0x6f0] sm:$0xff]  ;;  %v11222_v31 = vpop.trf.xlu0  ;;  %v13124_v5 = vld [vmem:[#allocation89_spill] sm:$0xff] }
 0x328   : > { %v5117_v46 = vmul.f32 %v13113_v53, %v3313_v18  ;;  %v3315_v39 = vpop.f32.mrb[6].mxu1  ;;  %3914 = vmatprep.mubr.bf16.mxu0 %v12194_v52  ;;  %4968 = vxpose.xlu0.b32.cont [15/16] %v4520_v29, 128  ;;  %13121 = vst [vmem:[#allocation83_spill] sm:$0xff] %v11222_v31  ;;  %v13129_v31 = vld [vmem:[#allocation11_spill] sm:$0xff] }
 0x329   : > { %v5381_v25 = vadd.f32 %v5380_v22, %v5116_v17  ;;  %v5132_v62 = vmul.f32 %v13115_v51, %v3315_v39  ;;  %v3317_v32 = vpop.f32.mrb[7].mxu1  ;;  %v5361_v22 = vadd.f32 %v5360_v24, %v5131_v20  ;;  %v13122_v39 = vld [vmem:[#allocation88_spill] sm:$0xff]  ;;  %v13126_v51 = vld [vmem:[#allocation90_spill] sm:$0xff] }
 0x32a   : > { %v5402_v23 = vadd.f32 %v5401_v30, %v5117_v46  ;;  %v5133_v35 = vmul.f32 %v13117_v13, %v3317_v32  ;;  %v11220_v30 = vpop.trf.xlu1  ;;  %v3208_v13 = vpop.f32.mrb[8].mxu0  ;;  %5000 = vxpose.xlu1.b32.cont [15/16] %v4536_v33, 128 }
 0x32b   : > { %v5382_v18 = vadd.f32 %v5381_v25, %v5132_v62  ;;  %7022 = vmatmul.mubr.msk.bf16.gmra.mrb[112].mxu1 %vm13119_vm6, %v10642_v3  ;;  %13120 = vst [vmem:[#allocation70_spill] sm:$0xff] %v11220_v30  ;;  %v5146_v57 = vmul.f32 %v13122_v39, %v3208_v13  ;;  %v3210_v17 = vpop.f32.mrb[9].mxu0  ;;  %v13123_v3 = vld [vmem:[#allocation115_spill] sm:$0xff]  ;;  %v13125_v25 = vld [vmem:[#allocation9_spill] sm:$0xff]  ;;  %v13127_v13 = vld [vmem:[#allocation10_spill] sm:$0xff] }
 0x32c   : > { %v5403_v15 = vadd.f32 %v5402_v23, %v5133_v35  ;;  %4027 = vmatprep.mubr.bf16.mxu1 %v12194_v52  ;;  %v5147_v10 = vmul.f32 %v13124_v5, %v3210_v17  ;;  %v3212_v46 = vpop.f32.mrb[10].mxu0  ;;  %v13128_v39 = vld [vmem:[#allocation91_spill] sm:$0xff]  ;;  %4969 = vxpose.xlu0.b32.end [16/16] %v4521_v37, 128 }
 0x32d   : > { %v5341_v9 = vadd.f32 %v5340_v19, %v5146_v57  ;;  %v5162_v20 = vmul.f32 %v13126_v51, %v3212_v46  ;;  %v3214_v23 = vpop.f32.mrb[11].mxu0  ;;  %v4538_v57 = vld [vmem:[%s9616_s16 + $0x700] sm:$0xff]  ;;  %v13136_v51 = vld [vmem:[#allocation93_spill] sm:$0xff] }
 0x32e   : > { %v3321_v62 = vpop.f32.mrb[8].mxu1  ;;  %v5362_v29 = vadd.f32 %v5361_v22, %v5147_v10  ;;  %5001 = vxpose.xlu1.b32.end [16/16] %v4537_v42, 128  ;;  %v11240_v22 = vpop.trf.xlu1  ;;  %v13134_v10 = vld [vmem:[#allocation92_spill] sm:$0xff] }
 0x32f   : > { %v5148_v44 = vmul.f32 %v13123_v3, %v3321_v62  ;;  %v3323_v53 = vpop.f32.mrb[9].mxu1  ;;  %v5163_v62 = vmul.f32 %v13128_v39, %v3214_v23  ;;  %v5342_v5 = vadd.f32 %v5341_v9, %v5162_v20  ;;  %6990 = vmatmul.mubr.msk.bf16.gmra.mrb[116].mxu0 %vm13130_vm3, %v10668_v56  ;;  %13132 = vst [vmem:[#allocation109_spill] sm:$0xff] %v11240_v22  ;;  %v13138_v39 = vld [vmem:[#allocation94_spill] sm:$0xff]  ;;  %v13153_v22 = vld [vmem:[#allocation99_spill] sm:$0xff] }
 0x330   : > { %v5149_v24 = vmul.f32 %v13125_v25, %v3323_v53  ;;  %v3325_v32 = vpop.f32.mrb[10].mxu1  ;;  %3924 = vmatprep.mubr.bf16.mxu0 %v12194_v52  ;;  %5018 = vxpose.xlu0.b32.start [1/16] %v4538_v57, 128  ;;  %v4539_v25 = vld [vmem:[%s9616_s16 + $0x708] sm:$0xff] }
 0x331   : > { %v5383_v35 = vadd.f32 %v5382_v18, %v5148_v44  ;;  %v5164_v33 = vmul.f32 %v13127_v13, %v3325_v32  ;;  %v3327_v3 = vpop.f32.mrb[11].mxu1  ;;  %v5363_v18 = vadd.f32 %v5362_v29, %v5163_v62  ;;  %v11244_v44 = vpop.trf.xlu0  ;;  %v13137_v13 = vld [vmem:[#allocation13_spill] sm:$0xff] }
 0x332   : > { %v5404_v17 = vadd.f32 %v5403_v15, %v5149_v24  ;;  %v5165_v19 = vmul.f32 %v13129_v31, %v3327_v3  ;;  %v4554_v15 = vld [vmem:[%s9616_s16 + $0x780] sm:$0xff]  ;;  %v3218_v31 = vpop.f32.mrb[12].mxu0  ;;  %13133 = vst [vmem:[#allocation110_spill] sm:$0xff] %v11244_v44 }
 0x333   : > { %v5384_v53 = vadd.f32 %v5383_v35, %v5164_v33  ;;  %7023 = vmatmul.mubr.msk.bf16.gmra.mrb[116].mxu1 %vm13131_vm4, %v10668_v56  ;;  %v5178_v46 = vmul.f32 %v13134_v10, %v3218_v31  ;;  %v3220_v9 = vpop.f32.mrb[13].mxu0  ;;  %5050 = vxpose.xlu1.b32.start [1/16] %v4554_v15, 128  ;;  %v13135_v56 = vld [vmem:[#allocation12_spill] sm:$0xff]  ;;  %v4555_v35 = vld [vmem:[%s9616_s16 + $0x788] sm:$0xff]  ;;  %v13139_v31 = vld [vmem:[#allocation14_spill] sm:$0xff] }
 0x334   : > { %v5405_v37 = vadd.f32 %v5404_v17, %v5165_v19  ;;  %4037 = vmatprep.mubr.bf16.mxu1 %v12194_v52  ;;  %v5179_v20 = vmul.f32 %v13136_v51, %v3220_v9  ;;  %v3222_v23 = vpop.f32.mrb[14].mxu0  ;;  %v13140_v10 = vld [vmem:[#allocation95_spill] sm:$0xff]  ;;  %v11255_v9 = vpop.trf.xlu1  ;;  %5019 = vxpose.xlu0.b32.cont [2/16] %v4539_v25, 128 }
 0x335   : > { %v5343_v29 = vadd.f32 %v5342_v5, %v5178_v46  ;;  %v5194_v62 = vmul.f32 %v13138_v39, %v3222_v23  ;;  %v3224_v17 = vpop.f32.mrb[15].mxu0  ;;  %13141 = vst [vmem:[#allocation84_spill] sm:$0xff] %v11255_v9  ;;  %v13142_v46 = vld [vmem:[#allocation15_spill] sm:$0xff]  ;;  %v4540_v23 = vld [vmem:[%s9616_s16 + $0x710] sm:$0xff] }
 0x336   : > { %v3331_v42 = vpop.f32.mrb[12].mxu1  ;;  %v5364_v57 = vadd.f32 %v5363_v18, %v5179_v20 }
 0x337   : > { %v5180_v24 = vmul.f32 %v13135_v56, %v3331_v42  ;;  %v3333_v32 = vpop.f32.mrb[13].mxu1  ;;  %v5195_v42 = vmul.f32 %v13140_v10, %v3224_v17  ;;  %v5344_v5 = vadd.f32 %v5343_v29, %v5194_v62  ;;  %6991 = vmatmul.mubr.msk.bf16.gmra.mrb[120].mxu0 %vm13143_vm11, %v10689_v63  ;;  %5051 = vxpose.xlu1.b32.cont [2/16] %v4555_v35, 128  ;;  %v13147_v35 = vld [vmem:[#allocation96_spill] sm:$0xff]  ;;  %v4541_v62 = vld [vmem:[%s9616_s16 + $0x718] sm:$0xff] }
 0x338   : > { %v5181_v33 = vmul.f32 %v13137_v13, %v3333_v32  ;;  %v3335_v3 = vpop.f32.mrb[14].mxu1  ;;  %3934 = vmatprep.mubr.bf16.mxu0 %v12194_v52  ;;  %v11268_v29 = vpop.trf.xlu1  ;;  %5020 = vxpose.xlu0.b32.cont [3/16] %v4540_v23, 128  ;;  %v13149_v17 = vld [vmem:[#allocation97_spill] sm:$0xff] }
 0x339   : > { %v5385_v19 = vadd.f32 %v5384_v53, %v5180_v24  ;;  %v5196_v15 = vmul.f32 %v13139_v31, %v3335_v3  ;;  %v3337_v56 = vpop.f32.mrb[15].mxu1  ;;  %v5365_v18 = vadd.f32 %v5364_v57, %v5195_v42  ;;  %v11264_v24 = vpop.trf.xlu0  ;;  %13146 = vst [vmem:[#allocation85_spill] sm:$0xff] %v11268_v29  ;;  %v13150_v42 = vld [vmem:[#allocation17_spill] sm:$0xff] }
 0x33a   : > { %v5406_v51 = vadd.f32 %v5405_v37, %v5181_v33  ;;  %v5197_v32 = vmul.f32 %v13142_v46, %v3337_v56  ;;  %13145 = vst [vmem:[#allocation111_spill] sm:$0xff] %v11264_v24  ;;  %v4556_v37 = vld [vmem:[%s9616_s16 + $0x790] sm:$0xff]  ;;  %v3228_v20 = vpop.f32.mrb[16].mxu0  ;;  %v13151_v56 = vld [vmem:[#allocation98_spill] sm:$0xff]  ;;  %v4565_v29 = vld [vmem:[%s9616_s16 + $0x7d8] sm:$0xff] }
 0x33b   : > { %v5386_v53 = vadd.f32 %v5385_v19, %v5196_v15  ;;  %7024 = vmatmul.mubr.msk.bf16.gmra.mrb[120].mxu1 %vm13144_vm10, %v10689_v63  ;;  %v5210_v13 = vmul.f32 %v13147_v35, %v3228_v20  ;;  %v3230_v39 = vpop.f32.mrb[17].mxu0  ;;  %5052 = vxpose.xlu1.b32.cont [3/16] %v4556_v37, 128  ;;  %v13148_v63 = vld [vmem:[#allocation16_spill] sm:$0xff]  ;;  %v4557_v15 = vld [vmem:[%s9616_s16 + $0x798] sm:$0xff]  ;;  %v13152_v35 = vld [vmem:[#allocation18_spill] sm:$0xff] }
 0x33c   : > { %v5407_v25 = vadd.f32 %v5406_v51, %v5197_v32  ;;  %4047 = vmatprep.mubr.bf16.mxu1 %v12194_v52  ;;  %v5211_v19 = vmul.f32 %v13149_v17, %v3230_v39  ;;  %v3232_v31 = vpop.f32.mrb[18].mxu0  ;;  %5021 = vxpose.xlu0.b32.cont [4/16] %v4541_v62, 128 }
 0x33d   : > { %v5345_v10 = vadd.f32 %v5344_v5, %v5210_v13  ;;  %v5226_v51 = vmul.f32 %v13151_v56, %v3232_v31  ;;  %v3234_v32 = vpop.f32.mrb[19].mxu0  ;;  %v11279_v39 = vpop.trf.xlu0  ;;  %v13155_v13 = vld [vmem:[#allocation19_spill] sm:$0xff]  ;;  %v7576_v31 = vld [vmem:[%s11707_s0 + $0xb8] sm:$0xff]  }
 0x33e   : > { %v3341_v33 = vpop.f32.mrb[16].mxu1  ;;  %v5366_v20 = vadd.f32 %v5365_v18, %v5211_v19  ;;  %13154 = vst [vmem:[#allocation112_spill] sm:$0xff] %v11279_v39 }
 0x33f   : > { %v5212_v3 = vmul.f32 %v13148_v63, %v3341_v33  ;;  %v3343_v57 = vpop.f32.mrb[17].mxu1  ;;  %v5227_v33 = vmul.f32 %v13153_v22, %v3234_v32  ;;  %v5346_v5 = vadd.f32 %v5345_v10, %v5226_v51  ;;  %6992 = vmatmul.mubr.msk.bf16.gmra.mrb[124].mxu0 %vm13156_vm14, %v7576_v31  ;;  %5053 = vxpose.xlu1.b32.cont [4/16] %v4557_v15, 128  ;;  %v11288_v22 = vpop.trf.xlu1  ;;  %v4543_v15 = vld [vmem:[%s9616_s16 + $0x728] sm:$0xff] }
 0x340   : > { %v5213_v52 = vmul.f32 %v13150_v42, %v3343_v57  ;;  %v3345_v46 = vpop.f32.mrb[18].mxu1  ;;  %13157 = vst [vmem:[#allocation86_spill] sm:$0xff] %v11288_v22  ;;  %v13159_v42 = vld [vmem:[#allocation100_spill] sm:$0xff]  ;;  %v13165_v22 = vld [vmem:[#allocation75_spill] sm:$0xff] }
 0x341   : > { %v5387_v23 = vadd.f32 %v5386_v53, %v5212_v3  ;;  %v5228_v37 = vmul.f32 %v13152_v35, %v3345_v46  ;;  %v3347_v63 = vpop.f32.mrb[19].mxu1  ;;  %v4542_v53 = vld [vmem:[%s9616_s16 + $0x720] sm:$0xff]  ;;  %v5367_v3 = vadd.f32 %v5366_v20, %v5227_v33  ;;  %v11291_v10 = vpop.trf.xlu0  ;;  %v13160_v46 = vld [vmem:[#allocation20_spill] sm:$0xff]  ;;  %v4559_v33 = vld [vmem:[%s9616_s16 + $0x7a8] sm:$0xff] }
 0x342   : > { %v5408_v17 = vadd.f32 %v5407_v25, %v5213_v52  ;;  %v5229_v57 = vmul.f32 %v13155_v13, %v3347_v63  ;;  %v4558_v25 = vld [vmem:[%s9616_s16 + $0x7a0] sm:$0xff]  ;;  %v3238_v19 = vpop.f32.mrb[20].mxu0  ;;  %13158 = vst [vmem:[#allocation113_spill] sm:$0xff] %v11291_v10  ;;  %5022 = vxpose.xlu0.b32.cont [5/16] %v4542_v53, 128  ;;  %v13162_v13 = vld [vmem:[#allocation21_spill] sm:$0xff] }
 0x343   : > { %v5388_v18 = vadd.f32 %v5387_v23, %v5228_v37  ;;  %7025 = vmatmul.mubr.msk.bf16.gmra.mrb[124].mxu1 %vm13078_vm0, %v7576_v31  ;;  %v5242_v52 = vmul.f32 %v13159_v42, %v3238_v19  ;;  %v3240_v51 = vpop.f32.mrb[21].mxu0  ;;  %5054 = vxpose.xlu1.b32.cont [5/16] %v4558_v25, 128  ;;  %v13161_v23 = vld [vmem:[#allocation101_spill] sm:$0xff]  ;;  %v13164_v25 = vld [vmem:[#allocation23_spill] sm:$0xff] }
 0x344   : > { %v5409_v62 = vadd.f32 %v5408_v17, %v5229_v57  ;;  %v5243_v20 = vmul.f32 %v13161_v23, %v3240_v51  ;;  %v3242_v37 = vpop.f32.mrb[22].mxu0  ;;  %v13163_v57 = vld [vmem:[#allocation74_spill] sm:$0xff]  ;;  %v11302_v51 = vpop.trf.xlu1 }
 0x345   : > { %v5347_v63 = vadd.f32 %v5346_v5, %v5242_v52  ;;  %v5258_v31 = vmul.f32 %v13163_v57, %v3242_v37  ;;  %v3244_v30 = vpop.f32.mrb[23].mxu0  ;;  %13166 = vst [vmem:[#allocation87_spill] sm:$0xff] %v11302_v51  ;;  %v13167_v52 = vld [vmem:[#allocation25_spill] sm:$0xff]  ;;  %v4544_v37 = vld [vmem:[%s9616_s16 + $0x730] sm:$0xff] }
 0x346   : > { %v3351_v56 = vpop.f32.mrb[20].mxu1  ;;  %v5368_v42 = vadd.f32 %v5367_v3, %v5243_v20  ;;  %5023 = vxpose.xlu0.b32.cont [6/16] %v4543_v15, 128  ;;  %v4560_v3 = vld [vmem:[%s9616_s16 + $0x7b0] sm:$0xff] }
 0x347   : > { %v5244_v32 = vmul.f32 %v13160_v46, %v3351_v56  ;;  %v3353_v35 = vpop.f32.mrb[21].mxu1  ;;  %v5259_v56 = vmul.f32 %v13165_v22, %v3244_v30  ;;  %v5348_v5 = vadd.f32 %v5347_v63, %v5258_v31  ;;  %5055 = vxpose.xlu1.b32.cont [6/16] %v4559_v33, 128  ;;  %v13170_v22 = vld [vmem:[#allocation102_spill] sm:$0xff]  ;;  %v13171_v31 = vld [vmem:[#allocation27_spill] sm:$0xff]  ;;  %v13176_v51 = vld [vmem:[#allocation8_spill] sm:$0xff] }
 0x348   : > { %v5245_v17 = vmul.f32 %v13162_v13, %v3353_v35  ;;  %v3355_v53 = vpop.f32.mrb[22].mxu1  ;;  %v11309_v30 = vpop.trf.xlu1 }
 0x349   : > { %v5389_v19 = vadd.f32 %v5388_v18, %v5244_v32  ;;  %v5260_v10 = vmul.f32 %v13164_v25, %v3355_v53  ;;  %v3357_v46 = vpop.f32.mrb[23].mxu1  ;;  %v5369_v57 = vadd.f32 %v5368_v42, %v5259_v56  ;;  %v11306_v18 = vpop.trf.xlu0  ;;  %13169 = vst [vmem:[#allocation88_spill] sm:$0xff] %v11309_v30  ;;  %v13172_v53 = vld [vmem:[#allocation103_spill] sm:$0xff]  ;;  %v4561_v25 = vld [vmem:[%s9616_s16 + $0x7b8] sm:$0xff] }
 0x34a   : > { %v5410_v23 = vadd.f32 %v5409_v62, %v5245_v17  ;;  %v5261_v35 = vmul.f32 %v13167_v52, %v3357_v46  ;;  %13168 = vst [vmem:[#allocation114_spill] sm:$0xff] %v11306_v18  ;;  %v3248_v20 = vpop.f32.mrb[24].mxu0  ;;  %5024 = vxpose.xlu0.b32.cont [7/16] %v4544_v37, 128  ;;  %v4545_v17 = vld [vmem:[%s9616_s16 + $0x738] sm:$0xff]  ;;  %v13174_v52 = vld [vmem:[#allocation7_spill] sm:$0xff] }
 0x34b   : > { %v5390_v13 = vadd.f32 %v5389_v19, %v5260_v10  ;;  %v5274_v15 = vmul.f32 %v13170_v22, %v3248_v20  ;;  %v3250_v63 = vpop.f32.mrb[25].mxu0  ;;  %5056 = vxpose.xlu1.b32.cont [7/16] %v4560_v3, 128  ;;  %v13173_v46 = vld [vmem:[#allocation29_spill] sm:$0xff]  ;;  %v13175_v3 = vld [vmem:[#allocation30_spill] sm:$0xff] }
 0x34c   : > { %v5411_v32 = vadd.f32 %v5410_v23, %v5261_v35  ;;  %v5275_v10 = vmul.f32 %v13172_v53, %v3250_v63  ;;  %v3252_v42 = vpop.f32.mrb[26].mxu0 }
 0x34d   : > { %v5349_v56 = vadd.f32 %v5348_v5, %v5274_v15  ;;  %v5290_v35 = vmul.f32 %v13174_v52, %v3252_v42  ;;  %v3254_v30 = vpop.f32.mrb[27].mxu0  ;;  %v11320_v63 = vpop.trf.xlu0  ;;  %v13178_v15 = vld [vmem:[#allocation31_spill] sm:$0xff]  ;;  %v4546_v42 = vld [vmem:[%s9616_s16 + $0x740] sm:$0xff] }
 0x34e   : > { %v3361_v62 = vpop.f32.mrb[24].mxu1  ;;  %v5370_v22 = vadd.f32 %v5369_v57, %v5275_v10  ;;  %13177 = vst [vmem:[#allocation115_spill] sm:$0xff] %v11320_v63  ;;  %5025 = vxpose.xlu0.b32.cont [8/16] %v4545_v17, 128  ;;  %v4562_v57 = vld [vmem:[%s9616_s16 + $0x7c0] sm:$0xff]  ;;  %v13181_v17 = vld [vmem:[#allocation104_spill] sm:$0xff] }
 0x34f   : > { %v5276_v33 = vmul.f32 %v13171_v31, %v3361_v62  ;;  %v3363_v19 = vpop.f32.mrb[25].mxu1  ;;  %v5291_v62 = vmul.f32 %v13176_v51, %v3254_v30  ;;  %v5350_v5 = vadd.f32 %v5349_v56, %v5290_v35  ;;  %5057 = vxpose.xlu1.b32.cont [8/16] %v4561_v25, 128  ;;  %v13182_v25 = vld [vmem:[#allocation33_spill] sm:$0xff] }
 0x350   : > { %v5277_v23 = vmul.f32 %v13173_v46, %v3363_v19  ;;  %v3365_v37 = vpop.f32.mrb[26].mxu1 }
 0x351   : > { %v5391_v20 = vadd.f32 %v5390_v13, %v5276_v33  ;;  %v5292_v18 = vmul.f32 %v13175_v3, %v3365_v37  ;;  %v3367_v31 = vpop.f32.mrb[27].mxu1  ;;  %v5371_v52 = vadd.f32 %v5370_v22, %v5291_v62  ;;  %v11324_v13 = vpop.trf.xlu1  ;;  %v4563_v3 = vld [vmem:[%s9616_s16 + $0x7c8] sm:$0xff] }
 0x352   : > { %v5412_v53 = vadd.f32 %v5411_v32, %v5277_v23  ;;  %v5293_v19 = vmul.f32 %v13178_v15, %v3367_v31  ;;  %13179 = vst [vmem:[#allocation89_spill] sm:$0xff] %v11324_v13  ;;  %v3258_v51 = vpop.f32.mrb[28].mxu0  ;;  %v11327_v30 = vpop.trf.xlu0  ;;  %5026 = vxpose.xlu0.b32.cont [9/16] %v4546_v42, 128  ;;  %v4547_v23 = vld [vmem:[%s9616_s16 + $0x748] sm:$0xff]  ;;  %v13185_v15 = vld [vmem:[#allocation106_spill] sm:$0xff] }
 0x353   : > { %v5392_v46 = vadd.f32 %v5391_v20, %v5292_v18  ;;  %13180 = vst [vmem:[#allocation9_spill] sm:$0xff] %v11327_v30  ;;  %v5306_v32 = vmul.f32 %v13181_v17, %v3258_v51  ;;  %v3260_v56 = vpop.f32.mrb[29].mxu0  ;;  %5058 = vxpose.xlu1.b32.cont [9/16] %v4562_v57, 128  ;;  %v13183_v18 = vld [vmem:[#allocation105_spill] sm:$0xff]  ;;  %v13184_v31 = vld [vmem:[#allocation35_spill] sm:$0xff] }
 0x354   : > { %v5413_v33 = vadd.f32 %v5412_v53, %v5293_v19  ;;  %v5307_v37 = vmul.f32 %v13183_v18, %v3260_v56  ;;  %v3262_v22 = vpop.f32.mrb[30].mxu0 }
 0x355   : > { %v5351_v62 = vadd.f32 %v5350_v5, %v5306_v32  ;;  %v5322_v19 = vmul.f32 %v13185_v15, %v3262_v22  ;;  %v3264_v57 = vpop.f32.mrb[31].mxu0  ;;  %v11344_v13 = vpop.trf.xlu1  ;;  %v11347_v32 = vld [vmem:[%s11337_s5] sm:$0xff] }
 0x356   : > { %v3371_v10 = vpop.f32.mrb[28].mxu1  ;;  %v5372_v17 = vadd.f32 %v5371_v52, %v5307_v37  ;;  %13188 = vst [vmem:[#allocation90_spill] sm:$0xff] %v11344_v13  ;;  %5027 = vxpose.xlu0.b32.cont [10/16] %v4547_v23, 128  ;;  %v11353_v37 = vpop.trf.xlu0  ;;  %v13191_v23 = vld [vmem:[#allocation5_spill] sm:$0xff] }
 0x357   : > { %v5308_v35 = vmul.f32 %v13182_v25, %v3371_v10  ;;  %v3373_v20 = vpop.f32.mrb[29].mxu1  ;;  %v13186_v10 = vld [vmem:[#allocation36_spill] sm:$0xff]  ;;  %v13187_v25 = vld [vmem:[#allocation107_spill] sm:$0xff]  ;;  %v5352_v5 = vadd.f32 %v5351_v62, %v5322_v19  ;;  %5059 = vxpose.xlu1.b32.cont [10/16] %v4563_v3, 128  ;;  %13190 = vst [vmem:[#allocation10_spill] sm:$0xff] %v11353_v37  ;;  %v13194_v37 = vld [vmem:[#allocation37_spill] sm:$0xff] }
 0x358   : > { %v5309_v53 = vmul.f32 %v13184_v31, %v3373_v20  ;;  %v3375_v42 = vpop.f32.mrb[30].mxu1  ;;  %v5323_v18 = vmul.f32 %v13187_v25, %v3264_v57  ;;  %v7588_v20 = vmov 1966171168   ;;  %v13189_v31 = vld [vmem:[#allocation32_spill] sm:$0xff] }
 0x359   : > { %v5393_v51 = vadd.f32 %v5392_v46, %v5308_v35  ;;  %v5324_v56 = vmul.f32 %v13186_v10, %v3375_v42  ;;  %v3377_v30 = vpop.f32.mrb[31].mxu1  ;;  %v11349_v22 = vunpack.c.l.s4 %v7588_v20  ;;  %v4548_v46 = vld [vmem:[%s9616_s16 + $0x750] sm:$0xff]  ;;  %v5353_v57 = vrot.slane %v5352_v5, 4  ;;  %v11358_v25 = vpop.trf.xlu1 }
 0x35a   : > { %v5414_v63 = vadd.f32 %v5413_v33, %v5309_v53  ;;  %v5325_v15 = vmul.f32 %v13189_v31, %v3377_v30  ;;  %v5373_v35 = vadd.f32 %v5372_v17, %v5323_v18  ;;  %v4564_v42 = vld [vmem:[%s9616_s16 + $0x7d0] sm:$0xff]  ;;  %v3414_v19 = vpop.f32.mrb[32].mxu0  ;;  %13192 = vst [vmem:[#allocation91_spill] sm:$0xff] %v11358_v25  ;;  %5028 = vxpose.xlu0.b32.cont [11/16] %v4548_v46, 128  ;;  %v13193_v17 = vld [vmem:[#allocation34_spill] sm:$0xff] }
 0x35b   : > { %v5394_v52 = vadd.f32 %v5393_v51, %v5324_v56  ;;  %v5354_v30 = vadd.f32 %v5353_v57, %v5352_v5  ;;  %v5796_v3 = vunpack.c.0.s8 %v11349_v22  ;;  %v5086_v56 = vmul.f32 %v13193_v17, %v3414_v19  ;;  %v3416_v20 = vpop.f32.mrb[33].mxu0  ;;  %5060 = vxpose.xlu1.b32.cont [11/16] %v4564_v42, 128  ;;  %v13195_v57 = vld [vmem:[#allocation38_spill] sm:$0xff] }
 0x35c   : > { %v5415_v10 = vadd.f32 %v5414_v63, %v5325_v15  ;;  %v5374_v53 = vrot.slane %v5373_v35, 4  ;;  %v4549_v63 = vld [vmem:[%s9616_s16 + $0x758] sm:$0xff]  ;;  %v5087_v13 = vmul.f32 %v13194_v37, %v3416_v20  ;;  %v3418_v25 = vpop.f32.mrb[34].mxu0 }
 0x35d   : > { %v5395_v62 = vrot.slane %v5394_v52, 4  ;;  %v5355_v46 = vrot.slane %v5354_v30, 2  ;;  %v5102_v19 = vmul.f32 %v13195_v57, %v3418_v25  ;;  %v3420_v24 = vpop.f32.mrb[35].mxu0  ;;  %v11374_v44 = vpop.trf.xlu1 }
 0x35e   : > { %v5416_v51 = vrot.slane %v5415_v10, 4  ;;  %v3527_v18 = vpop.f32.mrb[32].mxu1  ;;  %v5375_v15 = vadd.f32 %v5374_v53, %v5373_v35  ;;  %v13196_v35 = vld [vmem:[#allocation39_spill] sm:$0xff]  ;;  %5029 = vxpose.xlu0.b32.cont [12/16] %v4549_v63, 128  ;;  %13198 = vst [vmem:[#allocation92_spill] sm:$0xff] %v11374_v44 }
 0x35f   : > { %v5396_v31 = vadd.f32 %v5395_v62, %v5394_v52  ;;  %v5088_v33 = vmul.f32 %v10774_v49, %v3527_v18  ;;  %v3529_v39 = vpop.f32.mrb[33].mxu1  ;;  %v5103_v49 = vmul.f32 %v13196_v35, %v3420_v24  ;;  %v11370_v62 = vpop.trf.xlu0  ;;  %v5356_v53 = vadd.f32 %v5355_v46, %v5354_v30  ;;  %5061 = vxpose.xlu1.b32.cont [12/16] %v4565_v29, 128  ;;  %v13199_v24 = vld [vmem:[#allocation6_spill] sm:$0xff]  ;;  %v13200_v46 = vld [vmem:[#allocation3_spill] sm:$0xff]  ;;  %v13201_v29 = vld [vmem:[#allocation4_spill] sm:$0xff] }
 0x360   : > { %v5417_v5 = vadd.f32 %v5416_v51, %v5415_v10  ;;  %v5089_v22 = vmul.f32 %v10790_v58, %v3529_v39  ;;  %v3531_v17 = vpop.f32.mrb[34].mxu1  ;;  %v5376_v9 = vrot.slane %v5375_v15, 2  ;;  %13197 = vst [vmem:[#allocation11_spill] sm:$0xff] %v11370_v62  ;;  %v5422_v51 = vadd.f32 %v5102_v19, %v5086_v56  ;;  %v4550_v39 = vld [vmem:[%s9616_s16 + $0x760] sm:$0xff] }
 0x361   : > { %v5397_v42 = vrot.slane %v5396_v31, 2  ;;  %v5104_v52 = vmul.f32 %v10792_v60, %v3531_v17  ;;  %v3533_v37 = vpop.f32.mrb[35].mxu1  ;;  %v5443_v57 = vadd.f32 %v5103_v49, %v5087_v13  ;;  %v4566_v60 = vld [vmem:[%s9616_s16 + $0x7e0] sm:$0xff]  ;;  %v5357_v17 = vrot.slane %v5356_v53, 1 }
 0x362   : > { %v5418_v10 = vrot.slane %v5417_v5, 2  ;;  %v5105_v58 = vmul.f32 %v10808_v8, %v3533_v37  ;;  %v5377_v18 = vadd.f32 %v5376_v9, %v5375_v15  ;;  %v5689_v35 = vrot.slane %v11347_v32, %v13199_v24  ;;  %5030 = vxpose.xlu0.b32.cont [13/16] %v4550_v39, 128  ;;  %v13203_v15 = vld [vmem:[#allocation2_spill] sm:$0xff]  ;;  %v4551_v37 = vld [vmem:[%s9616_s16 + $0x768] sm:$0xff] }
 0x363   : > { %v5398_v25 = vadd.f32 %v5397_v42, %v5396_v31  ;;  %v5464_v20 = vadd.f32 %v5104_v52, %v5088_v33  ;;  %v5685_v8 = vrot.slane %v11347_v32, %v13200_v46  ;;  %v5693_v9 = vrot.slane %v11347_v32, %v13201_v29  ;;  %v3424_v33 = vpop.f32.mrb[36].mxu0  ;;  %v11383_v13 = vpop.trf.xlu0  ;;  %v13204_v42 = vld [vmem:[#allocation40_spill] sm:$0xff]  ;;  %5062 = vxpose.xlu1.b32.cont [13/16] %v4566_v60, 128  ;;  %v13205_v46 = vld [vmem:[#allocation41_spill] sm:$0xff]  ;;  %v4567_v39 = vld [vmem:[%s9616_s16 + $0x7e8] sm:$0xff] }
 0x364   : > { %v5419_v62 = vadd.f32 %v5418_v10, %v5417_v5  ;;  %v5485_v30 = vadd.f32 %v5105_v58, %v5089_v22  ;;  %v5378_v56 = vrot.slane %v5377_v18, 1  ;;  %13202 = vst [vmem:[#allocation12_spill] sm:$0xff] %v11383_v13  ;;  %v5358_v31 = vadd.f32 %v5357_v17, %v5356_v53  ;;  %v3426_v49 = vpop.f32.mrb[37].mxu0 }
 0x365   : > { %v5399_v63 = vrot.slane %v5398_v25, 1  ;;  %v11386_v19 = vsub.s32 %v5796_v3, %v13203_v15  ;;  %v5118_v22 = vmul.f32 %v13204_v42, %v3424_v33  ;;  %v5119_v24 = vmul.f32 %v13205_v46, %v3426_v49  ;;  %v3428_v44 = vpop.f32.mrb[38].mxu0  ;;  %v11397_v46 = vpop.trf.xlu1 }
 0x366   : > { %v5420_v5 = vrot.slane %v5419_v62, 1  ;;  %v3537_v52 = vpop.f32.mrb[36].mxu1  ;;  %v5379_v58 = vadd.f32 %v5378_v56, %v5377_v18  ;;  %v13206_v3 = vrot.slane %v11347_v32, %v13191_v23  ;;  %v3430_v42 = vpop.f32.mrb[39].mxu0  ;;  %5031 = vxpose.xlu0.b32.cont [14/16] %v4551_v37, 128  ;;  %v13207_v23 = vld [vmem:[#allocation42_spill] sm:$0xff] }
 0x367   : > { %v5400_v10 = vadd.f32 %v5399_v63, %v5398_v25  ;;  %v5120_v29 = vmul.f32 %v10814_v16, %v3537_v52  ;;  %v3539_v13 = vpop.f32.mrb[37].mxu1  ;;  %v5423_v15 = vadd.f32 %v5422_v51, %v5118_v22  ;;  %v5444_v63 = vadd.f32 %v5443_v57, %v5119_v24  ;;  %5063 = vxpose.xlu1.b32.cont [14/16] %v4567_v39, 128  ;;  %v4552_v51 = vld [vmem:[%s9616_s16 + $0x770] sm:$0xff]  ;;  %v4553_v39 = vld [vmem:[%s9616_s16 + $0x778] sm:$0xff] }
 0x368   : > { %v5758_v53 = vadd.f32 %v13206_v3, %v5358_v31  ;;  %v5421_v17 = vadd.f32 %v5420_v5, %v5419_v62  ;;  %v5121_v33 = vmul.f32 %v10830_v59, %v3539_v13  ;;  %v3541_v60 = vpop.f32.mrb[38].mxu1  ;;  %v5759_v18 = vadd.f32 %v5685_v8, %v5379_v58  ;;  %v13208_v13 = vld [vmem:[#allocation43_spill] sm:$0xff]  ;;  %v11404_v8 = vpop.trf.xlu0 }
 0x369   : > { %v5760_v25 = vadd.f32 %v5689_v35, %v5400_v10  ;;  %v5465_v16 = vadd.f32 %v5464_v20, %v5120_v29  ;;  %v3543_v56 = vpop.f32.mrb[39].mxu1  ;;  %v5134_v31 = vmul.f32 %v13207_v23, %v3428_v44  ;;  %v5136_v62 = vmul.f32 %v10832_v54, %v3541_v60  ;;  %v4568_v20 = vld [vmem:[%s9616_s16 + $0x7f0] sm:$0xff]  ;;  %v4569_v60 = vld [vmem:[%s9616_s16 + $0x7f8] sm:$0xff] }
 0x36a   : > { %v5761_v52 = vadd.f32 %v5693_v9, %v5421_v17  ;;  %v5486_v49 = vadd.f32 %v5485_v30, %v5121_v33  ;;  %v5790_v59 = vcombine.low %v5758_v53, %v5759_v18  ;;  %v5135_v5 = vmul.f32 %v13208_v13, %v3430_v42  ;;  %v3434_v23 = vpop.f32.mrb[40].mxu0  ;;  %v11410_v9 = vpop.trf.xlu1  ;;  %5032 = vxpose.xlu0.b32.cont [15/16] %v4552_v51, 128  ;;  %v13210_v53 = vld [vmem:[#allocation45_spill] sm:$0xff] }
 0x36b   : > { %v5137_v35 = vmul.f32 %v10846_v47, %v3543_v56  ;;  %v5424_v24 = vadd.f32 %v5423_v15, %v5134_v31  ;;  %v5466_v29 = vadd.f32 %v5465_v16, %v5136_v62  ;;  %v13209_v47 = vld [vmem:[#allocation44_spill] sm:$0xff]  ;;  %v3436_v58 = vpop.f32.mrb[41].mxu0  ;;  %5064 = vxpose.xlu1.b32.cont [15/16] %v4568_v20, 128  ;;  %v13211_v16 = vld [vmem:[#allocation46_spill] sm:$0xff] }
 0x36c   : > { %v5791_v57 = vcombine.low %v5760_v25, %v5761_v52  ;;  %v11408_v30 = vrot.slane %v5790_v59, %v11386_v19  ;;  %v5445_v44 = vadd.f32 %v5444_v63, %v5135_v5  ;;  %v5150_v37 = vmul.f32 %v13209_v47, %v3434_v23  ;;  %v3438_v33 = vpop.f32.mrb[42].mxu0  ;;  %v11426_v13 = vpop.trf.xlu0 }
 0x36d   : > { %v5487_v54 = vadd.f32 %v5486_v49, %v5137_v35  ;;  %v5151_v17 = vmul.f32 %v13210_v53, %v3436_v58  ;;  %v5166_v63 = vmul.f32 %v13211_v16, %v3438_v33  ;;  %v3440_v52 = vpop.f32.mrb[43].mxu0 }
 0x36e   : > { %v11413_v22 = vrot.slane %v5791_v57, %v11386_v19  ;;  %v3547_v10 = vpop.f32.mrb[40].mxu1  ;;  %v5425_v25 = vadd.f32 %v5424_v24, %v5150_v37  ;;  %5033 = vxpose.xlu0.b32.end [16/16] %v4553_v39, 128  ;;  %v11429_v24 = vpop.trf.xlu1  ;;  %v13214_v39 = vld [vmem:[#allocation49_spill] sm:$0xff] }
 0x36f   : > { %v5152_v3 = vmul.f32 %v10852_v41, %v3547_v10  ;;  %v3549_v15 = vpop.f32.mrb[41].mxu1  ;;  %v5446_v31 = vadd.f32 %v5445_v44, %v5151_v17  ;;  %v13212_v41 = vld [vmem:[#allocation47_spill] sm:$0xff]  ;;  %5065 = vxpose.xlu1.b32.end [16/16] %v4569_v60, 128 }
 0x370   : > { %v5153_v18 = vmul.f32 %v10864_v2, %v3549_v15  ;;  %v3551_v56 = vpop.f32.mrb[42].mxu1  ;;  %v5167_v51 = vmul.f32 %v13212_v41, %v3440_v52  ;;  %v5426_v35 = vadd.f32 %v5425_v25, %v5166_v63  ;;  %v11431_v44 = vpop.trf.xlu0  ;;  %v13215_v15 = vld [vmem:[#allocation50_spill] sm:$0xff] }
 0x371   : > { %v5467_v49 = vadd.f32 %v5466_v29, %v5152_v3  ;;  %v5168_v62 = vmul.f32 %v10867_v36, %v3551_v56  ;;  %v3553_v59 = vpop.f32.mrb[43].mxu1  ;;  %v13213_v36 = vld [vmem:[#allocation48_spill] sm:$0xff]  ;;  %v13216_v56 = vld [vmem:[#allocation51_spill] sm:$0xff] }
 0x372   : > { %v5488_v5 = vadd.f32 %v5487_v54, %v5153_v18  ;;  %v5169_v20 = vmul.f32 %v10872_v6, %v3553_v59  ;;  %v5447_v57 = vadd.f32 %v5446_v31, %v5167_v51  ;;  %v3444_v29 = vpop.f32.mrb[44].mxu0  ;;  %v11440_v31 = vpop.trf.xlu1 }
 0x373   : > { %v5468_v2 = vadd.f32 %v5467_v49, %v5168_v62  ;;  %v5182_v47 = vmul.f32 %v13213_v36, %v3444_v29  ;;  %v3446_v10 = vpop.f32.mrb[45].mxu0 }
 0x374   : > { %v5489_v23 = vadd.f32 %v5488_v5, %v5169_v20  ;;  %v5183_v54 = vmul.f32 %v13214_v39, %v3446_v10  ;;  %v3448_v53 = vpop.f32.mrb[46].mxu0  ;;  %v13219_v39 = vld [vmem:[#allocation54_spill] sm:$0xff] }
 0x375   : > { %v5427_v6 = vadd.f32 %v5426_v35, %v5182_v47  ;;  %v5198_v33 = vmul.f32 %v13215_v15, %v3448_v53  ;;  %v3450_v25 = vpop.f32.mrb[47].mxu0  ;;  %v13218_v47 = vld [vmem:[#allocation53_spill] sm:$0xff] }
 0x376   : > { %v3557_v37 = vpop.f32.mrb[44].mxu1  ;;  %v5448_v16 = vadd.f32 %v5447_v57, %v5183_v54  ;;  %v5199_v52 = vmul.f32 %v13216_v56, %v3450_v25  ;;  %v11445_v20 = vpop.trf.xlu1 }
 0x377   : > { %v5184_v58 = vmul.f32 %v10880_v45, %v3557_v37  ;;  %v3559_v3 = vpop.f32.mrb[45].mxu1  ;;  %v5428_v62 = vadd.f32 %v5427_v6, %v5198_v33  ;;  %v13220_v33 = vld [vmem:[#allocation55_spill] sm:$0xff] }
 0x378   : > { %v5185_v17 = vmul.f32 %v10883_v43, %v3559_v3  ;;  %v3561_v60 = vpop.f32.mrb[46].mxu1  ;;  %v5449_v59 = vadd.f32 %v5448_v16, %v5199_v52  ;;  %v11443_v43 = vpop.trf.xlu0 }
 0x379   : > { %v5469_v18 = vadd.f32 %v5468_v2, %v5184_v58  ;;  %v5200_v63 = vmul.f32 %v10893_v11, %v3561_v60  ;;  %v3563_v49 = vpop.f32.mrb[47].mxu1  ;;  %v13217_v2 = vld [vmem:[#allocation52_spill] sm:$0xff] }
 0x37a   : > { %v5490_v45 = vadd.f32 %v5489_v23, %v5185_v17  ;;  %v5201_v41 = vmul.f32 %v10896_v48, %v3563_v49  ;;  %v3454_v35 = vpop.f32.mrb[48].mxu0 }
 0x37b   : > { %v5470_v51 = vadd.f32 %v5469_v18, %v5200_v63  ;;  %v5214_v57 = vmul.f32 %v13217_v2, %v3454_v35  ;;  %v3456_v29 = vpop.f32.mrb[49].mxu0  ;;  %v13222_v2 = vld [vmem:[#allocation59_spill] sm:$0xff] }
 0x37c   : > { %v5491_v5 = vadd.f32 %v5490_v45, %v5201_v41  ;;  %v5215_v37 = vmul.f32 %v13218_v47, %v3456_v29  ;;  %v3458_v10 = vpop.f32.mrb[50].mxu0  ;;  %v11454_v18 = vpop.trf.xlu0  ;;  %v13221_v41 = vld [vmem:[#allocation56_spill] sm:$0xff] }
 0x37d   : > { %v5429_v58 = vadd.f32 %v5428_v62, %v5214_v57  ;;  %v5230_v54 = vmul.f32 %v13219_v39, %v3458_v10  ;;  %v3460_v53 = vpop.f32.mrb[51].mxu0  ;;  %v13224_v39 = vld [vmem:[#allocation61_spill] sm:$0xff] }
 0x37e   : > { %v3567_v11 = vpop.f32.mrb[48].mxu1  ;;  %v5450_v17 = vadd.f32 %v5449_v59, %v5215_v37  ;;  %v5231_v60 = vmul.f32 %v13220_v33, %v3460_v53 }
 0x37f   : > { %v5216_v36 = vmul.f32 %v10902_v38, %v3567_v11  ;;  %v3569_v23 = vpop.f32.mrb[49].mxu1  ;;  %v5430_v16 = vadd.f32 %v5429_v58, %v5230_v54 }
 0x380   : > { %v5217_v48 = vmul.f32 %v10908_v0, %v3569_v23  ;;  %v3571_v3 = vpop.f32.mrb[50].mxu1  ;;  %v5451_v52 = vadd.f32 %v5450_v17, %v5231_v60  ;;  %v11457_v0 = vpop.trf.xlu1 }
 0x381   : > { %v5471_v6 = vadd.f32 %v5470_v51, %v5216_v36  ;;  %v5232_v15 = vmul.f32 %v10913_v50, %v3571_v3  ;;  %v3573_v25 = vpop.f32.mrb[51].mxu1  ;;  %v11459_v62 = vpop.trf.xlu0  ;;  %v13223_v36 = vld [vmem:[#allocation60_spill] sm:$0xff] }
 0x382   : > { %v5492_v38 = vadd.f32 %v5491_v5, %v5217_v48  ;;  %v5233_v63 = vmul.f32 %v10916_v14, %v3573_v25  ;;  %v3464_v45 = vpop.f32.mrb[52].mxu0 }
 0x383   : > { %v5472_v56 = vadd.f32 %v5471_v6, %v5232_v15  ;;  %v5246_v51 = vmul.f32 %v13221_v41, %v3464_v45  ;;  %v3466_v59 = vpop.f32.mrb[53].mxu0 }
 0x384   : > { %v5493_v49 = vadd.f32 %v5492_v38, %v5233_v63  ;;  %v5247_v57 = vmul.f32 %v13222_v2, %v3466_v59  ;;  %v3468_v11 = vpop.f32.mrb[54].mxu0  ;;  %v11468_v53 = vpop.trf.xlu1 }
 0x385   : > { %v5431_v29 = vadd.f32 %v5430_v16, %v5246_v51  ;;  %v5262_v47 = vmul.f32 %v13223_v36, %v3468_v11  ;;  %v3470_v23 = vpop.f32.mrb[55].mxu0 }
 0x386   : > { %v3577_v50 = vpop.f32.mrb[52].mxu1  ;;  %v5452_v58 = vadd.f32 %v5451_v52, %v5247_v57  ;;  %v5263_v54 = vmul.f32 %v13224_v39, %v3470_v23  ;;  %v13225_v52 = vld [vmem:[#allocation62_spill] sm:$0xff] }
 0x387   : > { %v5248_v35 = vmul.f32 %v10926_v55, %v3577_v50  ;;  %v3579_v5 = vpop.f32.mrb[53].mxu1  ;;  %v5432_v6 = vadd.f32 %v5431_v29, %v5262_v47  ;;  %v13226_v50 = vld [vmem:[#allocation63_spill] sm:$0xff] }
 0x388   : > { %v5249_v14 = vmul.f32 %v10929_v61, %v3579_v5  ;;  %v3581_v37 = vpop.f32.mrb[54].mxu1  ;;  %v5453_v33 = vadd.f32 %v5452_v58, %v5263_v54  ;;  %v11471_v61 = vpop.trf.xlu0 }
 0x389   : > { %v5473_v10 = vadd.f32 %v5472_v56, %v5248_v35  ;;  %v5264_v48 = vmul.f32 %v10944_v34, %v3581_v37  ;;  %v3583_v3 = vpop.f32.mrb[55].mxu1  ;;  %v11473_v38 = vpop.trf.xlu1 }
 0x38a   : > { %v5494_v55 = vadd.f32 %v5493_v49, %v5249_v14  ;;  %v5265_v17 = vmul.f32 %v10950_v4, %v3583_v3  ;;  %v3474_v25 = vpop.f32.mrb[56].mxu0  ;;  %v13227_v3 = vld [vmem:[#allocation64_spill] sm:$0xff] }
 0x38b   : > { %v5474_v15 = vadd.f32 %v5473_v10, %v5264_v48  ;;  %v5278_v16 = vmul.f32 %v10701_v7, %v3474_v25  ;;  %v3476_v63 = vpop.f32.mrb[57].mxu0 }
 0x38c   : > { %v5495_v60 = vadd.f32 %v5494_v55, %v5265_v17  ;;  %v5279_v45 = vmul.f32 %v13225_v52, %v3476_v63  ;;  %v3478_v41 = vpop.f32.mrb[58].mxu0  ;;  %v11482_v14 = vpop.trf.xlu0  ;;  %v13230_v52 = vld [vmem:[#allocation68_spill] sm:$0xff] }
 0x38d   : > { %v5433_v51 = vadd.f32 %v5432_v6, %v5278_v16  ;;  %v5294_v59 = vmul.f32 %v13226_v50, %v3478_v41  ;;  %v3480_v2 = vpop.f32.mrb[59].mxu0  ;;  %v13232_v50 = vld [vmem:[#allocation65_spill] sm:$0xff] }
 0x38e   : > { %v3587_v34 = vpop.f32.mrb[56].mxu1  ;;  %v5454_v5 = vadd.f32 %v5453_v33, %v5279_v45  ;;  %v5295_v7 = vmul.f32 %v10723_v40, %v3480_v2 }
 0x38f   : > { %v5280_v56 = vmul.f32 %v10970_v26, %v3587_v34  ;;  %v3589_v49 = vpop.f32.mrb[57].mxu1  ;;  %v5434_v36 = vadd.f32 %v5433_v51, %v5294_v59 }
 0x390   : > { %v5281_v4 = vmul.f32 %v10976_v27, %v3589_v49  ;;  %v3591_v35 = vpop.f32.mrb[58].mxu1  ;;  %v5455_v23 = vadd.f32 %v5454_v5, %v5295_v7  ;;  %v11485_v27 = vpop.trf.xlu1 }
 0x391   : > { %v5475_v57 = vadd.f32 %v5474_v15, %v5280_v56  ;;  %v5296_v11 = vmul.f32 %v10995_v21, %v3591_v35  ;;  %v3593_v29 = vpop.f32.mrb[59].mxu1  ;;  %v11487_v48 = vpop.trf.xlu0 }
 0x392   : > { %v5496_v26 = vadd.f32 %v5495_v60, %v5281_v4  ;;  %v5297_v47 = vmul.f32 %v11003_v1, %v3593_v29  ;;  %v3484_v58 = vpop.f32.mrb[60].mxu0  ;;  %v13228_v1 = vld [vmem:[#allocation67_spill] sm:$0xff]  ;;  %v13229_v60 = vld [vmem:[#allocation57_spill] sm:$0xff] }
 0x393   : > { %v5476_v37 = vadd.f32 %v5475_v57, %v5296_v11  ;;  %v5310_v39 = vmul.f32 %v10727_v12, %v3484_v58  ;;  %v3486_v54 = vpop.f32.mrb[61].mxu0  ;;  %v13231_v12 = vld [vmem:[#allocation58_spill] sm:$0xff] }
 0x394   : > { %v5497_v10 = vadd.f32 %v5496_v26, %v5297_v47  ;;  %v5311_v55 = vmul.f32 %v13227_v3, %v3486_v54  ;;  %v3488_v17 = vpop.f32.mrb[62].mxu0  ;;  %v11496_v51 = vpop.trf.xlu1 }
 0x395   : > { %v5435_v15 = vadd.f32 %v5434_v36, %v5310_v39  ;;  %v5326_v25 = vmul.f32 %v13229_v60, %v3488_v17  ;;  %v3490_v34 = vpop.f32.mrb[63].mxu0  ;;  %v11499_v57 = vpop.trf.xlu0  ;;  %v13236_v60 = vld [vmem:[#allocation84_spill] sm:$0xff] }
 0x396   : > { %v3597_v21 = vpop.f32.mrb[60].mxu1  ;;  %v5456_v56 = vadd.f32 %v5455_v23, %v5311_v55  ;;  %v5327_v49 = vmul.f32 %v13231_v12, %v3490_v34  ;;  %v13233_v23 = vld [vmem:[#allocation66_spill] sm:$0xff]  ;;  %v13235_v55 = vld [vmem:[#allocation77_spill] sm:$0xff]  ;;  %v13238_v12 = vld [vmem:[#allocation111_spill] sm:$0xff] }
 0x397   : > { %v5312_v40 = vmul.f32 %v11028_v28, %v3597_v21  ;;  %v3599_v6 = vpop.f32.mrb[61].mxu1  ;;  %v5436_v4 = vadd.f32 %v5435_v15, %v5326_v25 }
 0x398   : > { %v5313_v33 = vmul.f32 %v13228_v1, %v3599_v6  ;;  %v3601_v16 = vpop.f32.mrb[62].mxu1  ;;  %v5457_v2 = vadd.f32 %v5456_v56, %v5327_v49  ;;  %v11501_v36 = vpop.trf.xlu1 }
 0x399   : > { %v5477_v63 = vadd.f32 %v5476_v37, %v5312_v40  ;;  %v5328_v45 = vmul.f32 %v13230_v52, %v3601_v16  ;;  %v3603_v41 = vpop.f32.mrb[63].mxu1  ;;  %v5437_v5 = vrot.slane %v5436_v4, 4  ;;  %v13234_v40 = vld [vmem:[#allocation110_spill] sm:$0xff] }
 0x39a   : > { %v5498_v28 = vadd.f32 %v5497_v10, %v5313_v33  ;;  %v5329_v59 = vmul.f32 %v13232_v50, %v3603_v41  ;;  %v5458_v29 = vrot.slane %v5457_v2, 4  ;;  %v3640_v26 = vpop.f32.mrb[64].mxu0  ;;  %v13237_v16 = vld [vmem:[#allocation78_spill] sm:$0xff]  ;;  %v13239_v41 = vld [vmem:[#allocation79_spill] sm:$0xff]  ;;  %v11510_v50 = vpop.trf.xlu0 }
 0x39b   : > { %v5478_v35 = vadd.f32 %v5477_v63, %v5328_v45  ;;  %v5438_v47 = vadd.f32 %v5437_v5, %v5436_v4  ;;  %v5090_v58 = vmul.f32 %v13233_v23, %v3640_v26  ;;  %v3642_v10 = vpop.f32.mrb[65].mxu0  ;;  %v13240_v5 = vld [vmem:[#allocation85_spill] sm:$0xff] }
 0x39c   : > { %v5499_v11 = vadd.f32 %v5498_v28, %v5329_v59  ;;  %v5459_v54 = vadd.f32 %v5458_v29, %v5457_v2  ;;  %v5091_v6 = vmul.f32 %v13235_v55, %v3642_v10  ;;  %v3644_v15 = vpop.f32.mrb[66].mxu0  ;;  %v11513_v23 = vpop.trf.xlu1  ;;  %v13241_v10 = vld [vmem:[#allocation26_spill] sm:$0xff] }
 0x39d   : > { %v5479_v7 = vrot.slane %v5478_v35, 4  ;;  %v5439_v1 = vrot.slane %v5438_v47, 2  ;;  %v5106_v34 = vmul.f32 %v13237_v16, %v3644_v15  ;;  %v3646_v56 = vpop.f32.mrb[67].mxu0 }
 0x39e   : > { %v5500_v37 = vrot.slane %v5499_v11, 4  ;;  %v3753_v39 = vpop.f32.mrb[64].mxu1  ;;  %v5460_v45 = vrot.slane %v5459_v54, 2  ;;  %v5107_v28 = vmul.f32 %v13239_v41, %v3646_v56  ;;  %v13246_v56 = vld [vmem:[#allocation71_spill] sm:$0xff] }
 0x39f   : > { %v5480_v21 = vadd.f32 %v5479_v7, %v5478_v35  ;;  %v5092_v3 = vmul.f32 %v13234_v40, %v3753_v39  ;;  %v3755_v17 = vpop.f32.mrb[65].mxu1  ;;  %v5440_v59 = vadd.f32 %v5439_v1, %v5438_v47  ;;  %v5506_v2 = vadd.f32 %v5106_v34, %v5090_v58  ;;  %v13243_v58 = vld [vmem:[#allocation22_spill] sm:$0xff]  ;;  %v13245_v34 = vld [vmem:[#allocation24_spill] sm:$0xff] }
 0x3a0   : > { %v5501_v33 = vadd.f32 %v5500_v37, %v5499_v11  ;;  %v5093_v25 = vmul.f32 %v13236_v60, %v3755_v17  ;;  %v3757_v63 = vpop.f32.mrb[66].mxu1  ;;  %v5461_v29 = vadd.f32 %v5460_v45, %v5459_v54  ;;  %v5527_v37 = vadd.f32 %v5107_v28, %v5091_v6  ;;  %v13242_v60 = vld [vmem:[#allocation28_spill] sm:$0xff]  ;;  %v11521_v54 = vpop.trf.xlu0 }
 0x3a1   : > { %v5481_v52 = vrot.slane %v5480_v21, 2  ;;  %v5108_v49 = vmul.f32 %v13238_v12, %v3757_v63  ;;  %v3759_v4 = vpop.f32.mrb[67].mxu1  ;;  %v5441_v39 = vrot.slane %v5440_v59, 1  ;;  %v5697_v40 = vrot.slane %v11347_v32, %v13241_v10  ;;  %13244 = vst [vmem:[#allocation93_spill] sm:$0xff] %v11521_v54  ;;  %v13248_v28 = vld [vmem:[#allocation72_spill] sm:$0xff] }
 0x3a2   : > { %v5502_v35 = vrot.slane %v5501_v33, 2  ;;  %v5109_v11 = vmul.f32 %v13240_v5, %v3759_v4  ;;  %v5705_v47 = vrot.slane %v11347_v32, %v13242_v60  ;;  %v5462_v1 = vrot.slane %v5461_v29, 1 }
 0x3a3   : > { %v5482_v7 = vadd.f32 %v5481_v52, %v5480_v21  ;;  %v5548_v26 = vadd.f32 %v5108_v49, %v5092_v3  ;;  %v5701_v16 = vrot.slane %v11347_v32, %v13243_v58  ;;  %v3650_v21 = vpop.f32.mrb[68].mxu0  ;;  %v5442_v3 = vadd.f32 %v5441_v39, %v5440_v59  ;;  %v13247_v49 = vld [vmem:[#allocation112_spill] sm:$0xff]  ;;  %v13249_v59 = vld [vmem:[#allocation86_spill] sm:$0xff] }
 0x3a4   : > { %v5503_v55 = vadd.f32 %v5502_v35, %v5501_v33  ;;  %v5569_v17 = vadd.f32 %v5109_v11, %v5093_v25  ;;  %v5709_v63 = vrot.slane %v11347_v32, %v13245_v34  ;;  %v5122_v52 = vmul.f32 %v13246_v56, %v3650_v21  ;;  %v3652_v25 = vpop.f32.mrb[69].mxu0 }
 0x3a5   : > { %v5483_v15 = vrot.slane %v5482_v7, 1  ;;  %v5463_v12 = vadd.f32 %v5462_v1, %v5461_v29  ;;  %v5123_v4 = vmul.f32 %v13248_v28, %v3652_v25  ;;  %v3654_v5 = vpop.f32.mrb[70].mxu0  ;;  %v5762_v11 = vadd.f32 %v5697_v40, %v5442_v3  ;;  %v13250_v1 = vld [vmem:[#allocation73_spill] sm:$0xff]  ;;  %v13253_v3 = vld [vmem:[#allocation87_spill] sm:$0xff] }
 0x3a6   : > { %v5504_v6 = vrot.slane %v5503_v55, 1  ;;  %v3763_v33 = vpop.f32.mrb[68].mxu1  ;;  %v5507_v58 = vadd.f32 %v5506_v2, %v5122_v52  ;;  %v3656_v10 = vpop.f32.mrb[71].mxu0  ;;  %v13251_v25 = vld [vmem:[#allocation113_spill] sm:$0xff] }
 0x3a7   : > { %v5484_v45 = vadd.f32 %v5483_v15, %v5482_v7  ;;  %v5124_v41 = vmul.f32 %v13247_v49, %v3763_v33  ;;  %v3765_v35 = vpop.f32.mrb[69].mxu1  ;;  %v5763_v34 = vadd.f32 %v5701_v16, %v5463_v12  ;;  %v5528_v56 = vadd.f32 %v5527_v37, %v5123_v4  ;;  %v11529_v7 = vpop.trf.xlu1 }
 0x3a8   : > { %v5505_v42 = vadd.f32 %v5504_v6, %v5503_v55  ;;  %v5125_v39 = vmul.f32 %v13249_v59, %v3765_v35  ;;  %v3767_v60 = vpop.f32.mrb[70].mxu1  ;;  %v5138_v33 = vmul.f32 %v13250_v1, %v3654_v5  ;;  %v13252_v55 = vld [vmem:[#allocation76_spill] sm:$0xff]  ;;  %v11535_v52 = vpop.trf.xlu0  ;;  %v13257_v35 = vld [vmem:[#allocation81_spill] sm:$0xff] }
 0x3a9   : > { %v5764_v32 = vadd.f32 %v5705_v47, %v5484_v45  ;;  %v5549_v21 = vadd.f32 %v5548_v26, %v5124_v41  ;;  %v3769_v54 = vpop.f32.mrb[71].mxu1  ;;  %v5140_v49 = vmul.f32 %v13251_v25, %v3767_v60  ;;  %v5792_v40 = vcombine.low %v5762_v11, %v5763_v34  ;;  %v13254_v60 = vld [vmem:[#allocation80_spill] sm:$0xff] }
 0x3aa   : > { %v5765_v29 = vadd.f32 %v5709_v63, %v5505_v42  ;;  %v5570_v15 = vadd.f32 %v5569_v17, %v5125_v39  ;;  %v5139_v2 = vmul.f32 %v13252_v55, %v3656_v10  ;;  %v5141_v6 = vmul.f32 %v13253_v3, %v3769_v54  ;;  %v3660_v42 = vpop.f32.mrb[72].mxu0 }
 0x3ab   : > { %v5508_v16 = vadd.f32 %v5507_v58, %v5138_v33  ;;  %v5550_v26 = vadd.f32 %v5549_v21, %v5140_v49  ;;  %v5814_v37 = vrot.slane %v5792_v40, %v11386_v19  ;;  %v11538_v17 = vpop.trf.xlu1  ;;  %v5154_v34 = vmul.f32 %v13254_v60, %v3660_v42  ;;  %v3662_v10 = vpop.f32.mrb[73].mxu0  ;;  %v13256_v58 = vld [vmem:[#allocation114_spill] sm:$0xff]  ;;  %v13258_v21 = vld [vmem:[#allocation88_spill] sm:$0xff]  ;;  %v13260_v40 = vld [vmem:[#allocation115_spill] sm:$0xff] }
 0x3ac   : > { %v5793_v47 = vcombine.low %v5764_v32, %v5765_v29  ;;  %v5529_v45 = vadd.f32 %v5528_v56, %v5139_v2  ;;  %v5571_v12 = vadd.f32 %v5570_v15, %v5141_v6  ;;  %v13255_v54 = vcombine.low %v11408_v30, %v11413_v22  ;;  %v3664_v59 = vpop.f32.mrb[74].mxu0  ;;  %v13259_v29 = vld [vmem:[#allocation116_spill] sm:$0xff]  ;;  %v13261_v22 = vld [vmem:[#allocation117_spill] sm:$0xff]  ;;  %v11552_v3 = vpop.trf.xlu0 }
 0x3ad   : > { %v5155_v5 = vmul.f32 %v13257_v35, %v3662_v10  ;;  %v5509_v32 = vadd.f32 %v5508_v16, %v5154_v34  ;;  %v5170_v15 = vmul.f32 %v13259_v29, %v3664_v59  ;;  %v3666_v33 = vpop.f32.mrb[75].mxu0  ;;  %v13262_v16 = vld [vmem:[#allocation89_spill] sm:$0xff] }
 0x3ae   : > { %v5821_v63 = vrot.slane %v5793_v47, %v11386_v19  ;;  %v3773_v41 = vpop.f32.mrb[72].mxu1  ;;  %v5830_v28 = vrot.slane %v13255_v54, %v11386_v19  ;;  %v5171_v55 = vmul.f32 %v13261_v22, %v3666_v33  ;;  %v13264_v35 = vld [vmem:[#allocation9_spill] sm:$0xff] }
 0x3af   : > { %v5156_v4 = vmul.f32 %v13256_v58, %v3773_v41  ;;  %v3775_v11 = vpop.f32.mrb[73].mxu1  ;;  %v5530_v49 = vadd.f32 %v5529_v45, %v5155_v5  ;;  %v13269_v22 = vld [vmem:[#allocation121_spill] sm:$0xff] }
 0x3b0   : > { %v5823_v39 = vcombine.low %v5814_v37, %v5821_v63  ;;  %v5157_v56 = vmul.f32 %v13258_v21, %v3775_v11  ;;  %v3777_v1 = vpop.f32.mrb[74].mxu1  ;;  %v5510_v37 = vadd.f32 %v5509_v32, %v5170_v15  ;;  %v11562_v63 = vpop.trf.xlu1  ;;  %v13265_v11 = vld [vmem:[#allocation119_spill] sm:$0xff]  ;;  %v13267_v15 = vld [vmem:[#allocation120_spill] sm:$0xff] }
 0x3b1   : > { %v5551_v25 = vadd.f32 %v5550_v26, %v5156_v4  ;;  %v5172_v30 = vmul.f32 %v13260_v40, %v3777_v1  ;;  %v3779_v2 = vpop.f32.mrb[75].mxu1  ;;  %v5531_v45 = vadd.f32 %v5530_v49, %v5171_v55  ;;  %v11564_v10 = vpop.trf.xlu0  ;;  %v13268_v40 = vld [vmem:[#allocation10_spill] sm:$0xff] }
 0x3b2   : > { %v5837_v6 = vrot.slane %v5823_v39, %v11386_v19  ;;  %v5572_v47 = vadd.f32 %v5571_v12, %v5157_v56  ;;  %v5173_v42 = vmul.f32 %v13262_v16, %v3779_v2  ;;  %v3670_v41 = vpop.f32.mrb[76].mxu0  ;;  %v13263_v12 = vld [vmem:[#allocation118_spill] sm:$0xff] }
 0x3b3   : > { %v5552_v26 = vadd.f32 %v5551_v25, %v5172_v30  ;;  %v5186_v54 = vmul.f32 %v13263_v12, %v3670_v41  ;;  %v3672_v4 = vpop.f32.mrb[77].mxu0  ;;  %v13266_v56 = vld [vmem:[#allocation90_spill] sm:$0xff] }
 0x3b4   : > { %v5838_v60 = vcombine.low %v5830_v28, %v5837_v6  ;;  %v5573_v34 = vadd.f32 %v5572_v47, %v5173_v42  ;;  %v5187_v59 = vmul.f32 %v13265_v11, %v3672_v4  ;;  %v3674_v32 = vpop.f32.mrb[78].mxu0  ;;  %v11574_v6 = vpop.trf.xlu1  ;;  %v13270_v42 = vld [vmem:[#allocation91_spill] sm:$0xff] }
 0x3b5   : > { %v5511_v21 = vadd.f32 %v5510_v37, %v5186_v54  ;;  %v5202_v28 = vmul.f32 %v13267_v15, %v3674_v32  ;;  %v3676_v33 = vpop.f32.mrb[79].mxu0  ;;  %v11577_v12 = vpop.trf.xlu0  ;;  %v13272_v11 = vld [vmem:[#allocation11_spill] sm:$0xff] }
 0x3b6   : > { %5890 = vst [vmem:[%s11560_s7] sm:$0xff] %v5838_v60  ;;  %v3783_v58 = vpop.f32.mrb[76].mxu1  ;;  %v5532_v49 = vadd.f32 %v5531_v45, %v5187_v59  ;;  %v5203_v55 = vmul.f32 %v13269_v22, %v3676_v33 }
 0x3b7   : > { %v5188_v5 = vmul.f32 %v13264_v35, %v3783_v58  ;;  %v3785_v39 = vpop.f32.mrb[77].mxu1  ;;  %v5512_v16 = vadd.f32 %v5511_v21, %v5202_v28  ;;  %v13275_v28 = vld [vmem:[#allocation124_spill] sm:$0xff] }
 0x3b8   : > { %v5189_v29 = vmul.f32 %v13266_v56, %v3785_v39  ;;  %v3787_v1 = vpop.f32.mrb[78].mxu1  ;;  %v5533_v41 = vadd.f32 %v5532_v49, %v5203_v55  ;;  %v11579_v4 = vpop.trf.xlu1  ;;  %v13273_v39 = vld [vmem:[#allocation123_spill] sm:$0xff]  ;;  %v13277_v55 = vld [vmem:[#allocation125_spill] sm:$0xff] }
 0x3b9   : > { %v5553_v25 = vadd.f32 %v5552_v26, %v5188_v5  ;;  %v5204_v30 = vmul.f32 %v13268_v40, %v3787_v1  ;;  %v3789_v2 = vpop.f32.mrb[79].mxu1  ;;  %v13271_v26 = vld [vmem:[#allocation122_spill] sm:$0xff] }
 0x3ba   : > { %v5574_v47 = vadd.f32 %v5573_v34, %v5189_v29  ;;  %v5205_v60 = vmul.f32 %v13270_v42, %v3789_v2  ;;  %v3680_v58 = vpop.f32.mrb[80].mxu0  ;;  %v13274_v29 = vld [vmem:[#allocation92_spill] sm:$0xff]  ;;  %v11588_v42 = vpop.trf.xlu0 }
 0x3bb   : > { %v5554_v37 = vadd.f32 %v5553_v25, %v5204_v30  ;;  %v5218_v45 = vmul.f32 %v13271_v26, %v3680_v58  ;;  %v3682_v5 = vpop.f32.mrb[81].mxu0  ;;  %v13276_v30 = vld [vmem:[#allocation12_spill] sm:$0xff] }
 0x3bc   : > { %v5575_v54 = vadd.f32 %v5574_v47, %v5205_v60  ;;  %v5219_v32 = vmul.f32 %v13273_v39, %v3682_v5  ;;  %v3684_v21 = vpop.f32.mrb[82].mxu0 }
 0x3bd   : > { %v5513_v56 = vadd.f32 %v5512_v16, %v5218_v45  ;;  %v5234_v1 = vmul.f32 %v13275_v28, %v3684_v21  ;;  %v3686_v25 = vpop.f32.mrb[83].mxu0  ;;  %v11591_v16 = vpop.trf.xlu1  ;;  %v13279_v21 = vld [vmem:[#allocation127_spill] sm:$0xff]  ;;  %v13280_v28 = vld [vmem:[#allocation128_spill] sm:$0xff] }
 0x3be   : > { %v3793_v35 = vpop.f32.mrb[80].mxu1  ;;  %v5534_v40 = vadd.f32 %v5533_v41, %v5219_v32  ;;  %v5235_v2 = vmul.f32 %v13277_v55, %v3686_v25  ;;  %v11593_v39 = vpop.trf.xlu0 }
 0x3bf   : > { %v5220_v59 = vmul.f32 %v13272_v11, %v3793_v35  ;;  %v3795_v34 = vpop.f32.mrb[81].mxu1  ;;  %v5514_v58 = vadd.f32 %v5513_v56, %v5234_v1 }
 0x3c0   : > { %v5221_v15 = vmul.f32 %v13274_v29, %v3795_v34  ;;  %v3797_v33 = vpop.f32.mrb[82].mxu1  ;;  %v5535_v35 = vadd.f32 %v5534_v40, %v5235_v2 }
 0x3c1   : > { %v5555_v49 = vadd.f32 %v5554_v37, %v5220_v59  ;;  %v5236_v22 = vmul.f32 %v13276_v30, %v3797_v33  ;;  %v3799_v47 = vpop.f32.mrb[83].mxu1  ;;  %v13278_v37 = vld [vmem:[#allocation126_spill] sm:$0xff]  ;;  %v11600_v25 = vpop.trf.xlu1 }
 0x3c2   : > { %v5576_v60 = vadd.f32 %v5575_v54, %v5221_v15  ;;  %v5237_v26 = vmul.f32 %v11397_v46, %v3799_v47  ;;  %v3690_v11 = vpop.f32.mrb[84].mxu0  ;;  %v13281_v47 = vld [vmem:[#allocation129_spill] sm:$0xff] }
 0x3c3   : > { %v5556_v45 = vadd.f32 %v5555_v49, %v5236_v22  ;;  %v5250_v41 = vmul.f32 %v13278_v37, %v3690_v11  ;;  %v3692_v32 = vpop.f32.mrb[85].mxu0 }
 0x3c4   : > { %v5577_v5 = vadd.f32 %v5576_v60, %v5237_v26  ;;  %v5251_v29 = vmul.f32 %v13279_v21, %v3692_v32  ;;  %v3694_v56 = vpop.f32.mrb[86].mxu0 }
 0x3c5   : > { %v5515_v15 = vadd.f32 %v5514_v58, %v5250_v41  ;;  %v5266_v1 = vmul.f32 %v13280_v28, %v3694_v56  ;;  %v3696_v22 = vpop.f32.mrb[87].mxu0  ;;  %v11605_v58 = vpop.trf.xlu0 }
 0x3c6   : > { %v3803_v59 = vpop.f32.mrb[84].mxu1  ;;  %v5536_v40 = vadd.f32 %v5535_v35, %v5251_v29  ;;  %v5267_v60 = vmul.f32 %v13281_v47, %v3696_v22  ;;  %v11607_v41 = vpop.trf.xlu1 }
 0x3c7   : > { %v5252_v34 = vmul.f32 %v11404_v8, %v3803_v59  ;;  %v3805_v54 = vpop.f32.mrb[85].mxu1  ;;  %v5516_v8 = vadd.f32 %v5515_v15, %v5266_v1 }
 0x3c8   : > { %v5253_v46 = vmul.f32 %v11410_v9, %v3805_v54  ;;  %v3807_v33 = vpop.f32.mrb[86].mxu1  ;;  %v5537_v11 = vadd.f32 %v5536_v40, %v5267_v60 }
 0x3c9   : > { %v5557_v49 = vadd.f32 %v5556_v45, %v5252_v34  ;;  %v5268_v30 = vmul.f32 %v11426_v13, %v3807_v33  ;;  %v3809_v55 = vpop.f32.mrb[87].mxu1  ;;  %v13282_v45 = vld [vmem:[#allocation130_spill] sm:$0xff]  ;;  %v11612_v54 = vpop.trf.xlu0  ;;  %v13284_v33 = vld [vmem:[#allocation69_spill] sm:$0xff] }
 0x3ca   : > { %v5578_v2 = vadd.f32 %v5577_v5, %v5253_v46  ;;  %v5269_v26 = vmul.f32 %v11429_v24, %v3809_v55  ;;  %v3700_v59 = vpop.f32.mrb[88].mxu0  ;;  %v13283_v5 = vld [vmem:[#allocation131_spill] sm:$0xff]  ;;  %v13285_v55 = vld [vmem:[#allocation82_spill] sm:$0xff] }
 0x3cb   : > { %v5558_v9 = vadd.f32 %v5557_v49, %v5268_v30  ;;  %v5282_v35 = vmul.f32 %v13282_v45, %v3700_v59  ;;  %v3702_v13 = vpop.f32.mrb[89].mxu0  ;;  %v11617_v30 = vpop.trf.xlu1 }
 0x3cc   : > { %v5579_v37 = vadd.f32 %v5578_v2, %v5269_v26  ;;  %v5283_v21 = vmul.f32 %v13283_v5, %v3702_v13  ;;  %v3704_v15 = vpop.f32.mrb[90].mxu0 }
 0x3cd   : > { %v5517_v24 = vadd.f32 %v5516_v8, %v5282_v35  ;;  %v5298_v49 = vmul.f32 %v13284_v33, %v3704_v15  ;;  %v3706_v22 = vpop.f32.mrb[91].mxu0  ;;  %v13287_v35 = vld [vmem:[#allocation108_spill] sm:$0xff] }
 0x3ce   : > { %v3813_v32 = vpop.f32.mrb[88].mxu1  ;;  %v5538_v1 = vadd.f32 %v5537_v11, %v5283_v21  ;;  %v5299_v2 = vmul.f32 %v13285_v55, %v3706_v22 }
 0x3cf   : > { %v5284_v34 = vmul.f32 %v11431_v44, %v3813_v32  ;;  %v3815_v29 = vpop.f32.mrb[89].mxu1  ;;  %v5518_v60 = vadd.f32 %v5517_v24, %v5298_v49  ;;  %v11623_v11 = vpop.trf.xlu1 }
 0x3d0   : > { %v5285_v56 = vmul.f32 %v11440_v31, %v3815_v29  ;;  %v3817_v46 = vpop.f32.mrb[90].mxu1  ;;  %v11621_v31 = vpop.trf.xlu0  ;;  %v5539_v59 = vadd.f32 %v5538_v1, %v5299_v2  ;;  %13286 = vst [vmem:[#allocation13_spill] sm:$0xff] %v11623_v11  ;;  %v13290_v1 = vld [vmem:[#allocation83_spill] sm:$0xff] }
 0x3d1   : > { %v5559_v28 = vadd.f32 %v5558_v9, %v5284_v34  ;;  %v5300_v40 = vmul.f32 %v11443_v43, %v3817_v46  ;;  %v3819_v47 = vpop.f32.mrb[91].mxu1  ;;  %v13288_v34 = vld [vmem:[#allocation70_spill] sm:$0xff] }
 0x3d2   : > { %v5580_v44 = vadd.f32 %v5579_v37, %v5285_v56  ;;  %v5301_v8 = vmul.f32 %v11445_v20, %v3819_v47  ;;  %v3710_v45 = vpop.f32.mrb[92].mxu0 }
 0x3d3   : > { %v5560_v26 = vadd.f32 %v5559_v28, %v5300_v40  ;;  %v5314_v43 = vmul.f32 %v13287_v35, %v3710_v45  ;;  %v3712_v13 = vpop.f32.mrb[93].mxu0  ;;  %v11633_v40 = vpop.trf.xlu1 }
 0x3d4   : > { %v5581_v9 = vadd.f32 %v5580_v44, %v5301_v8  ;;  %v5315_v5 = vmul.f32 %v13288_v34, %v3712_v13  ;;  %v11628_v29 = vpop.trf.xlu0  ;;  %v3714_v56 = vpop.f32.mrb[94].mxu0  ;;  %13291 = vst [vmem:[#allocation14_spill] sm:$0xff] %v11633_v40  ;;  %v13292_v44 = vld [vmem:[#allocation109_spill] sm:$0xff]  ;;  %v11637_v8 = vld [vmem:[%s11337_s5 + $0x8] sm:$0xff] }
 0x3d5   : > { %13289 = vst [vmem:[#allocation94_spill] sm:$0xff] %v11628_v29  ;;  %v5519_v20 = vadd.f32 %v5518_v60, %v5314_v43  ;;  %v5330_v33 = vmul.f32 %v13290_v1, %v3714_v56  ;;  %v13293_v13 = vld [vmem:[#allocation5_spill] sm:$0xff] }
 0x3d6   : > { %v3823_v32 = vpop.f32.mrb[92].mxu1  ;;  %v5540_v28 = vadd.f32 %v5539_v59, %v5315_v5 }
 0x3d7   : > { %v5316_v37 = vmul.f32 %v11454_v18, %v3823_v32  ;;  %v3825_v21 = vpop.f32.mrb[93].mxu1  ;;  %v3716_v18 = vpop.f32.mrb[95].mxu0  ;;  %v5520_v47 = vadd.f32 %v5519_v20, %v5330_v33 }
 0x3d8   : > { %v5317_v24 = vmul.f32 %v11457_v0, %v3825_v21  ;;  %v3827_v15 = vpop.f32.mrb[94].mxu1  ;;  %v5331_v55 = vmul.f32 %v13292_v44, %v3716_v18  ;;  %v5034_v45 = vpop.trf.xlu0 }
 0x3d9   : > { %v5561_v46 = vadd.f32 %v5560_v26, %v5316_v37  ;;  %v5332_v49 = vmul.f32 %v11459_v62, %v3827_v15  ;;  %v3829_v2 = vpop.f32.mrb[95].mxu1  ;;  %v5521_v59 = vrot.slane %v5520_v47, 4  ;;  %v5066_v32 = vpop.trf.xlu1  ;;  %v5713_v37 = vrot.slane %v11637_v8, %v13293_v13 }
 0x3da   : > { %v5582_v22 = vadd.f32 %v5581_v9, %v5317_v24  ;;  %v5333_v0 = vmul.f32 %v11468_v53, %v3829_v2  ;;  %v5541_v26 = vadd.f32 %v5540_v28, %v5331_v55  ;;  %v3866_v62 = vpop.f32.mrb[96].mxu0  ;;  %v13294_v24 = vld [vmem:[#allocation6_spill] sm:$0xff] }
 0x3db   : > { %v5562_v60 = vadd.f32 %v5561_v46, %v5332_v49  ;;  %v3868_v5 = vpop.f32.mrb[97].mxu0  ;;  %v5522_v21 = vadd.f32 %v5521_v59, %v5520_v47  ;;  %v5721_v56 = vrot.slane %v11637_v8, %v13294_v24  ;;  %v5094_v1 = vmul.f32 %v11471_v61, %v3866_v62 }
 0x3dc   : > { %v5583_v43 = vadd.f32 %v5582_v22, %v5333_v0  ;;  %v5542_v9 = vrot.slane %v5541_v26, 4  ;;  %v5035_v46 = vpop.trf.xlu0  ;;  %v5095_v49 = vmul.f32 %v11473_v38, %v3868_v5  ;;  %v3870_v18 = vpop.f32.mrb[98].mxu0 }
 0x3dd   : > { %v5563_v35 = vrot.slane %v5562_v60, 4  ;;  %v5523_v44 = vrot.slane %v5522_v21, 2  ;;  %v5110_v47 = vmul.f32 %v11482_v14, %v3870_v18  ;;  %v3872_v0 = vpop.f32.mrb[99].mxu0  ;;  %v13295_v14 = vld [vmem:[#allocation3_spill] sm:$0xff] }
 0x3de   : > { %v3979_v34 = vpop.f32.mrb[96].mxu1  ;;  %v5584_v15 = vrot.slane %v5583_v43, 4  ;;  %v5543_v28 = vadd.f32 %v5542_v9, %v5541_v26  ;;  %v5111_v24 = vmul.f32 %v11485_v27, %v3872_v0  ;;  %v5717_v18 = vrot.slane %v11637_v8, %v13295_v14  ;;  %v13296_v27 = vld [vmem:[#allocation4_spill] sm:$0xff] }
 0x3df   : > { %v5564_v20 = vadd.f32 %v5563_v35, %v5562_v60  ;;  %v3981_v53 = vpop.f32.mrb[97].mxu1  ;;  %v5096_v33 = vmul.f32 %v5034_v45, %v3979_v34  ;;  %v5067_v60 = vpop.trf.xlu1  ;;  %v5524_v9 = vadd.f32 %v5523_v44, %v5522_v21  ;;  %v5590_v62 = vadd.f32 %v5110_v47, %v5094_v1 }
 0x3e0   : > { %v3983_v22 = vpop.f32.mrb[98].mxu1  ;;  %v5585_v2 = vadd.f32 %v5584_v15, %v5583_v43  ;;  %v5544_v59 = vrot.slane %v5543_v28, 2  ;;  %v5097_v35 = vmul.f32 %v5066_v32, %v3981_v53  ;;  %v5036_v38 = vpop.trf.xlu0  ;;  %v5611_v40 = vadd.f32 %v5111_v24, %v5095_v49 }
 0x3e1   : > { %v5565_v55 = vrot.slane %v5564_v20, 2  ;;  %v5112_v13 = vmul.f32 %v5035_v46, %v3983_v22  ;;  %v3985_v26 = vpop.f32.mrb[99].mxu1  ;;  %v5525_v43 = vrot.slane %v5524_v9, 1  ;;  %v5725_v21 = vrot.slane %v11637_v8, %v13296_v27 }
 0x3e2   : > { %v5586_v45 = vrot.slane %v5585_v2, 2  ;;  %v5545_v34 = vadd.f32 %v5544_v59, %v5543_v28  ;;  %v5113_v29 = vmul.f32 %v5067_v60, %v3985_v26  ;;  %v3876_v53 = vpop.f32.mrb[100].mxu0 }
 0x3e3   : > { %v5566_v61 = vadd.f32 %v5565_v55, %v5564_v20  ;;  %v5632_v5 = vadd.f32 %v5112_v13, %v5096_v33  ;;  %v5068_v32 = vpop.trf.xlu1  ;;  %v5126_v1 = vmul.f32 %v11487_v48, %v3876_v53  ;;  %v3878_v28 = vpop.f32.mrb[101].mxu0  ;;  %v5526_v33 = vadd.f32 %v5525_v43, %v5524_v9 }
 0x3e4   : > { %v5587_v11 = vadd.f32 %v5586_v45, %v5585_v2  ;;  %v5546_v46 = vrot.slane %v5545_v34, 1  ;;  %v5653_v20 = vadd.f32 %v5113_v29, %v5097_v35  ;;  %v5037_v60 = vpop.trf.xlu0  ;;  %v5127_v2 = vmul.f32 %v11496_v51, %v3878_v28  ;;  %v3880_v24 = vpop.f32.mrb[102].mxu0 }
 0x3e5   : > { %v5567_v15 = vrot.slane %v5566_v61, 1  ;;  %v5591_v59 = vadd.f32 %v5590_v62, %v5126_v1  ;;  %v5766_v45 = vadd.f32 %v5713_v37, %v5526_v33  ;;  %v3882_v53 = vpop.f32.mrb[103].mxu0 }
 0x3e6   : > { %v3989_v22 = vpop.f32.mrb[100].mxu1  ;;  %v5588_v44 = vrot.slane %v5587_v11, 1  ;;  %v5547_v0 = vadd.f32 %v5546_v46, %v5545_v34  ;;  %v5612_v9 = vadd.f32 %v5611_v40, %v5127_v2  ;;  %v5143_v62 = vmul.f32 %v11501_v36, %v3882_v53 }
 0x3e7   : > { %v5568_v49 = vadd.f32 %v5567_v15, %v5566_v61  ;;  %v5128_v55 = vmul.f32 %v5036_v38, %v3989_v22  ;;  %v3991_v47 = vpop.f32.mrb[101].mxu1  ;;  %v5069_v48 = vpop.trf.xlu1  ;;  %v5142_v38 = vmul.f32 %v11499_v57, %v3880_v24 }
 0x3e8   : > { %v5129_v13 = vmul.f32 %v5068_v32, %v3991_v47  ;;  %v3993_v26 = vpop.f32.mrb[102].mxu1  ;;  %v5589_v29 = vadd.f32 %v5588_v44, %v5587_v11  ;;  %v5767_v27 = vadd.f32 %v5717_v18, %v5547_v0  ;;  %v5038_v32 = vpop.trf.xlu0  ;;  %v5613_v11 = vadd.f32 %v5612_v9, %v5143_v62 }
 0x3e9   : > { %v5768_v14 = vadd.f32 %v5721_v56, %v5568_v49  ;;  %v5633_v35 = vadd.f32 %v5632_v5, %v5128_v55  ;;  %v3995_v43 = vpop.f32.mrb[103].mxu1  ;;  %v5144_v34 = vmul.f32 %v5037_v60, %v3993_v26  ;;  %v5592_v1 = vadd.f32 %v5591_v59, %v5142_v38 }
 0x3ea   : > { %v5654_v61 = vadd.f32 %v5653_v20, %v5129_v13  ;;  %v5769_v15 = vadd.f32 %v5725_v21, %v5589_v29  ;;  %v5145_v51 = vmul.f32 %v5069_v48, %v3995_v43  ;;  %v5839_v46 = vcombine.low %v5766_v45, %v5767_v27  ;;  %v3886_v28 = vpop.f32.mrb[104].mxu0 }
 0x3eb   : > { %v5634_v56 = vadd.f32 %v5633_v35, %v5144_v34  ;;  %v5070_v22 = vpop.trf.xlu1  ;;  %v5158_v57 = vmul.f32 %v11510_v50, %v3886_v28  ;;  %v3888_v21 = vpop.f32.mrb[105].mxu0  ;;  %v13297_v50 = vld [vmem:[#allocation93_spill] sm:$0xff] }
 0x3ec   : > { %v5840_v37 = vcombine.low %v5768_v14, %v5769_v15  ;;  %v5655_v5 = vadd.f32 %v5654_v61, %v5145_v51  ;;  %v11657_v40 = vrot.slane %v5839_v46, %v11386_v19  ;;  %v5159_v33 = vmul.f32 %v11513_v23, %v3888_v21  ;;  %v5039_v44 = vpop.trf.xlu0  ;;  %v3890_v60 = vpop.f32.mrb[106].mxu0 }
 0x3ed   : > { %v5593_v55 = vadd.f32 %v5592_v1, %v5158_v57  ;;  %v5174_v24 = vmul.f32 %v13297_v50, %v3890_v60  ;;  %v3892_v45 = vpop.f32.mrb[107].mxu0 }
 0x3ee   : > { %v3999_v18 = vpop.f32.mrb[104].mxu1  ;;  %v11661_v20 = vrot.slane %v5840_v37, %v11386_v19  ;;  %v5614_v13 = vadd.f32 %v5613_v11, %v5159_v33  ;;  %v5175_v35 = vmul.f32 %v11529_v7, %v3892_v45 }
 0x3ef   : > { %v5160_v36 = vmul.f32 %v5038_v32, %v3999_v18  ;;  %v4001_v49 = vpop.f32.mrb[105].mxu1  ;;  %v5071_v26 = vpop.trf.xlu1  ;;  %v5594_v48 = vadd.f32 %v5593_v55, %v5174_v24 }
 0x3f0   : > { %v5161_v47 = vmul.f32 %v5070_v22, %v4001_v49  ;;  %v4003_v0 = vpop.f32.mrb[106].mxu1  ;;  %v5871_v59 = vcombine.low %v11657_v40, %v11661_v20  ;;  %v5040_v27 = vpop.trf.xlu0  ;;  %v5615_v61 = vadd.f32 %v5614_v13, %v5175_v35 }
 0x3f1   : > { %v5635_v2 = vadd.f32 %v5634_v56, %v5160_v36  ;;  %v5176_v29 = vmul.f32 %v5039_v44, %v4003_v0  ;;  %v4005_v23 = vpop.f32.mrb[107].mxu1 }
 0x3f2   : > { %v5656_v14 = vadd.f32 %v5655_v5, %v5161_v47  ;;  %v5177_v53 = vmul.f32 %v5071_v26, %v4005_v23  ;;  %v3896_v15 = vpop.f32.mrb[108].mxu0 }
 0x3f3   : > { %v5636_v9 = vadd.f32 %v5635_v2, %v5176_v29  ;;  %v5072_v43 = vpop.trf.xlu1  ;;  %v5190_v34 = vmul.f32 %v11535_v52, %v3896_v15  ;;  %v3898_v51 = vpop.f32.mrb[109].mxu0 }
 0x3f4   : > { %v5657_v38 = vadd.f32 %v5656_v14, %v5177_v53  ;;  %v5191_v46 = vmul.f32 %v11538_v17, %v3898_v51  ;;  %v5041_v37 = vpop.trf.xlu0  ;;  %v3900_v11 = vpop.f32.mrb[110].mxu0 }
 0x3f5   : > { %v5595_v56 = vadd.f32 %v5594_v48, %v5190_v34  ;;  %v5206_v57 = vmul.f32 %v11552_v3, %v3900_v11  ;;  %v3902_v36 = vpop.f32.mrb[111].mxu0 }
 0x3f6   : > { %v4009_v62 = vpop.f32.mrb[108].mxu1  ;;  %v5616_v28 = vadd.f32 %v5615_v61, %v5191_v46  ;;  %v5207_v52 = vmul.f32 %v11562_v63, %v3902_v36 }
 0x3f7   : > { %v5192_v32 = vmul.f32 %v5040_v27, %v4009_v62  ;;  %v4011_v1 = vpop.f32.mrb[109].mxu1  ;;  %v5073_v21 = vpop.trf.xlu1  ;;  %v5596_v44 = vadd.f32 %v5595_v56, %v5206_v57 }
 0x3f8   : > { %v5193_v7 = vmul.f32 %v5072_v43, %v4011_v1  ;;  %v4013_v5 = vpop.f32.mrb[110].mxu1  ;;  %v5042_v47 = vpop.trf.xlu0  ;;  %v5617_v60 = vadd.f32 %v5616_v28, %v5207_v52 }
 0x3f9   : > { %v5637_v22 = vadd.f32 %v5636_v9, %v5192_v32  ;;  %v5208_v18 = vmul.f32 %v5041_v37, %v4013_v5  ;;  %v4015_v49 = vpop.f32.mrb[111].mxu1 }
 0x3fa   : > { %v5658_v33 = vadd.f32 %v5657_v38, %v5193_v7  ;;  %v5209_v17 = vmul.f32 %v5073_v21, %v4015_v49  ;;  %v3906_v13 = vpop.f32.mrb[112].mxu0 }
 0x3fb   : > { %v5638_v55 = vadd.f32 %v5637_v22, %v5208_v18  ;;  %v5074_v2 = vpop.trf.xlu1  ;;  %v5222_v50 = vmul.f32 %v11564_v10, %v3906_v13  ;;  %v3908_v26 = vpop.f32.mrb[113].mxu0 }
 0x3fc   : > { %v5659_v0 = vadd.f32 %v5658_v33, %v5209_v17  ;;  %v5223_v45 = vmul.f32 %v11574_v6, %v3908_v26  ;;  %v5043_v29 = vpop.trf.xlu0  ;;  %v3910_v23 = vpop.f32.mrb[114].mxu0 }
 0x3fd   : > { %v5597_v35 = vadd.f32 %v5596_v44, %v5222_v50  ;;  %v5238_v9 = vmul.f32 %v11577_v12, %v3910_v23  ;;  %v3912_v43 = vpop.f32.mrb[115].mxu0 }
 0x3fe   : > { %v4019_v24 = vpop.f32.mrb[112].mxu1  ;;  %v5618_v27 = vadd.f32 %v5617_v60, %v5223_v45  ;;  %v5239_v10 = vmul.f32 %v11579_v4, %v3912_v43 }
 0x3ff   : > { %v5224_v3 = vmul.f32 %v5042_v47, %v4019_v24  ;;  %v4021_v14 = vpop.f32.mrb[113].mxu1  ;;  %v5075_v38 = vpop.trf.xlu1  ;;  %v5598_v62 = vadd.f32 %v5597_v35, %v5238_v9 }
 0x400   : > { %v5225_v63 = vmul.f32 %v5074_v2, %v4021_v14  ;;  %v4023_v48 = vpop.f32.mrb[114].mxu1  ;;  %v5044_v32 = vpop.trf.xlu0  ;;  %v5619_v46 = vadd.f32 %v5618_v27, %v5239_v10 }
 0x401   : > { %v5639_v53 = vadd.f32 %v5638_v55, %v5224_v3  ;;  %v5240_v61 = vmul.f32 %v5043_v29, %v4023_v48  ;;  %v4025_v34 = vpop.f32.mrb[115].mxu1 }
 0x402   : > { %v5660_v15 = vadd.f32 %v5659_v0, %v5225_v63  ;;  %v5241_v6 = vmul.f32 %v5075_v38, %v4025_v34  ;;  %v3916_v56 = vpop.f32.mrb[116].mxu0 }
 0x403   : > { %v5640_v51 = vadd.f32 %v5639_v53, %v5240_v61  ;;  %v5076_v37 = vpop.trf.xlu1  ;;  %v5254_v7 = vmul.f32 %v11588_v42, %v3916_v56  ;;  %v3918_v5 = vpop.f32.mrb[117].mxu0 }
 0x404   : > { %v5661_v1 = vadd.f32 %v5660_v15, %v5241_v6  ;;  %v5255_v22 = vmul.f32 %v11591_v16, %v3918_v5  ;;  %v5045_v57 = vpop.trf.xlu0  ;;  %v3920_v21 = vpop.f32.mrb[118].mxu0 }
 0x405   : > { %v5599_v18 = vadd.f32 %v5598_v62, %v5254_v7  ;;  %v5270_v49 = vmul.f32 %v11593_v39, %v3920_v21  ;;  %v3922_v17 = vpop.f32.mrb[119].mxu0 }
 0x406   : > { %v4029_v11 = vpop.f32.mrb[116].mxu1  ;;  %v5620_v52 = vadd.f32 %v5619_v46, %v5255_v22  ;;  %v5271_v42 = vmul.f32 %v11600_v25, %v3922_v17 }
 0x407   : > { %v5256_v12 = vmul.f32 %v5044_v32, %v4029_v11  ;;  %v4031_v28 = vpop.f32.mrb[117].mxu1  ;;  %v5077_v55 = vpop.trf.xlu1  ;;  %v5600_v0 = vadd.f32 %v5599_v18, %v5270_v49 }
 0x408   : > { %v5257_v4 = vmul.f32 %v5076_v37, %v4031_v28  ;;  %v4033_v36 = vpop.f32.mrb[118].mxu1  ;;  %v5046_v13 = vpop.trf.xlu0  ;;  %v5621_v50 = vadd.f32 %v5620_v52, %v5271_v42  ;;  %v13299_v52 = vld [vmem:[#allocation94_spill] sm:$0xff] }
 0x409   : > { %v5641_v33 = vadd.f32 %v5640_v51, %v5256_v12  ;;  %v5272_v44 = vmul.f32 %v5045_v57, %v4033_v36  ;;  %v4035_v60 = vpop.f32.mrb[119].mxu1  ;;  %v13298_v12 = vld [vmem:[#allocation13_spill] sm:$0xff] }
 0x40a   : > { %v5662_v47 = vadd.f32 %v5661_v1, %v5257_v4  ;;  %v5273_v16 = vmul.f32 %v5077_v55, %v4035_v60  ;;  %v3926_v3 = vpop.f32.mrb[120].mxu0 }
 0x40b   : > { %v5642_v2 = vadd.f32 %v5641_v33, %v5272_v44  ;;  %v5078_v26 = vpop.trf.xlu1  ;;  %v5286_v45 = vmul.f32 %v11605_v58, %v3926_v3  ;;  %v3928_v29 = vpop.f32.mrb[121].mxu0 }
 0x40c   : > { %v5663_v24 = vadd.f32 %v5662_v47, %v5273_v16  ;;  %v5287_v35 = vmul.f32 %v11607_v41, %v3928_v29  ;;  %v5047_v23 = vpop.trf.xlu0  ;;  %v3930_v53 = vpop.f32.mrb[122].mxu0 }
 0x40d   : > { %v5601_v48 = vadd.f32 %v5600_v0, %v5286_v45  ;;  %v5302_v38 = vmul.f32 %v11612_v54, %v3930_v53  ;;  %v3932_v10 = vpop.f32.mrb[123].mxu0 }
 0x40e   : > { %v4039_v14 = vpop.f32.mrb[120].mxu1  ;;  %v5622_v61 = vadd.f32 %v5621_v50, %v5287_v35  ;;  %v5303_v58 = vmul.f32 %v11617_v30, %v3932_v10  ;;  %v13302_v10 = vld [vmem:[#allocation28_spill] sm:$0xff] }
 0x40f   : > { %v5288_v39 = vmul.f32 %v5046_v13, %v4039_v14  ;;  %v4041_v63 = vpop.f32.mrb[121].mxu1  ;;  %v5079_v15 = vpop.trf.xlu1  ;;  %v5602_v51 = vadd.f32 %v5601_v48, %v5302_v38 }
 0x410   : > { %v5289_v25 = vmul.f32 %v5078_v26, %v4041_v63  ;;  %v4043_v27 = vpop.f32.mrb[122].mxu1  ;;  %v5048_v32 = vpop.trf.xlu0  ;;  %v5623_v46 = vadd.f32 %v5622_v61, %v5303_v58 }
 0x411   : > { %v5643_v9 = vadd.f32 %v5642_v2, %v5288_v39  ;;  %v5304_v43 = vmul.f32 %v5047_v23, %v4043_v27  ;;  %v4045_v62 = vpop.f32.mrb[123].mxu1 }
 0x412   : > { %v5664_v34 = vadd.f32 %v5663_v24, %v5289_v25  ;;  %v5305_v41 = vmul.f32 %v5079_v15, %v4045_v62  ;;  %v3936_v56 = vpop.f32.mrb[124].mxu0 }
 0x413   : > { %v5644_v6 = vadd.f32 %v5643_v9, %v5304_v43  ;;  %v5080_v37 = vpop.trf.xlu1  ;;  %v5318_v7 = vmul.f32 %v11621_v31, %v3936_v56  ;;  %v3938_v5 = vpop.f32.mrb[125].mxu0  ;;  %v13300_v31 = vld [vmem:[#allocation14_spill] sm:$0xff] }
 0x414   : > { %v5665_v1 = vadd.f32 %v5664_v34, %v5305_v41  ;;  %v5319_v22 = vmul.f32 %v13298_v12, %v3938_v5  ;;  %v5049_v57 = vpop.trf.xlu0  ;;  %v3940_v4 = vpop.f32.mrb[126].mxu0  ;;  %v13301_v9 = vld [vmem:[#allocation26_spill] sm:$0xff]  ;;  %v5737_v34 = vrot.slane %v11637_v8, %v13302_v10 }
 0x415   : > { %v5603_v18 = vadd.f32 %v5602_v51, %v5318_v7  ;;  %v5334_v49 = vmul.f32 %v13299_v52, %v3940_v4  ;;  %v3942_v17 = vpop.f32.mrb[127].mxu0  ;;  %v5729_v61 = vrot.slane %v11637_v8, %v13301_v9  ;;  %v13303_v51 = vld [vmem:[#allocation22_spill] sm:$0xff]  ;;  %v5879_v4 = vrot.slane %v5871_v59, %v11386_v19 }
 0x416   : > { %v4049_v11 = vpop.f32.mrb[124].mxu1  ;;  %v5624_v33 = vadd.f32 %v5623_v46, %v5319_v22  ;;  %v5335_v42 = vmul.f32 %v13300_v31, %v3942_v17 }
 0x417   : > { %v5320_v54 = vmul.f32 %v5048_v32, %v4049_v11  ;;  %v4051_v28 = vpop.f32.mrb[125].mxu1  ;;  %v5081_v55 = vpop.trf.xlu1  ;;  %v5604_v0 = vadd.f32 %v5603_v18, %v5334_v49 }
 0x418   : > { %v5321_v30 = vmul.f32 %v5080_v37, %v4051_v28  ;;  %v4053_v21 = vpop.f32.mrb[126].mxu1  ;;  %v5625_v13 = vadd.f32 %v5624_v33, %v5335_v42 }
 0x419   : > { %v5645_v36 = vadd.f32 %v5644_v6, %v5320_v54  ;;  %v5336_v44 = vmul.f32 %v5049_v57, %v4053_v21  ;;  %v4055_v60 = vpop.f32.mrb[127].mxu1  ;;  %v5605_v50 = vrot.slane %v5604_v0, 4  ;;  %v5733_v6 = vrot.slane %v11637_v8, %v13303_v51 }
 0x41a   : > { %v5666_v47 = vadd.f32 %v5665_v1, %v5321_v30  ;;  %v5337_v16 = vmul.f32 %v5081_v55, %v4055_v60  ;;  %v5626_v3 = vrot.slane %v5625_v13, 4  ;;  %v13304_v1 = vld [vmem:[#allocation24_spill] sm:$0xff] }
 0x41b   : > { %v5646_v2 = vadd.f32 %v5645_v36, %v5336_v44  ;;  %v5606_v45 = vadd.f32 %v5605_v50, %v5604_v0  ;;  %v5741_v37 = vrot.slane %v11637_v8, %v13304_v1 }
 0x41c   : > { %v5667_v26 = vadd.f32 %v5666_v47, %v5337_v16  ;;  %v5627_v39 = vadd.f32 %v5626_v3, %v5625_v13 }
 0x41d   : > { %v5647_v24 = vrot.slane %v5646_v2, 4  ;;  %v5607_v35 = vrot.slane %v5606_v45, 2 }
 0x41e   : > { %v5668_v29 = vrot.slane %v5667_v26, 4  ;;  %v5628_v48 = vrot.slane %v5627_v39, 2 }
 0x41f   : > { %v5648_v14 = vadd.f32 %v5647_v24, %v5646_v2  ;;  %v5608_v25 = vadd.f32 %v5607_v35, %v5606_v45 }
 0x420   : > { %v5669_v23 = vadd.f32 %v5668_v29, %v5667_v26  ;;  %v5629_v38 = vadd.f32 %v5628_v48, %v5627_v39 }
 0x421   : > { %v5649_v63 = vrot.slane %v5648_v14, 2  ;;  %v5609_v43 = vrot.slane %v5608_v25, 1 }
 0x422   : > { %v5670_v27 = vrot.slane %v5669_v23, 2  ;;  %v5630_v62 = vrot.slane %v5629_v38, 1 }
 0x423   : > { %v5650_v53 = vadd.f32 %v5649_v63, %v5648_v14  ;;  %v5610_v41 = vadd.f32 %v5609_v43, %v5608_v25 }
 0x424   : > { %v5671_v58 = vadd.f32 %v5670_v27, %v5669_v23  ;;  %v5631_v56 = vadd.f32 %v5630_v62, %v5629_v38 }
 0x425   : > { %v5651_v15 = vrot.slane %v5650_v53, 1  ;;  %v5770_v7 = vadd.f32 %v5729_v61, %v5610_v41 }
 0x426   : > { %v5672_v46 = vrot.slane %v5671_v58, 1  ;;  %v5771_v54 = vadd.f32 %v5733_v6, %v5631_v56 }
 0x427   : > { %v5652_v32 = vadd.f32 %v5651_v15, %v5650_v53 }
 0x428   : > { %v5673_v5 = vadd.f32 %v5672_v46, %v5671_v58  ;;  %v5841_v22 = vcombine.low %v5770_v7, %v5771_v54 }
 0x429   : > { %v5772_v11 = vadd.f32 %v5737_v34, %v5652_v32 }
 0x42a   : > { %v5773_v12 = vadd.f32 %v5741_v37, %v5673_v5  ;;  %v5863_v57 = vrot.slane %v5841_v22, %v11386_v19 }
 0x42c   : > { %v5842_v28 = vcombine.low %v5772_v11, %v5773_v12 }
 0x42e   : > { %v5870_v18 = vrot.slane %v5842_v28, %v11386_v19 }
 0x430   : > { %v5872_v30 = vcombine.low %v5863_v57, %v5870_v18 }
 0x432   : > { %v5886_v8 = vrot.slane %v5872_v30, %v11386_v19 }
 0x434   : > { %v5887_v21 = vcombine.low %v5879_v4, %v5886_v8 }
 0x436   : > { %5891 = vst [vmem:[%s11560_s7 + $0x8] sm:$0xff] %v5887_v21 }
 0x437 PF: > { %s14_s15 = sadd.s32 1, %s7583_s15  }
 0x438   : > { %p11_p5 = scmp.ge.s32.totalorder %s14_s15, 4  }
 0x43a   :  { %13 = sbr.rel (!%p11_p5) target bundleno = 1 (0x1), region = 74 }

</bundles_post_ra>
